<compile_context>
chip_gen: v5e
topology: v5e:2x2
jax: 0.10.0
libtpu: 0.0.40
codegen_flags: <defaults>
</compile_context>

<pallas_src>
import functools
import math

import jax
import jax.numpy as jnp
from jax.experimental import pallas as pl
from jax.experimental.pallas import tpu as pltpu

HEAD_SIZE = 8
LN_EPS = 1e-6
NEG_INF = -1e9


# ----------------------------------------------------------------------------
# In-kernel helpers (pure f32 math on VMEM-resident values)
# ----------------------------------------------------------------------------
def _layernorm(x, g, b):
    mean = jnp.mean(x, axis=-1, keepdims=True)
    xc = x - mean
    var = jnp.mean(xc * xc, axis=-1, keepdims=True)
    return xc * jax.lax.rsqrt(var + LN_EPS) * g + b


def _attention(x, kv_src, add_mask, g, b, wq, wkv, wo):
    """Pre-LN multi-head attention + residual, all heads in one invocation.

    * 1/sqrt(dk) is folded into `wq` (prep-time).
    * `add_mask` is additive (-1e9 where masked), precomputed in the wrapper.
    * Output projection folded into the head loop -> no per-head concatenate.
    * `kv_src is None` => self-attention (reuse the normalized x, no extra DMA).
    """
    H = x.shape[-1]
    dk = H // HEAD_SIZE
    y = _layernorm(x, g, b)
    kv_in = y if kv_src is None else kv_src
    q = jnp.dot(y, wq, preferred_element_type=jnp.float32)          # (Tq, H) pre-scaled
    kvp = jnp.dot(kv_in, wkv, preferred_element_type=jnp.float32)   # (Tk, 2H)
    kt = kvp[:, :H].T                                               # (H, Tk), one transpose
    v = kvp[:, H:]                                                  # (Tk, H)

    out = jnp.zeros_like(x)
    for h in range(HEAD_SIZE):                                      # static unroll
        lo = h * dk
        s = jnp.dot(q[:, lo:lo + dk], kt[lo:lo + dk, :],
                    preferred_element_type=jnp.float32)             # (Tq, Tk)
        s = s + add_mask
        s = s - jnp.max(s, axis=-1, keepdims=True)
        p = jnp.exp(s)
        p = p * pl.reciprocal(jnp.sum(p, axis=-1, keepdims=True), approx=False)
        ctx = jnp.dot(p, v[:, lo:lo + dk], preferred_element_type=jnp.float32)
        out = out + jnp.dot(ctx, wo[lo:lo + dk, :],
                            preferred_element_type=jnp.float32)     # O-proj folded per head
    return x + out


def _ffn(x, g, b, w1, b1, w2, b2):
    y = _layernorm(x, g, b)
    h = jnp.maximum(jnp.dot(y, w1, preferred_element_type=jnp.float32) + b1, 0.0)
    return x + jnp.dot(h, w2, preferred_element_type=jnp.float32) + b2


# ----------------------------------------------------------------------------
# Single fused kernel: whole decoder stack for one batch element per grid step
# ----------------------------------------------------------------------------
def _decoder_stack_kernel(x_ref, enc_ref, smask_ref, imask_ref,
                          sa_g, sa_b, sa_wq, sa_wkv, sa_wo,
                          ed_g, ed_b, ed_wq, ed_wkv, ed_wo,
                          ff_g, ff_b, ff_w1, ff_b1, ff_w2, ff_b2,
                          last_g, last_b,
                          o_ref, *, n_layers, has_enc):
    x = x_ref[0].astype(jnp.float32)                     # (Tq, H)
    smask = smask_ref[0]                                 # (Tq, Tq) additive
    if has_enc:
        enc = enc_ref[0].astype(jnp.float32)             # (Tk, H)
        imask = imask_ref[0]                             # (Tq, Tk) additive

    for l in range(n_layers):                            # static unroll; weights stay in VMEM
        x = _attention(x, None, smask,
                       sa_g[l], sa_b[l], sa_wq[l], sa_wkv[l], sa_wo[l])
        if has_enc:
            x = _attention(x, enc, imask,
                           ed_g[l], ed_b[l], ed_wq[l], ed_wkv[l], ed_wo[l])
        x = _ffn(x, ff_g[l], ff_b[l], ff_w1[l], ff_b1[l], ff_w2[l], ff_b2[l])

    o_ref[0] = _layernorm(x, last_g[...], last_b[...]).astype(o_ref.dtype)


# ----------------------------------------------------------------------------
# Wrapper: one pallas_call for the whole forward pass
# ----------------------------------------------------------------------------
def decoder_forward(kp, targets, enc_output, i_mask, t_self_mask):
    B, Tq, H = targets.shape
    has_enc = enc_output is not None
    L = kp["sa_wq"].shape[0]

    # Additive masks, computed ONCE (identical for every layer and head).
    smask_add = jnp.where(jnp.asarray(t_self_mask, jnp.float32) > 0,
                          jnp.float32(NEG_INF), jnp.float32(0.0))
    if has_enc:
        enc_in = enc_output
        Tk = enc_output.shape[1]
        imask_add = jnp.where(jnp.asarray(i_mask, jnp.float32) > 0,
                              jnp.float32(NEG_INF), jnp.float32(0.0))
    else:
        Tk = Tq
        enc_in = jnp.zeros((B, Tk, H), targets.dtype)    # unused when has_enc=False
        imask_add = jnp.zeros((B, Tq, Tk), jnp.float32)  # unused when has_enc=False

    def batch3(t1, t2):
        return pl.BlockSpec((1, t1, t2), lambda b: (b, 0, 0))

    def const(shape):
        nd = len(shape)
        return pl.BlockSpec(tuple(shape), lambda b: (0,) * nd)

    in_specs = [
        batch3(Tq, H),                 # x
        batch3(Tk, H),                 # enc_output
        batch3(Tq, Tq),                # self mask (additive)
        batch3(Tq, Tk),                # enc-dec mask (additive)
        const(kp["sa_g"].shape), const(kp["sa_b"].shape),
        const(kp["sa_wq"].shape), const(kp["sa_wkv"].shape), const(kp["sa_wo"].shape),
        const(kp["ed_g"].shape), const(kp["ed_b"].shape),
        const(kp["ed_wq"].shape), const(kp["ed_wkv"].shape), const(kp["ed_wo"].shape),
        const(kp["ff_g"].shape), const(kp["ff_b"].shape),
        const(kp["ff_w1"].shape), const(kp["ff_b1"].shape),
        const(kp["ff_w2"].shape), const(kp["ff_b2"].shape),
        const(kp["last_g"].shape), const(kp["last_b"].shape),
    ]

    kernel = functools.partial(_decoder_stack_kernel, n_layers=L, has_enc=has_enc)

    return pl.pallas_call(
        kernel,
        out_shape=jax.ShapeDtypeStruct((B, Tq, H), targets.dtype),
        grid=(B,),
        in_specs=in_specs,
        out_specs=pl.BlockSpec((1, Tq, H), lambda b: (b, 0, 0)),
        compiler_params=pltpu.CompilerParams(
            dimension_semantics=("parallel",)),          # batch-parallel -> free 2x on v7x
    )(targets, enc_in, smask_add, imask_add,
      kp["sa_g"], kp["sa_b"], kp["sa_wq"], kp["sa_wkv"], kp["sa_wo"],
      kp["ed_g"], kp["ed_b"], kp["ed_wq"], kp["ed_wkv"], kp["ed_wo"],
      kp["ff_g"], kp["ff_b"], kp["ff_w1"], kp["ff_b1"], kp["ff_w2"], kp["ff_b2"],
      kp["last_g"], kp["last_b"])


# ----------------------------------------------------------------------------
# Deterministic parameter init (xavier_uniform, PyTorch (out,in) convention)
# and one-time kernel-side prep (transpose + K/V merge + scale fold + stack).
# ----------------------------------------------------------------------------
def xavier_uniform(key, out_f, in_f):
    limit = math.sqrt(6.0 / (in_f + out_f))
    return jax.random.uniform(key, (out_f, in_f), jnp.float32, -limit, limit)


def make_params(key, hidden, filt, n_layers):
    layers = []
    for _ in range(n_layers):
        keys = jax.random.split(key, 11)
        key = keys[0]
        lp = {
            "sa_ln_g": jnp.ones((hidden,), jnp.float32),
            "sa_ln_b": jnp.zeros((hidden,), jnp.float32),
            "sa": {
                "wq": xavier_uniform(keys[1], hidden, hidden),
                "wk": xavier_uniform(keys[2], hidden, hidden),
                "wv": xavier_uniform(keys[3], hidden, hidden),
                "wo": xavier_uniform(keys[4], hidden, hidden),
            },
            "ed_ln_g": jnp.ones((hidden,), jnp.float32),
            "ed_ln_b": jnp.zeros((hidden,), jnp.float32),
            "ed": {
                "wq": xavier_uniform(keys[5], hidden, hidden),
                "wk": xavier_uniform(keys[6], hidden, hidden),
                "wv": xavier_uniform(keys[7], hidden, hidden),
                "wo": xavier_uniform(keys[8], hidden, hidden),
            },
            "ffn_ln_g": jnp.ones((hidden,), jnp.float32),
            "ffn_ln_b": jnp.zeros((hidden,), jnp.float32),
            "ffn": {
                "w1": xavier_uniform(keys[9], filt, hidden),
                "b1": jnp.zeros((filt,), jnp.float32),
                "w2": xavier_uniform(keys[10], hidden, filt),
                "b2": jnp.zeros((hidden,), jnp.float32),
            },
        }
        layers.append(lp)
    return {
        "layers": layers,
        "last_g": jnp.ones((hidden,), jnp.float32),
        "last_b": jnp.zeros((hidden,), jnp.float32),
    }


def prep_kernel_params(params):
    """One-time prep: pre-transpose weights to (in,out), fold 1/sqrt(dk) into
    Wq, merge K/V into a single (H, 2H) weight, and stack every layer along a
    leading axis so the whole stack feeds one fused pallas_call."""
    hidden = params["layers"][0]["sa"]["wq"].shape[0]
    scale = (hidden // HEAD_SIZE) ** (-0.5)

    def stack(fn):
        return jnp.stack([fn(lp) for lp in params["layers"]])

    return {
        "sa_g": stack(lambda lp: lp["sa_ln_g"][None, :]),
        "sa_b": stack(lambda lp: lp["sa_ln_b"][None, :]),
        "sa_wq": stack(lambda lp: lp["sa"]["wq"].T * scale),
        "sa_wkv": stack(lambda lp: jnp.concatenate(
            [lp["sa"]["wk"].T, lp["sa"]["wv"].T], axis=1)),
        "sa_wo": stack(lambda lp: lp["sa"]["wo"].T),
        "ed_g": stack(lambda lp: lp["ed_ln_g"][None, :]),
        "ed_b": stack(lambda lp: lp["ed_ln_b"][None, :]),
        "ed_wq": stack(lambda lp: lp["ed"]["wq"].T * scale),
        "ed_wkv": stack(lambda lp: jnp.concatenate(
            [lp["ed"]["wk"].T, lp["ed"]["wv"].T], axis=1)),
        "ed_wo": stack(lambda lp: lp["ed"]["wo"].T),
        "ff_g": stack(lambda lp: lp["ffn_ln_g"][None, :]),
        "ff_b": stack(lambda lp: lp["ffn_ln_b"][None, :]),
        "ff_w1": stack(lambda lp: lp["ffn"]["w1"].T),
        "ff_b1": stack(lambda lp: lp["ffn"]["b1"][None, :]),
        "ff_w2": stack(lambda lp: lp["ffn"]["w2"].T),
        "ff_b2": stack(lambda lp: lp["ffn"]["b2"][None, :]),
        "last_g": params["last_g"][None, :],
        "last_b": params["last_b"][None, :],
    }


# ----------------------------------------------------------------------------
# Pure-JAX reference for verification (mirrors the PyTorch module, dropout=id)
# ----------------------------------------------------------------------------
def _ref_ln(x, g, b):
    m = jnp.mean(x, -1, keepdims=True)
    v = jnp.mean((x - m) ** 2, -1, keepdims=True)
    return (x - m) * jax.lax.rsqrt(v + LN_EPS) * g + b


def _ref_mha(p, q_in, kv_in, mask):
    B, Tq, H = q_in.shape
    Tk = kv_in.shape[1]
    dk = H // HEAD_SIZE
    q = (q_in @ p["wq"].T).reshape(B, Tq, HEAD_SIZE, dk).transpose(0, 2, 1, 3)
    k = (kv_in @ p["wk"].T).reshape(B, Tk, HEAD_SIZE, dk).transpose(0, 2, 1, 3)
    v = (kv_in @ p["wv"].T).reshape(B, Tk, HEAD_SIZE, dk).transpose(0, 2, 1, 3)
    s = (q * dk ** -0.5) @ k.transpose(0, 1, 3, 2)
    s = jnp.where(mask[:, None] > 0, -1e9, s)
    a = jax.nn.softmax(s, axis=-1)
    o = (a @ v).transpose(0, 2, 1, 3).reshape(B, Tq, H)
    return o @ p["wo"].T


def ref_decoder(params, x, enc, i_mask, t_mask):
    for lp in params["layers"]:
        y = _ref_ln(x, lp["sa_ln_g"], lp["sa_ln_b"])
        x = x + _ref_mha(lp["sa"], y, y, t_mask)
        if enc is not None:
            y = _ref_ln(x, lp["ed_ln_g"], lp["ed_ln_b"])
            x = x + _ref_mha(lp["ed"], y, enc, i_mask)
        y = _ref_ln(x, lp["ffn_ln_g"], lp["ffn_ln_b"])
        y = jnp.maximum(y @ lp["ffn"]["w1"].T + lp["ffn"]["b1"], 0.0) @ lp["ffn"]["w2"].T + lp["ffn"]["b2"]
        x = x + y
    return _ref_ln(x, params["last_g"], params["last_b"])


# ----------------------------------------------------------------------------
if __name__ == "__main__":
    B, T_TGT, T_SRC = 2, 8, 8
    HIDDEN, FILTER, N_LAYERS = 32, 64, 2

    key = jax.random.PRNGKey(0)
    k_params, k_tgt, k_enc = jax.random.split(key, 3)

    params = make_params(k_params, HIDDEN, FILTER, N_LAYERS)
    kparams = prep_kernel_params(params)

    targets = jax.random.normal(k_tgt, (B, T_TGT, HIDDEN), jnp.float32)
    enc_output = jax.random.normal(k_enc, (B, T_SRC, HIDDEN), jnp.float32)

    # causal self-attention mask (1.0 = masked) and no-op enc-dec mask
    t_self_mask = jnp.broadcast_to(
        jnp.triu(jnp.ones((T_TGT, T_TGT), jnp.float32), k=1), (B, T_TGT, T_TGT)
    )
    i_mask = jnp.zeros((B, T_TGT, T_SRC), jnp.float32)

    out = decoder_forward(kparams, targets, enc_output, i_mask, t_self_mask)
    out = jax.block_until_ready(out)

    ref = ref_decoder(params, targets, enc_output, i_mask, t_self_mask)
    assert out.shape == (B, T_TGT, HIDDEN)
    assert jnp.allclose(out, ref, atol=2e-3, rtol=2e-3), float(jnp.max(jnp.abs(out - ref)))

    print("KERNEL_OK")
</pallas_src>

<mosaic_0001>
module attributes {stable_mosaic.version = 11 : i64} {
  func.func @_decoder_stack_kernel(%arg0: i32, %arg1: memref<1x8x32xf32, #tpu.memory_space<vmem>>, %arg2: memref<1x8x32xf32, #tpu.memory_space<vmem>>, %arg3: memref<1x8x8xf32, #tpu.memory_space<vmem>>, %arg4: memref<1x8x8xf32, #tpu.memory_space<vmem>>, %arg5: memref<2x1x32xf32, #tpu.memory_space<vmem>>, %arg6: memref<2x1x32xf32, #tpu.memory_space<vmem>>, %arg7: memref<2x32x32xf32, #tpu.memory_space<vmem>>, %arg8: memref<2x32x64xf32, #tpu.memory_space<vmem>>, %arg9: memref<2x32x32xf32, #tpu.memory_space<vmem>>, %arg10: memref<2x1x32xf32, #tpu.memory_space<vmem>>, %arg11: memref<2x1x32xf32, #tpu.memory_space<vmem>>, %arg12: memref<2x32x32xf32, #tpu.memory_space<vmem>>, %arg13: memref<2x32x64xf32, #tpu.memory_space<vmem>>, %arg14: memref<2x32x32xf32, #tpu.memory_space<vmem>>, %arg15: memref<2x1x32xf32, #tpu.memory_space<vmem>>, %arg16: memref<2x1x32xf32, #tpu.memory_space<vmem>>, %arg17: memref<2x32x64xf32, #tpu.memory_space<vmem>>, %arg18: memref<2x1x64xf32, #tpu.memory_space<vmem>>, %arg19: memref<2x64x32xf32, #tpu.memory_space<vmem>>, %arg20: memref<2x1x32xf32, #tpu.memory_space<vmem>>, %arg21: memref<1x32xf32, #tpu.memory_space<vmem>>, %arg22: memref<1x32xf32, #tpu.memory_space<vmem>>, %arg23: memref<1x8x32xf32, #tpu.memory_space<vmem>>) attributes {dimension_semantics = [#tpu.dimension_semantics<parallel>], iteration_bounds = array<i64: 2>, scalar_prefetch = 0 : i64, scratch_operands = 0 : i64, tpu.core_type = #tpu.core_type<tc>, window_params = [{transform_indices = @transform_0, window_bounds = array<i64: 1, 8, 32>}, {transform_indices = @transform_1, window_bounds = array<i64: 1, 8, 32>}, {transform_indices = @transform_2, window_bounds = array<i64: 1, 8, 8>}, {transform_indices = @transform_3, window_bounds = array<i64: 1, 8, 8>}, {pipeline_mode = #tpu.pipeline_mode<synchronous>, transform_indices = @transform_4, window_bounds = array<i64: 2, 1, 32>}, {pipeline_mode = #tpu.pipeline_mode<synchronous>, transform_indices = @transform_5, window_bounds = array<i64: 2, 1, 32>}, {pipeline_mode = #tpu.pipeline_mode<synchronous>, transform_indices = @transform_6, window_bounds = array<i64: 2, 32, 32>}, {pipeline_mode = #tpu.pipeline_mode<synchronous>, transform_indices = @transform_7, window_bounds = array<i64: 2, 32, 64>}, {pipeline_mode = #tpu.pipeline_mode<synchronous>, transform_indices = @transform_8, window_bounds = array<i64: 2, 32, 32>}, {pipeline_mode = #tpu.pipeline_mode<synchronous>, transform_indices = @transform_9, window_bounds = array<i64: 2, 1, 32>}, {pipeline_mode = #tpu.pipeline_mode<synchronous>, transform_indices = @transform_10, window_bounds = array<i64: 2, 1, 32>}, {pipeline_mode = #tpu.pipeline_mode<synchronous>, transform_indices = @transform_11, window_bounds = array<i64: 2, 32, 32>}, {pipeline_mode = #tpu.pipeline_mode<synchronous>, transform_indices = @transform_12, window_bounds = array<i64: 2, 32, 64>}, {pipeline_mode = #tpu.pipeline_mode<synchronous>, transform_indices = @transform_13, window_bounds = array<i64: 2, 32, 32>}, {pipeline_mode = #tpu.pipeline_mode<synchronous>, transform_indices = @transform_14, window_bounds = array<i64: 2, 1, 32>}, {pipeline_mode = #tpu.pipeline_mode<synchronous>, transform_indices = @transform_15, window_bounds = array<i64: 2, 1, 32>}, {pipeline_mode = #tpu.pipeline_mode<synchronous>, transform_indices = @transform_16, window_bounds = array<i64: 2, 32, 64>}, {pipeline_mode = #tpu.pipeline_mode<synchronous>, transform_indices = @transform_17, window_bounds = array<i64: 2, 1, 64>}, {pipeline_mode = #tpu.pipeline_mode<synchronous>, transform_indices = @transform_18, window_bounds = array<i64: 2, 64, 32>}, {pipeline_mode = #tpu.pipeline_mode<synchronous>, transform_indices = @transform_19, window_bounds = array<i64: 2, 1, 32>}, {pipeline_mode = #tpu.pipeline_mode<synchronous>, transform_indices = @transform_20, window_bounds = array<i64: 1, 32>}, {pipeline_mode = #tpu.pipeline_mode<synchronous>, transform_indices = @transform_21, window_bounds = array<i64: 1, 32>}, {transform_indices = @transform_22, window_bounds = array<i64: 1, 8, 32>}]} {
    %c0 = arith.constant 0 : index
    %c0_0 = arith.constant 0 : index
    %c0_1 = arith.constant 0 : index
    %0 = vector.load %arg1[%c0, %c0_0, %c0_1] : memref<1x8x32xf32, #tpu.memory_space<vmem>>, vector<1x8x32xf32>
    %1 = vector.shape_cast %0 : vector<1x8x32xf32> to vector<8x32xf32>
    %c0_2 = arith.constant 0 : index
    %c0_3 = arith.constant 0 : index
    %c0_4 = arith.constant 0 : index
    %2 = vector.load %arg3[%c0_2, %c0_3, %c0_4] : memref<1x8x8xf32, #tpu.memory_space<vmem>>, vector<1x8x8xf32>
    %3 = vector.shape_cast %2 : vector<1x8x8xf32> to vector<8x8xf32>
    %c0_5 = arith.constant 0 : index
    %c0_6 = arith.constant 0 : index
    %c0_7 = arith.constant 0 : index
    %4 = vector.load %arg2[%c0_5, %c0_6, %c0_7] : memref<1x8x32xf32, #tpu.memory_space<vmem>>, vector<1x8x32xf32>
    %5 = vector.shape_cast %4 : vector<1x8x32xf32> to vector<8x32xf32>
    %c0_8 = arith.constant 0 : index
    %c0_9 = arith.constant 0 : index
    %c0_10 = arith.constant 0 : index
    %6 = vector.load %arg4[%c0_8, %c0_9, %c0_10] : memref<1x8x8xf32, #tpu.memory_space<vmem>>, vector<1x8x8xf32>
    %7 = vector.shape_cast %6 : vector<1x8x8xf32> to vector<8x8xf32>
    %c0_11 = arith.constant 0 : index
    %c0_12 = arith.constant 0 : index
    %c0_13 = arith.constant 0 : index
    %8 = vector.load %arg5[%c0_11, %c0_12, %c0_13] : memref<2x1x32xf32, #tpu.memory_space<vmem>>, vector<1x1x32xf32>
    %9 = vector.shape_cast %8 : vector<1x1x32xf32> to vector<1x32xf32>
    %c0_14 = arith.constant 0 : index
    %c0_15 = arith.constant 0 : index
    %c0_16 = arith.constant 0 : index
    %10 = vector.load %arg6[%c0_14, %c0_15, %c0_16] : memref<2x1x32xf32, #tpu.memory_space<vmem>>, vector<1x1x32xf32>
    %11 = vector.shape_cast %10 : vector<1x1x32xf32> to vector<1x32xf32>
    %c0_17 = arith.constant 0 : index
    %c0_18 = arith.constant 0 : index
    %c0_19 = arith.constant 0 : index
    %12 = vector.load %arg7[%c0_17, %c0_18, %c0_19] : memref<2x32x32xf32, #tpu.memory_space<vmem>>, vector<1x32x32xf32>
    %13 = vector.shape_cast %12 : vector<1x32x32xf32> to vector<32x32xf32>
    %c0_20 = arith.constant 0 : index
    %c0_21 = arith.constant 0 : index
    %c0_22 = arith.constant 0 : index
    %14 = vector.load %arg8[%c0_20, %c0_21, %c0_22] : memref<2x32x64xf32, #tpu.memory_space<vmem>>, vector<1x32x64xf32>
    %15 = vector.shape_cast %14 : vector<1x32x64xf32> to vector<32x64xf32>
    %c0_23 = arith.constant 0 : index
    %c0_24 = arith.constant 0 : index
    %c0_25 = arith.constant 0 : index
    %16 = vector.load %arg9[%c0_23, %c0_24, %c0_25] : memref<2x32x32xf32, #tpu.memory_space<vmem>>, vector<1x32x32xf32>
    %17 = vector.shape_cast %16 : vector<1x32x32xf32> to vector<32x32xf32>
    %cst = arith.constant dense<0.000000e+00> : vector<8xf32>
    %18 = vector.multi_reduction <add>, %1, %cst [1] : vector<8x32xf32> to vector<8xf32>
    %19 = vector.shape_cast %18 : vector<8xf32> to vector<8x1xf32>
    %cst_26 = arith.constant 3.200000e+01 : f32
    %20 = vector.broadcast %cst_26 : f32 to vector<8x1xf32>
    %21 = arith.divf %19, %20 : vector<8x1xf32>
    %22 = vector.broadcast %21 : vector<8x1xf32> to vector<8x32xf32>
    %23 = arith.subf %1, %22 : vector<8x32xf32>
    %24 = arith.mulf %23, %23 : vector<8x32xf32>
    %cst_27 = arith.constant dense<0.000000e+00> : vector<8xf32>
    %25 = vector.multi_reduction <add>, %24, %cst_27 [1] : vector<8x32xf32> to vector<8xf32>
    %26 = vector.shape_cast %25 : vector<8xf32> to vector<8x1xf32>
    %cst_28 = arith.constant 3.200000e+01 : f32
    %27 = vector.broadcast %cst_28 : f32 to vector<8x1xf32>
    %28 = arith.divf %26, %27 : vector<8x1xf32>
    %cst_29 = arith.constant 9.99999997E-7 : f32
    %29 = vector.broadcast %cst_29 : f32 to vector<8x1xf32>
    %30 = arith.addf %28, %29 : vector<8x1xf32>
    %31 = math.rsqrt %30 : vector<8x1xf32>
    %32 = vector.broadcast %31 : vector<8x1xf32> to vector<8x32xf32>
    %33 = arith.mulf %23, %32 : vector<8x32xf32>
    %34 = vector.broadcast %9 : vector<1x32xf32> to vector<8x32xf32>
    %35 = arith.mulf %33, %34 : vector<8x32xf32>
    %36 = vector.broadcast %11 : vector<1x32xf32> to vector<8x32xf32>
    %37 = arith.addf %35, %36 : vector<8x32xf32>
    %cst_30 = arith.constant dense<0.000000e+00> : vector<8x32xf32>
    %38 = tpu.matmul %37, %13, %cst_30 {dimension_numbers = #tpu.dot_dimension_numbers<[1], [0], [0], [1], [0, 0, 1, 1], [], []>} : vector<8x32xf32>, vector<32x32xf32>, vector<8x32xf32> -> vector<8x32xf32>
    %cst_31 = arith.constant dense<0.000000e+00> : vector<8x64xf32>
    %39 = tpu.matmul %37, %15, %cst_31 {dimension_numbers = #tpu.dot_dimension_numbers<[1], [0], [0], [1], [0, 0, 1, 1], [], []>} : vector<8x32xf32>, vector<32x64xf32>, vector<8x64xf32> -> vector<8x64xf32>
    %40 = vector.extract_strided_slice %39 {offsets = [0, 0], sizes = [8, 32], strides = [1, 1]} : vector<8x64xf32> to vector<8x32xf32>
    %41 = tpu.transpose %40, [1, 0] : vector<8x32xf32> -> vector<32x8xf32>
    %42 = vector.extract_strided_slice %39 {offsets = [0, 32], sizes = [8, 32], strides = [1, 1]} : vector<8x64xf32> to vector<8x32xf32>
    %cst_32 = arith.constant 0.000000e+00 : f32
    %43 = vector.broadcast %cst_32 : f32 to vector<8x32xf32>
    %44 = vector.extract_strided_slice %38 {offsets = [0, 0], sizes = [8, 4], strides = [1, 1]} : vector<8x32xf32> to vector<8x4xf32>
    %45 = vector.extract_strided_slice %41 {offsets = [0, 0], sizes = [4, 8], strides = [1, 1]} : vector<32x8xf32> to vector<4x8xf32>
    %cst_33 = arith.constant dense<0.000000e+00> : vector<8x8xf32>
    %46 = tpu.matmul %44, %45, %cst_33 {dimension_numbers = #tpu.dot_dimension_numbers<[1], [0], [0], [1], [0, 0, 1, 1], [], []>} : vector<8x4xf32>, vector<4x8xf32>, vector<8x8xf32> -> vector<8x8xf32>
    %47 = arith.addf %46, %3 : vector<8x8xf32>
    %cst_34 = arith.constant dense<0xFF800000> : vector<8xf32>
    %48 = vector.multi_reduction <maximumf>, %47, %cst_34 [1] : vector<8x8xf32> to vector<8xf32>
    %49 = vector.shape_cast %48 : vector<8xf32> to vector<8x1xf32>
    %50 = vector.broadcast %49 : vector<8x1xf32> to vector<8x8xf32>
    %51 = arith.subf %47, %50 : vector<8x8xf32>
    %52 = math.exp %51 : vector<8x8xf32>
    %cst_35 = arith.constant dense<0.000000e+00> : vector<8xf32>
    %53 = vector.multi_reduction <add>, %52, %cst_35 [1] : vector<8x8xf32> to vector<8xf32>
    %54 = vector.shape_cast %53 : vector<8xf32> to vector<8x1xf32>
    %55 = tpu.reciprocal %54 : vector<8x1xf32> -> vector<8x1xf32>
    %56 = vector.broadcast %55 : vector<8x1xf32> to vector<8x8xf32>
    %57 = arith.mulf %52, %56 : vector<8x8xf32>
    %58 = vector.extract_strided_slice %42 {offsets = [0, 0], sizes = [8, 4], strides = [1, 1]} : vector<8x32xf32> to vector<8x4xf32>
    %cst_36 = arith.constant dense<0.000000e+00> : vector<8x4xf32>
    %59 = tpu.matmul %57, %58, %cst_36 {dimension_numbers = #tpu.dot_dimension_numbers<[1], [0], [0], [1], [0, 0, 1, 1], [], []>} : vector<8x8xf32>, vector<8x4xf32>, vector<8x4xf32> -> vector<8x4xf32>
    %60 = vector.extract_strided_slice %17 {offsets = [0, 0], sizes = [4, 32], strides = [1, 1]} : vector<32x32xf32> to vector<4x32xf32>
    %cst_37 = arith.constant dense<0.000000e+00> : vector<8x32xf32>
    %61 = tpu.matmul %59, %60, %cst_37 {dimension_numbers = #tpu.dot_dimension_numbers<[1], [0], [0], [1], [0, 0, 1, 1], [], []>} : vector<8x4xf32>, vector<4x32xf32>, vector<8x32xf32> -> vector<8x32xf32>
    %62 = arith.addf %43, %61 : vector<8x32xf32>
    %63 = vector.extract_strided_slice %38 {offsets = [0, 4], sizes = [8, 4], strides = [1, 1]} : vector<8x32xf32> to vector<8x4xf32>
    %64 = vector.extract_strided_slice %41 {offsets = [4, 0], sizes = [4, 8], strides = [1, 1]} : vector<32x8xf32> to vector<4x8xf32>
    %cst_38 = arith.constant dense<0.000000e+00> : vector<8x8xf32>
    %65 = tpu.matmul %63, %64, %cst_38 {dimension_numbers = #tpu.dot_dimension_numbers<[1], [0], [0], [1], [0, 0, 1, 1], [], []>} : vector<8x4xf32>, vector<4x8xf32>, vector<8x8xf32> -> vector<8x8xf32>
    %66 = arith.addf %65, %3 : vector<8x8xf32>
    %cst_39 = arith.constant dense<0xFF800000> : vector<8xf32>
    %67 = vector.multi_reduction <maximumf>, %66, %cst_39 [1] : vector<8x8xf32> to vector<8xf32>
    %68 = vector.shape_cast %67 : vector<8xf32> to vector<8x1xf32>
    %69 = vector.broadcast %68 : vector<8x1xf32> to vector<8x8xf32>
    %70 = arith.subf %66, %69 : vector<8x8xf32>
    %71 = math.exp %70 : vector<8x8xf32>
    %cst_40 = arith.constant dense<0.000000e+00> : vector<8xf32>
    %72 = vector.multi_reduction <add>, %71, %cst_40 [1] : vector<8x8xf32> to vector<8xf32>
    %73 = vector.shape_cast %72 : vector<8xf32> to vector<8x1xf32>
    %74 = tpu.reciprocal %73 : vector<8x1xf32> -> vector<8x1xf32>
    %75 = vector.broadcast %74 : vector<8x1xf32> to vector<8x8xf32>
    %76 = arith.mulf %71, %75 : vector<8x8xf32>
    %77 = vector.extract_strided_slice %42 {offsets = [0, 4], sizes = [8, 4], strides = [1, 1]} : vector<8x32xf32> to vector<8x4xf32>
    %cst_41 = arith.constant dense<0.000000e+00> : vector<8x4xf32>
    %78 = tpu.matmul %76, %77, %cst_41 {dimension_numbers = #tpu.dot_dimension_numbers<[1], [0], [0], [1], [0, 0, 1, 1], [], []>} : vector<8x8xf32>, vector<8x4xf32>, vector<8x4xf32> -> vector<8x4xf32>
    %79 = vector.extract_strided_slice %17 {offsets = [4, 0], sizes = [4, 32], strides = [1, 1]} : vector<32x32xf32> to vector<4x32xf32>
    %cst_42 = arith.constant dense<0.000000e+00> : vector<8x32xf32>
    %80 = tpu.matmul %78, %79, %cst_42 {dimension_numbers = #tpu.dot_dimension_numbers<[1], [0], [0], [1], [0, 0, 1, 1], [], []>} : vector<8x4xf32>, vector<4x32xf32>, vector<8x32xf32> -> vector<8x32xf32>
    %81 = arith.addf %62, %80 : vector<8x32xf32>
    %82 = vector.extract_strided_slice %38 {offsets = [0, 8], sizes = [8, 4], strides = [1, 1]} : vector<8x32xf32> to vector<8x4xf32>
    %83 = vector.extract_strided_slice %41 {offsets = [8, 0], sizes = [4, 8], strides = [1, 1]} : vector<32x8xf32> to vector<4x8xf32>
    %cst_43 = arith.constant dense<0.000000e+00> : vector<8x8xf32>
    %84 = tpu.matmul %82, %83, %cst_43 {dimension_numbers = #tpu.dot_dimension_numbers<[1], [0], [0], [1], [0, 0, 1, 1], [], []>} : vector<8x4xf32>, vector<4x8xf32>, vector<8x8xf32> -> vector<8x8xf32>
    %85 = arith.addf %84, %3 : vector<8x8xf32>
    %cst_44 = arith.constant dense<0xFF800000> : vector<8xf32>
    %86 = vector.multi_reduction <maximumf>, %85, %cst_44 [1] : vector<8x8xf32> to vector<8xf32>
    %87 = vector.shape_cast %86 : vector<8xf32> to vector<8x1xf32>
    %88 = vector.broadcast %87 : vector<8x1xf32> to vector<8x8xf32>
    %89 = arith.subf %85, %88 : vector<8x8xf32>
    %90 = math.exp %89 : vector<8x8xf32>
    %cst_45 = arith.constant dense<0.000000e+00> : vector<8xf32>
    %91 = vector.multi_reduction <add>, %90, %cst_45 [1] : vector<8x8xf32> to vector<8xf32>
    %92 = vector.shape_cast %91 : vector<8xf32> to vector<8x1xf32>
    %93 = tpu.reciprocal %92 : vector<8x1xf32> -> vector<8x1xf32>
    %94 = vector.broadcast %93 : vector<8x1xf32> to vector<8x8xf32>
    %95 = arith.mulf %90, %94 : vector<8x8xf32>
    %96 = vector.extract_strided_slice %42 {offsets = [0, 8], sizes = [8, 4], strides = [1, 1]} : vector<8x32xf32> to vector<8x4xf32>
    %cst_46 = arith.constant dense<0.000000e+00> : vector<8x4xf32>
    %97 = tpu.matmul %95, %96, %cst_46 {dimension_numbers = #tpu.dot_dimension_numbers<[1], [0], [0], [1], [0, 0, 1, 1], [], []>} : vector<8x8xf32>, vector<8x4xf32>, vector<8x4xf32> -> vector<8x4xf32>
    %98 = vector.extract_strided_slice %17 {offsets = [8, 0], sizes = [4, 32], strides = [1, 1]} : vector<32x32xf32> to vector<4x32xf32>
    %cst_47 = arith.constant dense<0.000000e+00> : vector<8x32xf32>
    %99 = tpu.matmul %97, %98, %cst_47 {dimension_numbers = #tpu.dot_dimension_numbers<[1], [0], [0], [1], [0, 0, 1, 1], [], []>} : vector<8x4xf32>, vector<4x32xf32>, vector<8x32xf32> -> vector<8x32xf32>
    %100 = arith.addf %81, %99 : vector<8x32xf32>
    %101 = vector.extract_strided_slice %38 {offsets = [0, 12], sizes = [8, 4], strides = [1, 1]} : vector<8x32xf32> to vector<8x4xf32>
    %102 = vector.extract_strided_slice %41 {offsets = [12, 0], sizes = [4, 8], strides = [1, 1]} : vector<32x8xf32> to vector<4x8xf32>
    %cst_48 = arith.constant dense<0.000000e+00> : vector<8x8xf32>
    %103 = tpu.matmul %101, %102, %cst_48 {dimension_numbers = #tpu.dot_dimension_numbers<[1], [0], [0], [1], [0, 0, 1, 1], [], []>} : vector<8x4xf32>, vector<4x8xf32>, vector<8x8xf32> -> vector<8x8xf32>
    %104 = arith.addf %103, %3 : vector<8x8xf32>
    %cst_49 = arith.constant dense<0xFF800000> : vector<8xf32>
    %105 = vector.multi_reduction <maximumf>, %104, %cst_49 [1] : vector<8x8xf32> to vector<8xf32>
    %106 = vector.shape_cast %105 : vector<8xf32> to vector<8x1xf32>
    %107 = vector.broadcast %106 : vector<8x1xf32> to vector<8x8xf32>
    %108 = arith.subf %104, %107 : vector<8x8xf32>
    %109 = math.exp %108 : vector<8x8xf32>
    %cst_50 = arith.constant dense<0.000000e+00> : vector<8xf32>
    %110 = vector.multi_reduction <add>, %109, %cst_50 [1] : vector<8x8xf32> to vector<8xf32>
    %111 = vector.shape_cast %110 : vector<8xf32> to vector<8x1xf32>
    %112 = tpu.reciprocal %111 : vector<8x1xf32> -> vector<8x1xf32>
    %113 = vector.broadcast %112 : vector<8x1xf32> to vector<8x8xf32>
    %114 = arith.mulf %109, %113 : vector<8x8xf32>
    %115 = vector.extract_strided_slice %42 {offsets = [0, 12], sizes = [8, 4], strides = [1, 1]} : vector<8x32xf32> to vector<8x4xf32>
    %cst_51 = arith.constant dense<0.000000e+00> : vector<8x4xf32>
    %116 = tpu.matmul %114, %115, %cst_51 {dimension_numbers = #tpu.dot_dimension_numbers<[1], [0], [0], [1], [0, 0, 1, 1], [], []>} : vector<8x8xf32>, vector<8x4xf32>, vector<8x4xf32> -> vector<8x4xf32>
    %117 = vector.extract_strided_slice %17 {offsets = [12, 0], sizes = [4, 32], strides = [1, 1]} : vector<32x32xf32> to vector<4x32xf32>
    %cst_52 = arith.constant dense<0.000000e+00> : vector<8x32xf32>
    %118 = tpu.matmul %116, %117, %cst_52 {dimension_numbers = #tpu.dot_dimension_numbers<[1], [0], [0], [1], [0, 0, 1, 1], [], []>} : vector<8x4xf32>, vector<4x32xf32>, vector<8x32xf32> -> vector<8x32xf32>
    %119 = arith.addf %100, %118 : vector<8x32xf32>
    %120 = vector.extract_strided_slice %38 {offsets = [0, 16], sizes = [8, 4], strides = [1, 1]} : vector<8x32xf32> to vector<8x4xf32>
    %121 = vector.extract_strided_slice %41 {offsets = [16, 0], sizes = [4, 8], strides = [1, 1]} : vector<32x8xf32> to vector<4x8xf32>
    %cst_53 = arith.constant dense<0.000000e+00> : vector<8x8xf32>
    %122 = tpu.matmul %120, %121, %cst_53 {dimension_numbers = #tpu.dot_dimension_numbers<[1], [0], [0], [1], [0, 0, 1, 1], [], []>} : vector<8x4xf32>, vector<4x8xf32>, vector<8x8xf32> -> vector<8x8xf32>
    %123 = arith.addf %122, %3 : vector<8x8xf32>
    %cst_54 = arith.constant dense<0xFF800000> : vector<8xf32>
    %124 = vector.multi_reduction <maximumf>, %123, %cst_54 [1] : vector<8x8xf32> to vector<8xf32>
    %125 = vector.shape_cast %124 : vector<8xf32> to vector<8x1xf32>
    %126 = vector.broadcast %125 : vector<8x1xf32> to vector<8x8xf32>
    %127 = arith.subf %123, %126 : vector<8x8xf32>
    %128 = math.exp %127 : vector<8x8xf32>
    %cst_55 = arith.constant dense<0.000000e+00> : vector<8xf32>
    %129 = vector.multi_reduction <add>, %128, %cst_55 [1] : vector<8x8xf32> to vector<8xf32>
    %130 = vector.shape_cast %129 : vector<8xf32> to vector<8x1xf32>
    %131 = tpu.reciprocal %130 : vector<8x1xf32> -> vector<8x1xf32>
    %132 = vector.broadcast %131 : vector<8x1xf32> to vector<8x8xf32>
    %133 = arith.mulf %128, %132 : vector<8x8xf32>
    %134 = vector.extract_strided_slice %42 {offsets = [0, 16], sizes = [8, 4], strides = [1, 1]} : vector<8x32xf32> to vector<8x4xf32>
    %cst_56 = arith.constant dense<0.000000e+00> : vector<8x4xf32>
    %135 = tpu.matmul %133, %134, %cst_56 {dimension_numbers = #tpu.dot_dimension_numbers<[1], [0], [0], [1], [0, 0, 1, 1], [], []>} : vector<8x8xf32>, vector<8x4xf32>, vector<8x4xf32> -> vector<8x4xf32>
    %136 = vector.extract_strided_slice %17 {offsets = [16, 0], sizes = [4, 32], strides = [1, 1]} : vector<32x32xf32> to vector<4x32xf32>
    %cst_57 = arith.constant dense<0.000000e+00> : vector<8x32xf32>
    %137 = tpu.matmul %135, %136, %cst_57 {dimension_numbers = #tpu.dot_dimension_numbers<[1], [0], [0], [1], [0, 0, 1, 1], [], []>} : vector<8x4xf32>, vector<4x32xf32>, vector<8x32xf32> -> vector<8x32xf32>
    %138 = arith.addf %119, %137 : vector<8x32xf32>
    %139 = vector.extract_strided_slice %38 {offsets = [0, 20], sizes = [8, 4], strides = [1, 1]} : vector<8x32xf32> to vector<8x4xf32>
    %140 = vector.extract_strided_slice %41 {offsets = [20, 0], sizes = [4, 8], strides = [1, 1]} : vector<32x8xf32> to vector<4x8xf32>
    %cst_58 = arith.constant dense<0.000000e+00> : vector<8x8xf32>
    %141 = tpu.matmul %139, %140, %cst_58 {dimension_numbers = #tpu.dot_dimension_numbers<[1], [0], [0], [1], [0, 0, 1, 1], [], []>} : vector<8x4xf32>, vector<4x8xf32>, vector<8x8xf32> -> vector<8x8xf32>
    %142 = arith.addf %141, %3 : vector<8x8xf32>
    %cst_59 = arith.constant dense<0xFF800000> : vector<8xf32>
    %143 = vector.multi_reduction <maximumf>, %142, %cst_59 [1] : vector<8x8xf32> to vector<8xf32>
    %144 = vector.shape_cast %143 : vector<8xf32> to vector<8x1xf32>
    %145 = vector.broadcast %144 : vector<8x1xf32> to vector<8x8xf32>
    %146 = arith.subf %142, %145 : vector<8x8xf32>
    %147 = math.exp %146 : vector<8x8xf32>
    %cst_60 = arith.constant dense<0.000000e+00> : vector<8xf32>
    %148 = vector.multi_reduction <add>, %147, %cst_60 [1] : vector<8x8xf32> to vector<8xf32>
    %149 = vector.shape_cast %148 : vector<8xf32> to vector<8x1xf32>
    %150 = tpu.reciprocal %149 : vector<8x1xf32> -> vector<8x1xf32>
    %151 = vector.broadcast %150 : vector<8x1xf32> to vector<8x8xf32>
    %152 = arith.mulf %147, %151 : vector<8x8xf32>
    %153 = vector.extract_strided_slice %42 {offsets = [0, 20], sizes = [8, 4], strides = [1, 1]} : vector<8x32xf32> to vector<8x4xf32>
    %cst_61 = arith.constant dense<0.000000e+00> : vector<8x4xf32>
    %154 = tpu.matmul %152, %153, %cst_61 {dimension_numbers = #tpu.dot_dimension_numbers<[1], [0], [0], [1], [0, 0, 1, 1], [], []>} : vector<8x8xf32>, vector<8x4xf32>, vector<8x4xf32> -> vector<8x4xf32>
    %155 = vector.extract_strided_slice %17 {offsets = [20, 0], sizes = [4, 32], strides = [1, 1]} : vector<32x32xf32> to vector<4x32xf32>
    %cst_62 = arith.constant dense<0.000000e+00> : vector<8x32xf32>
    %156 = tpu.matmul %154, %155, %cst_62 {dimension_numbers = #tpu.dot_dimension_numbers<[1], [0], [0], [1], [0, 0, 1, 1], [], []>} : vector<8x4xf32>, vector<4x32xf32>, vector<8x32xf32> -> vector<8x32xf32>
    %157 = arith.addf %138, %156 : vector<8x32xf32>
    %158 = vector.extract_strided_slice %38 {offsets = [0, 24], sizes = [8, 4], strides = [1, 1]} : vector<8x32xf32> to vector<8x4xf32>
    %159 = vector.extract_strided_slice %41 {offsets = [24, 0], sizes = [4, 8], strides = [1, 1]} : vector<32x8xf32> to vector<4x8xf32>
    %cst_63 = arith.constant dense<0.000000e+00> : vector<8x8xf32>
    %160 = tpu.matmul %158, %159, %cst_63 {dimension_numbers = #tpu.dot_dimension_numbers<[1], [0], [0], [1], [0, 0, 1, 1], [], []>} : vector<8x4xf32>, vector<4x8xf32>, vector<8x8xf32> -> vector<8x8xf32>
    %161 = arith.addf %160, %3 : vector<8x8xf32>
    %cst_64 = arith.constant dense<0xFF800000> : vector<8xf32>
    %162 = vector.multi_reduction <maximumf>, %161, %cst_64 [1] : vector<8x8xf32> to vector<8xf32>
    %163 = vector.shape_cast %162 : vector<8xf32> to vector<8x1xf32>
    %164 = vector.broadcast %163 : vector<8x1xf32> to vector<8x8xf32>
    %165 = arith.subf %161, %164 : vector<8x8xf32>
    %166 = math.exp %165 : vector<8x8xf32>
    %cst_65 = arith.constant dense<0.000000e+00> : vector<8xf32>
    %167 = vector.multi_reduction <add>, %166, %cst_65 [1] : vector<8x8xf32> to vector<8xf32>
    %168 = vector.shape_cast %167 : vector<8xf32> to vector<8x1xf32>
    %169 = tpu.reciprocal %168 : vector<8x1xf32> -> vector<8x1xf32>
    %170 = vector.broadcast %169 : vector<8x1xf32> to vector<8x8xf32>
    %171 = arith.mulf %166, %170 : vector<8x8xf32>
    %172 = vector.extract_strided_slice %42 {offsets = [0, 24], sizes = [8, 4], strides = [1, 1]} : vector<8x32xf32> to vector<8x4xf32>
    %cst_66 = arith.constant dense<0.000000e+00> : vector<8x4xf32>
    %173 = tpu.matmul %171, %172, %cst_66 {dimension_numbers = #tpu.dot_dimension_numbers<[1], [0], [0], [1], [0, 0, 1, 1], [], []>} : vector<8x8xf32>, vector<8x4xf32>, vector<8x4xf32> -> vector<8x4xf32>
    %174 = vector.extract_strided_slice %17 {offsets = [24, 0], sizes = [4, 32], strides = [1, 1]} : vector<32x32xf32> to vector<4x32xf32>
    %cst_67 = arith.constant dense<0.000000e+00> : vector<8x32xf32>
    %175 = tpu.matmul %173, %174, %cst_67 {dimension_numbers = #tpu.dot_dimension_numbers<[1], [0], [0], [1], [0, 0, 1, 1], [], []>} : vector<8x4xf32>, vector<4x32xf32>, vector<8x32xf32> -> vector<8x32xf32>
    %176 = arith.addf %157, %175 : vector<8x32xf32>
    %177 = vector.extract_strided_slice %38 {offsets = [0, 28], sizes = [8, 4], strides = [1, 1]} : vector<8x32xf32> to vector<8x4xf32>
    %178 = vector.extract_strided_slice %41 {offsets = [28, 0], sizes = [4, 8], strides = [1, 1]} : vector<32x8xf32> to vector<4x8xf32>
    %cst_68 = arith.constant dense<0.000000e+00> : vector<8x8xf32>
    %179 = tpu.matmul %177, %178, %cst_68 {dimension_numbers = #tpu.dot_dimension_numbers<[1], [0], [0], [1], [0, 0, 1, 1], [], []>} : vector<8x4xf32>, vector<4x8xf32>, vector<8x8xf32> -> vector<8x8xf32>
    %180 = arith.addf %179, %3 : vector<8x8xf32>
    %cst_69 = arith.constant dense<0xFF800000> : vector<8xf32>
    %181 = vector.multi_reduction <maximumf>, %180, %cst_69 [1] : vector<8x8xf32> to vector<8xf32>
    %182 = vector.shape_cast %181 : vector<8xf32> to vector<8x1xf32>
    %183 = vector.broadcast %182 : vector<8x1xf32> to vector<8x8xf32>
    %184 = arith.subf %180, %183 : vector<8x8xf32>
    %185 = math.exp %184 : vector<8x8xf32>
    %cst_70 = arith.constant dense<0.000000e+00> : vector<8xf32>
    %186 = vector.multi_reduction <add>, %185, %cst_70 [1] : vector<8x8xf32> to vector<8xf32>
    %187 = vector.shape_cast %186 : vector<8xf32> to vector<8x1xf32>
    %188 = tpu.reciprocal %187 : vector<8x1xf32> -> vector<8x1xf32>
    %189 = vector.broadcast %188 : vector<8x1xf32> to vector<8x8xf32>
    %190 = arith.mulf %185, %189 : vector<8x8xf32>
    %191 = vector.extract_strided_slice %42 {offsets = [0, 28], sizes = [8, 4], strides = [1, 1]} : vector<8x32xf32> to vector<8x4xf32>
    %cst_71 = arith.constant dense<0.000000e+00> : vector<8x4xf32>
    %192 = tpu.matmul %190, %191, %cst_71 {dimension_numbers = #tpu.dot_dimension_numbers<[1], [0], [0], [1], [0, 0, 1, 1], [], []>} : vector<8x8xf32>, vector<8x4xf32>, vector<8x4xf32> -> vector<8x4xf32>
    %193 = vector.extract_strided_slice %17 {offsets = [28, 0], sizes = [4, 32], strides = [1, 1]} : vector<32x32xf32> to vector<4x32xf32>
    %cst_72 = arith.constant dense<0.000000e+00> : vector<8x32xf32>
    %194 = tpu.matmul %192, %193, %cst_72 {dimension_numbers = #tpu.dot_dimension_numbers<[1], [0], [0], [1], [0, 0, 1, 1], [], []>} : vector<8x4xf32>, vector<4x32xf32>, vector<8x32xf32> -> vector<8x32xf32>
    %195 = arith.addf %176, %194 : vector<8x32xf32>
    %196 = arith.addf %1, %195 : vector<8x32xf32>
    %c0_73 = arith.constant 0 : index
    %c0_74 = arith.constant 0 : index
    %c0_75 = arith.constant 0 : index
    %197 = vector.load %arg10[%c0_73, %c0_74, %c0_75] : memref<2x1x32xf32, #tpu.memory_space<vmem>>, vector<1x1x32xf32>
    %198 = vector.shape_cast %197 : vector<1x1x32xf32> to vector<1x32xf32>
    %c0_76 = arith.constant 0 : index
    %c0_77 = arith.constant 0 : index
    %c0_78 = arith.constant 0 : index
    %199 = vector.load %arg11[%c0_76, %c0_77, %c0_78] : memref<2x1x32xf32, #tpu.memory_space<vmem>>, vector<1x1x32xf32>
    %200 = vector.shape_cast %199 : vector<1x1x32xf32> to vector<1x32xf32>
    %c0_79 = arith.constant 0 : index
    %c0_80 = arith.constant 0 : index
    %c0_81 = arith.constant 0 : index
    %201 = vector.load %arg12[%c0_79, %c0_80, %c0_81] : memref<2x32x32xf32, #tpu.memory_space<vmem>>, vector<1x32x32xf32>
    %202 = vector.shape_cast %201 : vector<1x32x32xf32> to vector<32x32xf32>
    %c0_82 = arith.constant 0 : index
    %c0_83 = arith.constant 0 : index
    %c0_84 = arith.constant 0 : index
    %203 = vector.load %arg13[%c0_82, %c0_83, %c0_84] : memref<2x32x64xf32, #tpu.memory_space<vmem>>, vector<1x32x64xf32>
    %204 = vector.shape_cast %203 : vector<1x32x64xf32> to vector<32x64xf32>
    %c0_85 = arith.constant 0 : index
    %c0_86 = arith.constant 0 : index
    %c0_87 = arith.constant 0 : index
    %205 = vector.load %arg14[%c0_85, %c0_86, %c0_87] : memref<2x32x32xf32, #tpu.memory_space<vmem>>, vector<1x32x32xf32>
    %206 = vector.shape_cast %205 : vector<1x32x32xf32> to vector<32x32xf32>
    %cst_88 = arith.constant dense<0.000000e+00> : vector<8xf32>
    %207 = vector.multi_reduction <add>, %196, %cst_88 [1] : vector<8x32xf32> to vector<8xf32>
    %208 = vector.shape_cast %207 : vector<8xf32> to vector<8x1xf32>
    %cst_89 = arith.constant 3.200000e+01 : f32
    %209 = vector.broadcast %cst_89 : f32 to vector<8x1xf32>
    %210 = arith.divf %208, %209 : vector<8x1xf32>
    %211 = vector.broadcast %210 : vector<8x1xf32> to vector<8x32xf32>
    %212 = arith.subf %196, %211 : vector<8x32xf32>
    %213 = arith.mulf %212, %212 : vector<8x32xf32>
    %cst_90 = arith.constant dense<0.000000e+00> : vector<8xf32>
    %214 = vector.multi_reduction <add>, %213, %cst_90 [1] : vector<8x32xf32> to vector<8xf32>
    %215 = vector.shape_cast %214 : vector<8xf32> to vector<8x1xf32>
    %cst_91 = arith.constant 3.200000e+01 : f32
    %216 = vector.broadcast %cst_91 : f32 to vector<8x1xf32>
    %217 = arith.divf %215, %216 : vector<8x1xf32>
    %cst_92 = arith.constant 9.99999997E-7 : f32
    %218 = vector.broadcast %cst_92 : f32 to vector<8x1xf32>
    %219 = arith.addf %217, %218 : vector<8x1xf32>
    %220 = math.rsqrt %219 : vector<8x1xf32>
    %221 = vector.broadcast %220 : vector<8x1xf32> to vector<8x32xf32>
    %222 = arith.mulf %212, %221 : vector<8x32xf32>
    %223 = vector.broadcast %198 : vector<1x32xf32> to vector<8x32xf32>
    %224 = arith.mulf %222, %223 : vector<8x32xf32>
    %225 = vector.broadcast %200 : vector<1x32xf32> to vector<8x32xf32>
    %226 = arith.addf %224, %225 : vector<8x32xf32>
    %cst_93 = arith.constant dense<0.000000e+00> : vector<8x32xf32>
    %227 = tpu.matmul %226, %202, %cst_93 {dimension_numbers = #tpu.dot_dimension_numbers<[1], [0], [0], [1], [0, 0, 1, 1], [], []>} : vector<8x32xf32>, vector<32x32xf32>, vector<8x32xf32> -> vector<8x32xf32>
    %cst_94 = arith.constant dense<0.000000e+00> : vector<8x64xf32>
    %228 = tpu.matmul %5, %204, %cst_94 {dimension_numbers = #tpu.dot_dimension_numbers<[1], [0], [0], [1], [0, 0, 1, 1], [], []>} : vector<8x32xf32>, vector<32x64xf32>, vector<8x64xf32> -> vector<8x64xf32>
    %229 = vector.extract_strided_slice %228 {offsets = [0, 0], sizes = [8, 32], strides = [1, 1]} : vector<8x64xf32> to vector<8x32xf32>
    %230 = tpu.transpose %229, [1, 0] : vector<8x32xf32> -> vector<32x8xf32>
    %231 = vector.extract_strided_slice %228 {offsets = [0, 32], sizes = [8, 32], strides = [1, 1]} : vector<8x64xf32> to vector<8x32xf32>
    %cst_95 = arith.constant 0.000000e+00 : f32
    %232 = vector.broadcast %cst_95 : f32 to vector<8x32xf32>
    %233 = vector.extract_strided_slice %227 {offsets = [0, 0], sizes = [8, 4], strides = [1, 1]} : vector<8x32xf32> to vector<8x4xf32>
    %234 = vector.extract_strided_slice %230 {offsets = [0, 0], sizes = [4, 8], strides = [1, 1]} : vector<32x8xf32> to vector<4x8xf32>
    %cst_96 = arith.constant dense<0.000000e+00> : vector<8x8xf32>
    %235 = tpu.matmul %233, %234, %cst_96 {dimension_numbers = #tpu.dot_dimension_numbers<[1], [0], [0], [1], [0, 0, 1, 1], [], []>} : vector<8x4xf32>, vector<4x8xf32>, vector<8x8xf32> -> vector<8x8xf32>
    %236 = arith.addf %235, %7 : vector<8x8xf32>
    %cst_97 = arith.constant dense<0xFF800000> : vector<8xf32>
    %237 = vector.multi_reduction <maximumf>, %236, %cst_97 [1] : vector<8x8xf32> to vector<8xf32>
    %238 = vector.shape_cast %237 : vector<8xf32> to vector<8x1xf32>
    %239 = vector.broadcast %238 : vector<8x1xf32> to vector<8x8xf32>
    %240 = arith.subf %236, %239 : vector<8x8xf32>
    %241 = math.exp %240 : vector<8x8xf32>
    %cst_98 = arith.constant dense<0.000000e+00> : vector<8xf32>
    %242 = vector.multi_reduction <add>, %241, %cst_98 [1] : vector<8x8xf32> to vector<8xf32>
    %243 = vector.shape_cast %242 : vector<8xf32> to vector<8x1xf32>
    %244 = tpu.reciprocal %243 : vector<8x1xf32> -> vector<8x1xf32>
    %245 = vector.broadcast %244 : vector<8x1xf32> to vector<8x8xf32>
    %246 = arith.mulf %241, %245 : vector<8x8xf32>
    %247 = vector.extract_strided_slice %231 {offsets = [0, 0], sizes = [8, 4], strides = [1, 1]} : vector<8x32xf32> to vector<8x4xf32>
    %cst_99 = arith.constant dense<0.000000e+00> : vector<8x4xf32>
    %248 = tpu.matmul %246, %247, %cst_99 {dimension_numbers = #tpu.dot_dimension_numbers<[1], [0], [0], [1], [0, 0, 1, 1], [], []>} : vector<8x8xf32>, vector<8x4xf32>, vector<8x4xf32> -> vector<8x4xf32>
    %249 = vector.extract_strided_slice %206 {offsets = [0, 0], sizes = [4, 32], strides = [1, 1]} : vector<32x32xf32> to vector<4x32xf32>
    %cst_100 = arith.constant dense<0.000000e+00> : vector<8x32xf32>
    %250 = tpu.matmul %248, %249, %cst_100 {dimension_numbers = #tpu.dot_dimension_numbers<[1], [0], [0], [1], [0, 0, 1, 1], [], []>} : vector<8x4xf32>, vector<4x32xf32>, vector<8x32xf32> -> vector<8x32xf32>
    %251 = arith.addf %232, %250 : vector<8x32xf32>
    %252 = vector.extract_strided_slice %227 {offsets = [0, 4], sizes = [8, 4], strides = [1, 1]} : vector<8x32xf32> to vector<8x4xf32>
    %253 = vector.extract_strided_slice %230 {offsets = [4, 0], sizes = [4, 8], strides = [1, 1]} : vector<32x8xf32> to vector<4x8xf32>
    %cst_101 = arith.constant dense<0.000000e+00> : vector<8x8xf32>
    %254 = tpu.matmul %252, %253, %cst_101 {dimension_numbers = #tpu.dot_dimension_numbers<[1], [0], [0], [1], [0, 0, 1, 1], [], []>} : vector<8x4xf32>, vector<4x8xf32>, vector<8x8xf32> -> vector<8x8xf32>
    %255 = arith.addf %254, %7 : vector<8x8xf32>
    %cst_102 = arith.constant dense<0xFF800000> : vector<8xf32>
    %256 = vector.multi_reduction <maximumf>, %255, %cst_102 [1] : vector<8x8xf32> to vector<8xf32>
    %257 = vector.shape_cast %256 : vector<8xf32> to vector<8x1xf32>
    %258 = vector.broadcast %257 : vector<8x1xf32> to vector<8x8xf32>
    %259 = arith.subf %255, %258 : vector<8x8xf32>
    %260 = math.exp %259 : vector<8x8xf32>
    %cst_103 = arith.constant dense<0.000000e+00> : vector<8xf32>
    %261 = vector.multi_reduction <add>, %260, %cst_103 [1] : vector<8x8xf32> to vector<8xf32>
    %262 = vector.shape_cast %261 : vector<8xf32> to vector<8x1xf32>
    %263 = tpu.reciprocal %262 : vector<8x1xf32> -> vector<8x1xf32>
    %264 = vector.broadcast %263 : vector<8x1xf32> to vector<8x8xf32>
    %265 = arith.mulf %260, %264 : vector<8x8xf32>
    %266 = vector.extract_strided_slice %231 {offsets = [0, 4], sizes = [8, 4], strides = [1, 1]} : vector<8x32xf32> to vector<8x4xf32>
    %cst_104 = arith.constant dense<0.000000e+00> : vector<8x4xf32>
    %267 = tpu.matmul %265, %266, %cst_104 {dimension_numbers = #tpu.dot_dimension_numbers<[1], [0], [0], [1], [0, 0, 1, 1], [], []>} : vector<8x8xf32>, vector<8x4xf32>, vector<8x4xf32> -> vector<8x4xf32>
    %268 = vector.extract_strided_slice %206 {offsets = [4, 0], sizes = [4, 32], strides = [1, 1]} : vector<32x32xf32> to vector<4x32xf32>
    %cst_105 = arith.constant dense<0.000000e+00> : vector<8x32xf32>
    %269 = tpu.matmul %267, %268, %cst_105 {dimension_numbers = #tpu.dot_dimension_numbers<[1], [0], [0], [1], [0, 0, 1, 1], [], []>} : vector<8x4xf32>, vector<4x32xf32>, vector<8x32xf32> -> vector<8x32xf32>
    %270 = arith.addf %251, %269 : vector<8x32xf32>
    %271 = vector.extract_strided_slice %227 {offsets = [0, 8], sizes = [8, 4], strides = [1, 1]} : vector<8x32xf32> to vector<8x4xf32>
    %272 = vector.extract_strided_slice %230 {offsets = [8, 0], sizes = [4, 8], strides = [1, 1]} : vector<32x8xf32> to vector<4x8xf32>
    %cst_106 = arith.constant dense<0.000000e+00> : vector<8x8xf32>
    %273 = tpu.matmul %271, %272, %cst_106 {dimension_numbers = #tpu.dot_dimension_numbers<[1], [0], [0], [1], [0, 0, 1, 1], [], []>} : vector<8x4xf32>, vector<4x8xf32>, vector<8x8xf32> -> vector<8x8xf32>
    %274 = arith.addf %273, %7 : vector<8x8xf32>
    %cst_107 = arith.constant dense<0xFF800000> : vector<8xf32>
    %275 = vector.multi_reduction <maximumf>, %274, %cst_107 [1] : vector<8x8xf32> to vector<8xf32>
    %276 = vector.shape_cast %275 : vector<8xf32> to vector<8x1xf32>
    %277 = vector.broadcast %276 : vector<8x1xf32> to vector<8x8xf32>
    %278 = arith.subf %274, %277 : vector<8x8xf32>
    %279 = math.exp %278 : vector<8x8xf32>
    %cst_108 = arith.constant dense<0.000000e+00> : vector<8xf32>
    %280 = vector.multi_reduction <add>, %279, %cst_108 [1] : vector<8x8xf32> to vector<8xf32>
    %281 = vector.shape_cast %280 : vector<8xf32> to vector<8x1xf32>
    %282 = tpu.reciprocal %281 : vector<8x1xf32> -> vector<8x1xf32>
    %283 = vector.broadcast %282 : vector<8x1xf32> to vector<8x8xf32>
    %284 = arith.mulf %279, %283 : vector<8x8xf32>
    %285 = vector.extract_strided_slice %231 {offsets = [0, 8], sizes = [8, 4], strides = [1, 1]} : vector<8x32xf32> to vector<8x4xf32>
    %cst_109 = arith.constant dense<0.000000e+00> : vector<8x4xf32>
    %286 = tpu.matmul %284, %285, %cst_109 {dimension_numbers = #tpu.dot_dimension_numbers<[1], [0], [0], [1], [0, 0, 1, 1], [], []>} : vector<8x8xf32>, vector<8x4xf32>, vector<8x4xf32> -> vector<8x4xf32>
    %287 = vector.extract_strided_slice %206 {offsets = [8, 0], sizes = [4, 32], strides = [1, 1]} : vector<32x32xf32> to vector<4x32xf32>
    %cst_110 = arith.constant dense<0.000000e+00> : vector<8x32xf32>
    %288 = tpu.matmul %286, %287, %cst_110 {dimension_numbers = #tpu.dot_dimension_numbers<[1], [0], [0], [1], [0, 0, 1, 1], [], []>} : vector<8x4xf32>, vector<4x32xf32>, vector<8x32xf32> -> vector<8x32xf32>
    %289 = arith.addf %270, %288 : vector<8x32xf32>
    %290 = vector.extract_strided_slice %227 {offsets = [0, 12], sizes = [8, 4], strides = [1, 1]} : vector<8x32xf32> to vector<8x4xf32>
    %291 = vector.extract_strided_slice %230 {offsets = [12, 0], sizes = [4, 8], strides = [1, 1]} : vector<32x8xf32> to vector<4x8xf32>
    %cst_111 = arith.constant dense<0.000000e+00> : vector<8x8xf32>
    %292 = tpu.matmul %290, %291, %cst_111 {dimension_numbers = #tpu.dot_dimension_numbers<[1], [0], [0], [1], [0, 0, 1, 1], [], []>} : vector<8x4xf32>, vector<4x8xf32>, vector<8x8xf32> -> vector<8x8xf32>
    %293 = arith.addf %292, %7 : vector<8x8xf32>
    %cst_112 = arith.constant dense<0xFF800000> : vector<8xf32>
    %294 = vector.multi_reduction <maximumf>, %293, %cst_112 [1] : vector<8x8xf32> to vector<8xf32>
    %295 = vector.shape_cast %294 : vector<8xf32> to vector<8x1xf32>
    %296 = vector.broadcast %295 : vector<8x1xf32> to vector<8x8xf32>
    %297 = arith.subf %293, %296 : vector<8x8xf32>
    %298 = math.exp %297 : vector<8x8xf32>
    %cst_113 = arith.constant dense<0.000000e+00> : vector<8xf32>
    %299 = vector.multi_reduction <add>, %298, %cst_113 [1] : vector<8x8xf32> to vector<8xf32>
    %300 = vector.shape_cast %299 : vector<8xf32> to vector<8x1xf32>
    %301 = tpu.reciprocal %300 : vector<8x1xf32> -> vector<8x1xf32>
    %302 = vector.broadcast %301 : vector<8x1xf32> to vector<8x8xf32>
    %303 = arith.mulf %298, %302 : vector<8x8xf32>
    %304 = vector.extract_strided_slice %231 {offsets = [0, 12], sizes = [8, 4], strides = [1, 1]} : vector<8x32xf32> to vector<8x4xf32>
    %cst_114 = arith.constant dense<0.000000e+00> : vector<8x4xf32>
    %305 = tpu.matmul %303, %304, %cst_114 {dimension_numbers = #tpu.dot_dimension_numbers<[1], [0], [0], [1], [0, 0, 1, 1], [], []>} : vector<8x8xf32>, vector<8x4xf32>, vector<8x4xf32> -> vector<8x4xf32>
    %306 = vector.extract_strided_slice %206 {offsets = [12, 0], sizes = [4, 32], strides = [1, 1]} : vector<32x32xf32> to vector<4x32xf32>
    %cst_115 = arith.constant dense<0.000000e+00> : vector<8x32xf32>
    %307 = tpu.matmul %305, %306, %cst_115 {dimension_numbers = #tpu.dot_dimension_numbers<[1], [0], [0], [1], [0, 0, 1, 1], [], []>} : vector<8x4xf32>, vector<4x32xf32>, vector<8x32xf32> -> vector<8x32xf32>
    %308 = arith.addf %289, %307 : vector<8x32xf32>
    %309 = vector.extract_strided_slice %227 {offsets = [0, 16], sizes = [8, 4], strides = [1, 1]} : vector<8x32xf32> to vector<8x4xf32>
    %310 = vector.extract_strided_slice %230 {offsets = [16, 0], sizes = [4, 8], strides = [1, 1]} : vector<32x8xf32> to vector<4x8xf32>
    %cst_116 = arith.constant dense<0.000000e+00> : vector<8x8xf32>
    %311 = tpu.matmul %309, %310, %cst_116 {dimension_numbers = #tpu.dot_dimension_numbers<[1], [0], [0], [1], [0, 0, 1, 1], [], []>} : vector<8x4xf32>, vector<4x8xf32>, vector<8x8xf32> -> vector<8x8xf32>
    %312 = arith.addf %311, %7 : vector<8x8xf32>
    %cst_117 = arith.constant dense<0xFF800000> : vector<8xf32>
    %313 = vector.multi_reduction <maximumf>, %312, %cst_117 [1] : vector<8x8xf32> to vector<8xf32>
    %314 = vector.shape_cast %313 : vector<8xf32> to vector<8x1xf32>
    %315 = vector.broadcast %314 : vector<8x1xf32> to vector<8x8xf32>
    %316 = arith.subf %312, %315 : vector<8x8xf32>
    %317 = math.exp %316 : vector<8x8xf32>
    %cst_118 = arith.constant dense<0.000000e+00> : vector<8xf32>
    %318 = vector.multi_reduction <add>, %317, %cst_118 [1] : vector<8x8xf32> to vector<8xf32>
    %319 = vector.shape_cast %318 : vector<8xf32> to vector<8x1xf32>
    %320 = tpu.reciprocal %319 : vector<8x1xf32> -> vector<8x1xf32>
    %321 = vector.broadcast %320 : vector<8x1xf32> to vector<8x8xf32>
    %322 = arith.mulf %317, %321 : vector<8x8xf32>
    %323 = vector.extract_strided_slice %231 {offsets = [0, 16], sizes = [8, 4], strides = [1, 1]} : vector<8x32xf32> to vector<8x4xf32>
    %cst_119 = arith.constant dense<0.000000e+00> : vector<8x4xf32>
    %324 = tpu.matmul %322, %323, %cst_119 {dimension_numbers = #tpu.dot_dimension_numbers<[1], [0], [0], [1], [0, 0, 1, 1], [], []>} : vector<8x8xf32>, vector<8x4xf32>, vector<8x4xf32> -> vector<8x4xf32>
    %325 = vector.extract_strided_slice %206 {offsets = [16, 0], sizes = [4, 32], strides = [1, 1]} : vector<32x32xf32> to vector<4x32xf32>
    %cst_120 = arith.constant dense<0.000000e+00> : vector<8x32xf32>
    %326 = tpu.matmul %324, %325, %cst_120 {dimension_numbers = #tpu.dot_dimension_numbers<[1], [0], [0], [1], [0, 0, 1, 1], [], []>} : vector<8x4xf32>, vector<4x32xf32>, vector<8x32xf32> -> vector<8x32xf32>
    %327 = arith.addf %308, %326 : vector<8x32xf32>
    %328 = vector.extract_strided_slice %227 {offsets = [0, 20], sizes = [8, 4], strides = [1, 1]} : vector<8x32xf32> to vector<8x4xf32>
    %329 = vector.extract_strided_slice %230 {offsets = [20, 0], sizes = [4, 8], strides = [1, 1]} : vector<32x8xf32> to vector<4x8xf32>
    %cst_121 = arith.constant dense<0.000000e+00> : vector<8x8xf32>
    %330 = tpu.matmul %328, %329, %cst_121 {dimension_numbers = #tpu.dot_dimension_numbers<[1], [0], [0], [1], [0, 0, 1, 1], [], []>} : vector<8x4xf32>, vector<4x8xf32>, vector<8x8xf32> -> vector<8x8xf32>
    %331 = arith.addf %330, %7 : vector<8x8xf32>
    %cst_122 = arith.constant dense<0xFF800000> : vector<8xf32>
    %332 = vector.multi_reduction <maximumf>, %331, %cst_122 [1] : vector<8x8xf32> to vector<8xf32>
    %333 = vector.shape_cast %332 : vector<8xf32> to vector<8x1xf32>
    %334 = vector.broadcast %333 : vector<8x1xf32> to vector<8x8xf32>
    %335 = arith.subf %331, %334 : vector<8x8xf32>
    %336 = math.exp %335 : vector<8x8xf32>
    %cst_123 = arith.constant dense<0.000000e+00> : vector<8xf32>
    %337 = vector.multi_reduction <add>, %336, %cst_123 [1] : vector<8x8xf32> to vector<8xf32>
    %338 = vector.shape_cast %337 : vector<8xf32> to vector<8x1xf32>
    %339 = tpu.reciprocal %338 : vector<8x1xf32> -> vector<8x1xf32>
    %340 = vector.broadcast %339 : vector<8x1xf32> to vector<8x8xf32>
    %341 = arith.mulf %336, %340 : vector<8x8xf32>
    %342 = vector.extract_strided_slice %231 {offsets = [0, 20], sizes = [8, 4], strides = [1, 1]} : vector<8x32xf32> to vector<8x4xf32>
    %cst_124 = arith.constant dense<0.000000e+00> : vector<8x4xf32>
    %343 = tpu.matmul %341, %342, %cst_124 {dimension_numbers = #tpu.dot_dimension_numbers<[1], [0], [0], [1], [0, 0, 1, 1], [], []>} : vector<8x8xf32>, vector<8x4xf32>, vector<8x4xf32> -> vector<8x4xf32>
    %344 = vector.extract_strided_slice %206 {offsets = [20, 0], sizes = [4, 32], strides = [1, 1]} : vector<32x32xf32> to vector<4x32xf32>
    %cst_125 = arith.constant dense<0.000000e+00> : vector<8x32xf32>
    %345 = tpu.matmul %343, %344, %cst_125 {dimension_numbers = #tpu.dot_dimension_numbers<[1], [0], [0], [1], [0, 0, 1, 1], [], []>} : vector<8x4xf32>, vector<4x32xf32>, vector<8x32xf32> -> vector<8x32xf32>
    %346 = arith.addf %327, %345 : vector<8x32xf32>
    %347 = vector.extract_strided_slice %227 {offsets = [0, 24], sizes = [8, 4], strides = [1, 1]} : vector<8x32xf32> to vector<8x4xf32>
    %348 = vector.extract_strided_slice %230 {offsets = [24, 0], sizes = [4, 8], strides = [1, 1]} : vector<32x8xf32> to vector<4x8xf32>
    %cst_126 = arith.constant dense<0.000000e+00> : vector<8x8xf32>
    %349 = tpu.matmul %347, %348, %cst_126 {dimension_numbers = #tpu.dot_dimension_numbers<[1], [0], [0], [1], [0, 0, 1, 1], [], []>} : vector<8x4xf32>, vector<4x8xf32>, vector<8x8xf32> -> vector<8x8xf32>
    %350 = arith.addf %349, %7 : vector<8x8xf32>
    %cst_127 = arith.constant dense<0xFF800000> : vector<8xf32>
    %351 = vector.multi_reduction <maximumf>, %350, %cst_127 [1] : vector<8x8xf32> to vector<8xf32>
    %352 = vector.shape_cast %351 : vector<8xf32> to vector<8x1xf32>
    %353 = vector.broadcast %352 : vector<8x1xf32> to vector<8x8xf32>
    %354 = arith.subf %350, %353 : vector<8x8xf32>
    %355 = math.exp %354 : vector<8x8xf32>
    %cst_128 = arith.constant dense<0.000000e+00> : vector<8xf32>
    %356 = vector.multi_reduction <add>, %355, %cst_128 [1] : vector<8x8xf32> to vector<8xf32>
    %357 = vector.shape_cast %356 : vector<8xf32> to vector<8x1xf32>
    %358 = tpu.reciprocal %357 : vector<8x1xf32> -> vector<8x1xf32>
    %359 = vector.broadcast %358 : vector<8x1xf32> to vector<8x8xf32>
    %360 = arith.mulf %355, %359 : vector<8x8xf32>
    %361 = vector.extract_strided_slice %231 {offsets = [0, 24], sizes = [8, 4], strides = [1, 1]} : vector<8x32xf32> to vector<8x4xf32>
    %cst_129 = arith.constant dense<0.000000e+00> : vector<8x4xf32>
    %362 = tpu.matmul %360, %361, %cst_129 {dimension_numbers = #tpu.dot_dimension_numbers<[1], [0], [0], [1], [0, 0, 1, 1], [], []>} : vector<8x8xf32>, vector<8x4xf32>, vector<8x4xf32> -> vector<8x4xf32>
    %363 = vector.extract_strided_slice %206 {offsets = [24, 0], sizes = [4, 32], strides = [1, 1]} : vector<32x32xf32> to vector<4x32xf32>
    %cst_130 = arith.constant dense<0.000000e+00> : vector<8x32xf32>
    %364 = tpu.matmul %362, %363, %cst_130 {dimension_numbers = #tpu.dot_dimension_numbers<[1], [0], [0], [1], [0, 0, 1, 1], [], []>} : vector<8x4xf32>, vector<4x32xf32>, vector<8x32xf32> -> vector<8x32xf32>
    %365 = arith.addf %346, %364 : vector<8x32xf32>
    %366 = vector.extract_strided_slice %227 {offsets = [0, 28], sizes = [8, 4], strides = [1, 1]} : vector<8x32xf32> to vector<8x4xf32>
    %367 = vector.extract_strided_slice %230 {offsets = [28, 0], sizes = [4, 8], strides = [1, 1]} : vector<32x8xf32> to vector<4x8xf32>
    %cst_131 = arith.constant dense<0.000000e+00> : vector<8x8xf32>
    %368 = tpu.matmul %366, %367, %cst_131 {dimension_numbers = #tpu.dot_dimension_numbers<[1], [0], [0], [1], [0, 0, 1, 1], [], []>} : vector<8x4xf32>, vector<4x8xf32>, vector<8x8xf32> -> vector<8x8xf32>
    %369 = arith.addf %368, %7 : vector<8x8xf32>
    %cst_132 = arith.constant dense<0xFF800000> : vector<8xf32>
    %370 = vector.multi_reduction <maximumf>, %369, %cst_132 [1] : vector<8x8xf32> to vector<8xf32>
    %371 = vector.shape_cast %370 : vector<8xf32> to vector<8x1xf32>
    %372 = vector.broadcast %371 : vector<8x1xf32> to vector<8x8xf32>
    %373 = arith.subf %369, %372 : vector<8x8xf32>
    %374 = math.exp %373 : vector<8x8xf32>
    %cst_133 = arith.constant dense<0.000000e+00> : vector<8xf32>
    %375 = vector.multi_reduction <add>, %374, %cst_133 [1] : vector<8x8xf32> to vector<8xf32>
    %376 = vector.shape_cast %375 : vector<8xf32> to vector<8x1xf32>
    %377 = tpu.reciprocal %376 : vector<8x1xf32> -> vector<8x1xf32>
    %378 = vector.broadcast %377 : vector<8x1xf32> to vector<8x8xf32>
    %379 = arith.mulf %374, %378 : vector<8x8xf32>
    %380 = vector.extract_strided_slice %231 {offsets = [0, 28], sizes = [8, 4], strides = [1, 1]} : vector<8x32xf32> to vector<8x4xf32>
    %cst_134 = arith.constant dense<0.000000e+00> : vector<8x4xf32>
    %381 = tpu.matmul %379, %380, %cst_134 {dimension_numbers = #tpu.dot_dimension_numbers<[1], [0], [0], [1], [0, 0, 1, 1], [], []>} : vector<8x8xf32>, vector<8x4xf32>, vector<8x4xf32> -> vector<8x4xf32>
    %382 = vector.extract_strided_slice %206 {offsets = [28, 0], sizes = [4, 32], strides = [1, 1]} : vector<32x32xf32> to vector<4x32xf32>
    %cst_135 = arith.constant dense<0.000000e+00> : vector<8x32xf32>
    %383 = tpu.matmul %381, %382, %cst_135 {dimension_numbers = #tpu.dot_dimension_numbers<[1], [0], [0], [1], [0, 0, 1, 1], [], []>} : vector<8x4xf32>, vector<4x32xf32>, vector<8x32xf32> -> vector<8x32xf32>
    %384 = arith.addf %365, %383 : vector<8x32xf32>
    %385 = arith.addf %196, %384 : vector<8x32xf32>
    %c0_136 = arith.constant 0 : index
    %c0_137 = arith.constant 0 : index
    %c0_138 = arith.constant 0 : index
    %386 = vector.load %arg15[%c0_136, %c0_137, %c0_138] : memref<2x1x32xf32, #tpu.memory_space<vmem>>, vector<1x1x32xf32>
    %387 = vector.shape_cast %386 : vector<1x1x32xf32> to vector<1x32xf32>
    %c0_139 = arith.constant 0 : index
    %c0_140 = arith.constant 0 : index
    %c0_141 = arith.constant 0 : index
    %388 = vector.load %arg16[%c0_139, %c0_140, %c0_141] : memref<2x1x32xf32, #tpu.memory_space<vmem>>, vector<1x1x32xf32>
    %389 = vector.shape_cast %388 : vector<1x1x32xf32> to vector<1x32xf32>
    %c0_142 = arith.constant 0 : index
    %c0_143 = arith.constant 0 : index
    %c0_144 = arith.constant 0 : index
    %390 = vector.load %arg17[%c0_142, %c0_143, %c0_144] : memref<2x32x64xf32, #tpu.memory_space<vmem>>, vector<1x32x64xf32>
    %391 = vector.shape_cast %390 : vector<1x32x64xf32> to vector<32x64xf32>
    %c0_145 = arith.constant 0 : index
    %c0_146 = arith.constant 0 : index
    %c0_147 = arith.constant 0 : index
    %392 = vector.load %arg18[%c0_145, %c0_146, %c0_147] : memref<2x1x64xf32, #tpu.memory_space<vmem>>, vector<1x1x64xf32>
    %393 = vector.shape_cast %392 : vector<1x1x64xf32> to vector<1x64xf32>
    %c0_148 = arith.constant 0 : index
    %c0_149 = arith.constant 0 : index
    %c0_150 = arith.constant 0 : index
    %394 = vector.load %arg19[%c0_148, %c0_149, %c0_150] : memref<2x64x32xf32, #tpu.memory_space<vmem>>, vector<1x64x32xf32>
    %395 = vector.shape_cast %394 : vector<1x64x32xf32> to vector<64x32xf32>
    %c0_151 = arith.constant 0 : index
    %c0_152 = arith.constant 0 : index
    %c0_153 = arith.constant 0 : index
    %396 = vector.load %arg20[%c0_151, %c0_152, %c0_153] : memref<2x1x32xf32, #tpu.memory_space<vmem>>, vector<1x1x32xf32>
    %397 = vector.shape_cast %396 : vector<1x1x32xf32> to vector<1x32xf32>
    %cst_154 = arith.constant dense<0.000000e+00> : vector<8xf32>
    %398 = vector.multi_reduction <add>, %385, %cst_154 [1] : vector<8x32xf32> to vector<8xf32>
    %399 = vector.shape_cast %398 : vector<8xf32> to vector<8x1xf32>
    %cst_155 = arith.constant 3.200000e+01 : f32
    %400 = vector.broadcast %cst_155 : f32 to vector<8x1xf32>
    %401 = arith.divf %399, %400 : vector<8x1xf32>
    %402 = vector.broadcast %401 : vector<8x1xf32> to vector<8x32xf32>
    %403 = arith.subf %385, %402 : vector<8x32xf32>
    %404 = arith.mulf %403, %403 : vector<8x32xf32>
    %cst_156 = arith.constant dense<0.000000e+00> : vector<8xf32>
    %405 = vector.multi_reduction <add>, %404, %cst_156 [1] : vector<8x32xf32> to vector<8xf32>
    %406 = vector.shape_cast %405 : vector<8xf32> to vector<8x1xf32>
    %cst_157 = arith.constant 3.200000e+01 : f32
    %407 = vector.broadcast %cst_157 : f32 to vector<8x1xf32>
    %408 = arith.divf %406, %407 : vector<8x1xf32>
    %cst_158 = arith.constant 9.99999997E-7 : f32
    %409 = vector.broadcast %cst_158 : f32 to vector<8x1xf32>
    %410 = arith.addf %408, %409 : vector<8x1xf32>
    %411 = math.rsqrt %410 : vector<8x1xf32>
    %412 = vector.broadcast %411 : vector<8x1xf32> to vector<8x32xf32>
    %413 = arith.mulf %403, %412 : vector<8x32xf32>
    %414 = vector.broadcast %387 : vector<1x32xf32> to vector<8x32xf32>
    %415 = arith.mulf %413, %414 : vector<8x32xf32>
    %416 = vector.broadcast %389 : vector<1x32xf32> to vector<8x32xf32>
    %417 = arith.addf %415, %416 : vector<8x32xf32>
    %cst_159 = arith.constant dense<0.000000e+00> : vector<8x64xf32>
    %418 = tpu.matmul %417, %391, %cst_159 {dimension_numbers = #tpu.dot_dimension_numbers<[1], [0], [0], [1], [0, 0, 1, 1], [], []>} : vector<8x32xf32>, vector<32x64xf32>, vector<8x64xf32> -> vector<8x64xf32>
    %419 = vector.broadcast %393 : vector<1x64xf32> to vector<8x64xf32>
    %420 = arith.addf %418, %419 : vector<8x64xf32>
    %cst_160 = arith.constant 0.000000e+00 : f32
    %421 = vector.broadcast %cst_160 : f32 to vector<8x64xf32>
    %422 = arith.maximumf %420, %421 : vector<8x64xf32>
    %cst_161 = arith.constant dense<0.000000e+00> : vector<8x32xf32>
    %423 = tpu.matmul %422, %395, %cst_161 {dimension_numbers = #tpu.dot_dimension_numbers<[1], [0], [0], [1], [0, 0, 1, 1], [], []>} : vector<8x64xf32>, vector<64x32xf32>, vector<8x32xf32> -> vector<8x32xf32>
    %424 = arith.addf %385, %423 : vector<8x32xf32>
    %425 = vector.broadcast %397 : vector<1x32xf32> to vector<8x32xf32>
    %426 = arith.addf %424, %425 : vector<8x32xf32>
    %c1 = arith.constant 1 : index
    %c0_162 = arith.constant 0 : index
    %c0_163 = arith.constant 0 : index
    %427 = vector.load %arg5[%c1, %c0_162, %c0_163] : memref<2x1x32xf32, #tpu.memory_space<vmem>>, vector<1x1x32xf32>
    %428 = vector.shape_cast %427 : vector<1x1x32xf32> to vector<1x32xf32>
    %c1_164 = arith.constant 1 : index
    %c0_165 = arith.constant 0 : index
    %c0_166 = arith.constant 0 : index
    %429 = vector.load %arg6[%c1_164, %c0_165, %c0_166] : memref<2x1x32xf32, #tpu.memory_space<vmem>>, vector<1x1x32xf32>
    %430 = vector.shape_cast %429 : vector<1x1x32xf32> to vector<1x32xf32>
    %c1_167 = arith.constant 1 : index
    %c0_168 = arith.constant 0 : index
    %c0_169 = arith.constant 0 : index
    %431 = vector.load %arg7[%c1_167, %c0_168, %c0_169] : memref<2x32x32xf32, #tpu.memory_space<vmem>>, vector<1x32x32xf32>
    %432 = vector.shape_cast %431 : vector<1x32x32xf32> to vector<32x32xf32>
    %c1_170 = arith.constant 1 : index
    %c0_171 = arith.constant 0 : index
    %c0_172 = arith.constant 0 : index
    %433 = vector.load %arg8[%c1_170, %c0_171, %c0_172] : memref<2x32x64xf32, #tpu.memory_space<vmem>>, vector<1x32x64xf32>
    %434 = vector.shape_cast %433 : vector<1x32x64xf32> to vector<32x64xf32>
    %c1_173 = arith.constant 1 : index
    %c0_174 = arith.constant 0 : index
    %c0_175 = arith.constant 0 : index
    %435 = vector.load %arg9[%c1_173, %c0_174, %c0_175] : memref<2x32x32xf32, #tpu.memory_space<vmem>>, vector<1x32x32xf32>
    %436 = vector.shape_cast %435 : vector<1x32x32xf32> to vector<32x32xf32>
    %cst_176 = arith.constant dense<0.000000e+00> : vector<8xf32>
    %437 = vector.multi_reduction <add>, %426, %cst_176 [1] : vector<8x32xf32> to vector<8xf32>
    %438 = vector.shape_cast %437 : vector<8xf32> to vector<8x1xf32>
    %cst_177 = arith.constant 3.200000e+01 : f32
    %439 = vector.broadcast %cst_177 : f32 to vector<8x1xf32>
    %440 = arith.divf %438, %439 : vector<8x1xf32>
    %441 = vector.broadcast %440 : vector<8x1xf32> to vector<8x32xf32>
    %442 = arith.subf %426, %441 : vector<8x32xf32>
    %443 = arith.mulf %442, %442 : vector<8x32xf32>
    %cst_178 = arith.constant dense<0.000000e+00> : vector<8xf32>
    %444 = vector.multi_reduction <add>, %443, %cst_178 [1] : vector<8x32xf32> to vector<8xf32>
    %445 = vector.shape_cast %444 : vector<8xf32> to vector<8x1xf32>
    %cst_179 = arith.constant 3.200000e+01 : f32
    %446 = vector.broadcast %cst_179 : f32 to vector<8x1xf32>
    %447 = arith.divf %445, %446 : vector<8x1xf32>
    %cst_180 = arith.constant 9.99999997E-7 : f32
    %448 = vector.broadcast %cst_180 : f32 to vector<8x1xf32>
    %449 = arith.addf %447, %448 : vector<8x1xf32>
    %450 = math.rsqrt %449 : vector<8x1xf32>
    %451 = vector.broadcast %450 : vector<8x1xf32> to vector<8x32xf32>
    %452 = arith.mulf %442, %451 : vector<8x32xf32>
    %453 = vector.broadcast %428 : vector<1x32xf32> to vector<8x32xf32>
    %454 = arith.mulf %452, %453 : vector<8x32xf32>
    %455 = vector.broadcast %430 : vector<1x32xf32> to vector<8x32xf32>
    %456 = arith.addf %454, %455 : vector<8x32xf32>
    %cst_181 = arith.constant dense<0.000000e+00> : vector<8x32xf32>
    %457 = tpu.matmul %456, %432, %cst_181 {dimension_numbers = #tpu.dot_dimension_numbers<[1], [0], [0], [1], [0, 0, 1, 1], [], []>} : vector<8x32xf32>, vector<32x32xf32>, vector<8x32xf32> -> vector<8x32xf32>
    %cst_182 = arith.constant dense<0.000000e+00> : vector<8x64xf32>
    %458 = tpu.matmul %456, %434, %cst_182 {dimension_numbers = #tpu.dot_dimension_numbers<[1], [0], [0], [1], [0, 0, 1, 1], [], []>} : vector<8x32xf32>, vector<32x64xf32>, vector<8x64xf32> -> vector<8x64xf32>
    %459 = vector.extract_strided_slice %458 {offsets = [0, 0], sizes = [8, 32], strides = [1, 1]} : vector<8x64xf32> to vector<8x32xf32>
    %460 = tpu.transpose %459, [1, 0] : vector<8x32xf32> -> vector<32x8xf32>
    %461 = vector.extract_strided_slice %458 {offsets = [0, 32], sizes = [8, 32], strides = [1, 1]} : vector<8x64xf32> to vector<8x32xf32>
    %cst_183 = arith.constant 0.000000e+00 : f32
    %462 = vector.broadcast %cst_183 : f32 to vector<8x32xf32>
    %463 = vector.extract_strided_slice %457 {offsets = [0, 0], sizes = [8, 4], strides = [1, 1]} : vector<8x32xf32> to vector<8x4xf32>
    %464 = vector.extract_strided_slice %460 {offsets = [0, 0], sizes = [4, 8], strides = [1, 1]} : vector<32x8xf32> to vector<4x8xf32>
    %cst_184 = arith.constant dense<0.000000e+00> : vector<8x8xf32>
    %465 = tpu.matmul %463, %464, %cst_184 {dimension_numbers = #tpu.dot_dimension_numbers<[1], [0], [0], [1], [0, 0, 1, 1], [], []>} : vector<8x4xf32>, vector<4x8xf32>, vector<8x8xf32> -> vector<8x8xf32>
    %466 = arith.addf %465, %3 : vector<8x8xf32>
    %cst_185 = arith.constant dense<0xFF800000> : vector<8xf32>
    %467 = vector.multi_reduction <maximumf>, %466, %cst_185 [1] : vector<8x8xf32> to vector<8xf32>
    %468 = vector.shape_cast %467 : vector<8xf32> to vector<8x1xf32>
    %469 = vector.broadcast %468 : vector<8x1xf32> to vector<8x8xf32>
    %470 = arith.subf %466, %469 : vector<8x8xf32>
    %471 = math.exp %470 : vector<8x8xf32>
    %cst_186 = arith.constant dense<0.000000e+00> : vector<8xf32>
    %472 = vector.multi_reduction <add>, %471, %cst_186 [1] : vector<8x8xf32> to vector<8xf32>
    %473 = vector.shape_cast %472 : vector<8xf32> to vector<8x1xf32>
    %474 = tpu.reciprocal %473 : vector<8x1xf32> -> vector<8x1xf32>
    %475 = vector.broadcast %474 : vector<8x1xf32> to vector<8x8xf32>
    %476 = arith.mulf %471, %475 : vector<8x8xf32>
    %477 = vector.extract_strided_slice %461 {offsets = [0, 0], sizes = [8, 4], strides = [1, 1]} : vector<8x32xf32> to vector<8x4xf32>
    %cst_187 = arith.constant dense<0.000000e+00> : vector<8x4xf32>
    %478 = tpu.matmul %476, %477, %cst_187 {dimension_numbers = #tpu.dot_dimension_numbers<[1], [0], [0], [1], [0, 0, 1, 1], [], []>} : vector<8x8xf32>, vector<8x4xf32>, vector<8x4xf32> -> vector<8x4xf32>
    %479 = vector.extract_strided_slice %436 {offsets = [0, 0], sizes = [4, 32], strides = [1, 1]} : vector<32x32xf32> to vector<4x32xf32>
    %cst_188 = arith.constant dense<0.000000e+00> : vector<8x32xf32>
    %480 = tpu.matmul %478, %479, %cst_188 {dimension_numbers = #tpu.dot_dimension_numbers<[1], [0], [0], [1], [0, 0, 1, 1], [], []>} : vector<8x4xf32>, vector<4x32xf32>, vector<8x32xf32> -> vector<8x32xf32>
    %481 = arith.addf %462, %480 : vector<8x32xf32>
    %482 = vector.extract_strided_slice %457 {offsets = [0, 4], sizes = [8, 4], strides = [1, 1]} : vector<8x32xf32> to vector<8x4xf32>
    %483 = vector.extract_strided_slice %460 {offsets = [4, 0], sizes = [4, 8], strides = [1, 1]} : vector<32x8xf32> to vector<4x8xf32>
    %cst_189 = arith.constant dense<0.000000e+00> : vector<8x8xf32>
    %484 = tpu.matmul %482, %483, %cst_189 {dimension_numbers = #tpu.dot_dimension_numbers<[1], [0], [0], [1], [0, 0, 1, 1], [], []>} : vector<8x4xf32>, vector<4x8xf32>, vector<8x8xf32> -> vector<8x8xf32>
    %485 = arith.addf %484, %3 : vector<8x8xf32>
    %cst_190 = arith.constant dense<0xFF800000> : vector<8xf32>
    %486 = vector.multi_reduction <maximumf>, %485, %cst_190 [1] : vector<8x8xf32> to vector<8xf32>
    %487 = vector.shape_cast %486 : vector<8xf32> to vector<8x1xf32>
    %488 = vector.broadcast %487 : vector<8x1xf32> to vector<8x8xf32>
    %489 = arith.subf %485, %488 : vector<8x8xf32>
    %490 = math.exp %489 : vector<8x8xf32>
    %cst_191 = arith.constant dense<0.000000e+00> : vector<8xf32>
    %491 = vector.multi_reduction <add>, %490, %cst_191 [1] : vector<8x8xf32> to vector<8xf32>
    %492 = vector.shape_cast %491 : vector<8xf32> to vector<8x1xf32>
    %493 = tpu.reciprocal %492 : vector<8x1xf32> -> vector<8x1xf32>
    %494 = vector.broadcast %493 : vector<8x1xf32> to vector<8x8xf32>
    %495 = arith.mulf %490, %494 : vector<8x8xf32>
    %496 = vector.extract_strided_slice %461 {offsets = [0, 4], sizes = [8, 4], strides = [1, 1]} : vector<8x32xf32> to vector<8x4xf32>
    %cst_192 = arith.constant dense<0.000000e+00> : vector<8x4xf32>
    %497 = tpu.matmul %495, %496, %cst_192 {dimension_numbers = #tpu.dot_dimension_numbers<[1], [0], [0], [1], [0, 0, 1, 1], [], []>} : vector<8x8xf32>, vector<8x4xf32>, vector<8x4xf32> -> vector<8x4xf32>
    %498 = vector.extract_strided_slice %436 {offsets = [4, 0], sizes = [4, 32], strides = [1, 1]} : vector<32x32xf32> to vector<4x32xf32>
    %cst_193 = arith.constant dense<0.000000e+00> : vector<8x32xf32>
    %499 = tpu.matmul %497, %498, %cst_193 {dimension_numbers = #tpu.dot_dimension_numbers<[1], [0], [0], [1], [0, 0, 1, 1], [], []>} : vector<8x4xf32>, vector<4x32xf32>, vector<8x32xf32> -> vector<8x32xf32>
    %500 = arith.addf %481, %499 : vector<8x32xf32>
    %501 = vector.extract_strided_slice %457 {offsets = [0, 8], sizes = [8, 4], strides = [1, 1]} : vector<8x32xf32> to vector<8x4xf32>
    %502 = vector.extract_strided_slice %460 {offsets = [8, 0], sizes = [4, 8], strides = [1, 1]} : vector<32x8xf32> to vector<4x8xf32>
    %cst_194 = arith.constant dense<0.000000e+00> : vector<8x8xf32>
    %503 = tpu.matmul %501, %502, %cst_194 {dimension_numbers = #tpu.dot_dimension_numbers<[1], [0], [0], [1], [0, 0, 1, 1], [], []>} : vector<8x4xf32>, vector<4x8xf32>, vector<8x8xf32> -> vector<8x8xf32>
    %504 = arith.addf %503, %3 : vector<8x8xf32>
    %cst_195 = arith.constant dense<0xFF800000> : vector<8xf32>
    %505 = vector.multi_reduction <maximumf>, %504, %cst_195 [1] : vector<8x8xf32> to vector<8xf32>
    %506 = vector.shape_cast %505 : vector<8xf32> to vector<8x1xf32>
    %507 = vector.broadcast %506 : vector<8x1xf32> to vector<8x8xf32>
    %508 = arith.subf %504, %507 : vector<8x8xf32>
    %509 = math.exp %508 : vector<8x8xf32>
    %cst_196 = arith.constant dense<0.000000e+00> : vector<8xf32>
    %510 = vector.multi_reduction <add>, %509, %cst_196 [1] : vector<8x8xf32> to vector<8xf32>
    %511 = vector.shape_cast %510 : vector<8xf32> to vector<8x1xf32>
    %512 = tpu.reciprocal %511 : vector<8x1xf32> -> vector<8x1xf32>
    %513 = vector.broadcast %512 : vector<8x1xf32> to vector<8x8xf32>
    %514 = arith.mulf %509, %513 : vector<8x8xf32>
    %515 = vector.extract_strided_slice %461 {offsets = [0, 8], sizes = [8, 4], strides = [1, 1]} : vector<8x32xf32> to vector<8x4xf32>
    %cst_197 = arith.constant dense<0.000000e+00> : vector<8x4xf32>
    %516 = tpu.matmul %514, %515, %cst_197 {dimension_numbers = #tpu.dot_dimension_numbers<[1], [0], [0], [1], [0, 0, 1, 1], [], []>} : vector<8x8xf32>, vector<8x4xf32>, vector<8x4xf32> -> vector<8x4xf32>
    %517 = vector.extract_strided_slice %436 {offsets = [8, 0], sizes = [4, 32], strides = [1, 1]} : vector<32x32xf32> to vector<4x32xf32>
    %cst_198 = arith.constant dense<0.000000e+00> : vector<8x32xf32>
    %518 = tpu.matmul %516, %517, %cst_198 {dimension_numbers = #tpu.dot_dimension_numbers<[1], [0], [0], [1], [0, 0, 1, 1], [], []>} : vector<8x4xf32>, vector<4x32xf32>, vector<8x32xf32> -> vector<8x32xf32>
    %519 = arith.addf %500, %518 : vector<8x32xf32>
    %520 = vector.extract_strided_slice %457 {offsets = [0, 12], sizes = [8, 4], strides = [1, 1]} : vector<8x32xf32> to vector<8x4xf32>
    %521 = vector.extract_strided_slice %460 {offsets = [12, 0], sizes = [4, 8], strides = [1, 1]} : vector<32x8xf32> to vector<4x8xf32>
    %cst_199 = arith.constant dense<0.000000e+00> : vector<8x8xf32>
    %522 = tpu.matmul %520, %521, %cst_199 {dimension_numbers = #tpu.dot_dimension_numbers<[1], [0], [0], [1], [0, 0, 1, 1], [], []>} : vector<8x4xf32>, vector<4x8xf32>, vector<8x8xf32> -> vector<8x8xf32>
    %523 = arith.addf %522, %3 : vector<8x8xf32>
    %cst_200 = arith.constant dense<0xFF800000> : vector<8xf32>
    %524 = vector.multi_reduction <maximumf>, %523, %cst_200 [1] : vector<8x8xf32> to vector<8xf32>
    %525 = vector.shape_cast %524 : vector<8xf32> to vector<8x1xf32>
    %526 = vector.broadcast %525 : vector<8x1xf32> to vector<8x8xf32>
    %527 = arith.subf %523, %526 : vector<8x8xf32>
    %528 = math.exp %527 : vector<8x8xf32>
    %cst_201 = arith.constant dense<0.000000e+00> : vector<8xf32>
    %529 = vector.multi_reduction <add>, %528, %cst_201 [1] : vector<8x8xf32> to vector<8xf32>
    %530 = vector.shape_cast %529 : vector<8xf32> to vector<8x1xf32>
    %531 = tpu.reciprocal %530 : vector<8x1xf32> -> vector<8x1xf32>
    %532 = vector.broadcast %531 : vector<8x1xf32> to vector<8x8xf32>
    %533 = arith.mulf %528, %532 : vector<8x8xf32>
    %534 = vector.extract_strided_slice %461 {offsets = [0, 12], sizes = [8, 4], strides = [1, 1]} : vector<8x32xf32> to vector<8x4xf32>
    %cst_202 = arith.constant dense<0.000000e+00> : vector<8x4xf32>
    %535 = tpu.matmul %533, %534, %cst_202 {dimension_numbers = #tpu.dot_dimension_numbers<[1], [0], [0], [1], [0, 0, 1, 1], [], []>} : vector<8x8xf32>, vector<8x4xf32>, vector<8x4xf32> -> vector<8x4xf32>
    %536 = vector.extract_strided_slice %436 {offsets = [12, 0], sizes = [4, 32], strides = [1, 1]} : vector<32x32xf32> to vector<4x32xf32>
    %cst_203 = arith.constant dense<0.000000e+00> : vector<8x32xf32>
    %537 = tpu.matmul %535, %536, %cst_203 {dimension_numbers = #tpu.dot_dimension_numbers<[1], [0], [0], [1], [0, 0, 1, 1], [], []>} : vector<8x4xf32>, vector<4x32xf32>, vector<8x32xf32> -> vector<8x32xf32>
    %538 = arith.addf %519, %537 : vector<8x32xf32>
    %539 = vector.extract_strided_slice %457 {offsets = [0, 16], sizes = [8, 4], strides = [1, 1]} : vector<8x32xf32> to vector<8x4xf32>
    %540 = vector.extract_strided_slice %460 {offsets = [16, 0], sizes = [4, 8], strides = [1, 1]} : vector<32x8xf32> to vector<4x8xf32>
    %cst_204 = arith.constant dense<0.000000e+00> : vector<8x8xf32>
    %541 = tpu.matmul %539, %540, %cst_204 {dimension_numbers = #tpu.dot_dimension_numbers<[1], [0], [0], [1], [0, 0, 1, 1], [], []>} : vector<8x4xf32>, vector<4x8xf32>, vector<8x8xf32> -> vector<8x8xf32>
    %542 = arith.addf %541, %3 : vector<8x8xf32>
    %cst_205 = arith.constant dense<0xFF800000> : vector<8xf32>
    %543 = vector.multi_reduction <maximumf>, %542, %cst_205 [1] : vector<8x8xf32> to vector<8xf32>
    %544 = vector.shape_cast %543 : vector<8xf32> to vector<8x1xf32>
    %545 = vector.broadcast %544 : vector<8x1xf32> to vector<8x8xf32>
    %546 = arith.subf %542, %545 : vector<8x8xf32>
    %547 = math.exp %546 : vector<8x8xf32>
    %cst_206 = arith.constant dense<0.000000e+00> : vector<8xf32>
    %548 = vector.multi_reduction <add>, %547, %cst_206 [1] : vector<8x8xf32> to vector<8xf32>
    %549 = vector.shape_cast %548 : vector<8xf32> to vector<8x1xf32>
    %550 = tpu.reciprocal %549 : vector<8x1xf32> -> vector<8x1xf32>
    %551 = vector.broadcast %550 : vector<8x1xf32> to vector<8x8xf32>
    %552 = arith.mulf %547, %551 : vector<8x8xf32>
    %553 = vector.extract_strided_slice %461 {offsets = [0, 16], sizes = [8, 4], strides = [1, 1]} : vector<8x32xf32> to vector<8x4xf32>
    %cst_207 = arith.constant dense<0.000000e+00> : vector<8x4xf32>
    %554 = tpu.matmul %552, %553, %cst_207 {dimension_numbers = #tpu.dot_dimension_numbers<[1], [0], [0], [1], [0, 0, 1, 1], [], []>} : vector<8x8xf32>, vector<8x4xf32>, vector<8x4xf32> -> vector<8x4xf32>
    %555 = vector.extract_strided_slice %436 {offsets = [16, 0], sizes = [4, 32], strides = [1, 1]} : vector<32x32xf32> to vector<4x32xf32>
    %cst_208 = arith.constant dense<0.000000e+00> : vector<8x32xf32>
    %556 = tpu.matmul %554, %555, %cst_208 {dimension_numbers = #tpu.dot_dimension_numbers<[1], [0], [0], [1], [0, 0, 1, 1], [], []>} : vector<8x4xf32>, vector<4x32xf32>, vector<8x32xf32> -> vector<8x32xf32>
    %557 = arith.addf %538, %556 : vector<8x32xf32>
    %558 = vector.extract_strided_slice %457 {offsets = [0, 20], sizes = [8, 4], strides = [1, 1]} : vector<8x32xf32> to vector<8x4xf32>
    %559 = vector.extract_strided_slice %460 {offsets = [20, 0], sizes = [4, 8], strides = [1, 1]} : vector<32x8xf32> to vector<4x8xf32>
    %cst_209 = arith.constant dense<0.000000e+00> : vector<8x8xf32>
    %560 = tpu.matmul %558, %559, %cst_209 {dimension_numbers = #tpu.dot_dimension_numbers<[1], [0], [0], [1], [0, 0, 1, 1], [], []>} : vector<8x4xf32>, vector<4x8xf32>, vector<8x8xf32> -> vector<8x8xf32>
    %561 = arith.addf %560, %3 : vector<8x8xf32>
    %cst_210 = arith.constant dense<0xFF800000> : vector<8xf32>
    %562 = vector.multi_reduction <maximumf>, %561, %cst_210 [1] : vector<8x8xf32> to vector<8xf32>
    %563 = vector.shape_cast %562 : vector<8xf32> to vector<8x1xf32>
    %564 = vector.broadcast %563 : vector<8x1xf32> to vector<8x8xf32>
    %565 = arith.subf %561, %564 : vector<8x8xf32>
    %566 = math.exp %565 : vector<8x8xf32>
    %cst_211 = arith.constant dense<0.000000e+00> : vector<8xf32>
    %567 = vector.multi_reduction <add>, %566, %cst_211 [1] : vector<8x8xf32> to vector<8xf32>
    %568 = vector.shape_cast %567 : vector<8xf32> to vector<8x1xf32>
    %569 = tpu.reciprocal %568 : vector<8x1xf32> -> vector<8x1xf32>
    %570 = vector.broadcast %569 : vector<8x1xf32> to vector<8x8xf32>
    %571 = arith.mulf %566, %570 : vector<8x8xf32>
    %572 = vector.extract_strided_slice %461 {offsets = [0, 20], sizes = [8, 4], strides = [1, 1]} : vector<8x32xf32> to vector<8x4xf32>
    %cst_212 = arith.constant dense<0.000000e+00> : vector<8x4xf32>
    %573 = tpu.matmul %571, %572, %cst_212 {dimension_numbers = #tpu.dot_dimension_numbers<[1], [0], [0], [1], [0, 0, 1, 1], [], []>} : vector<8x8xf32>, vector<8x4xf32>, vector<8x4xf32> -> vector<8x4xf32>
    %574 = vector.extract_strided_slice %436 {offsets = [20, 0], sizes = [4, 32], strides = [1, 1]} : vector<32x32xf32> to vector<4x32xf32>
    %cst_213 = arith.constant dense<0.000000e+00> : vector<8x32xf32>
    %575 = tpu.matmul %573, %574, %cst_213 {dimension_numbers = #tpu.dot_dimension_numbers<[1], [0], [0], [1], [0, 0, 1, 1], [], []>} : vector<8x4xf32>, vector<4x32xf32>, vector<8x32xf32> -> vector<8x32xf32>
    %576 = arith.addf %557, %575 : vector<8x32xf32>
    %577 = vector.extract_strided_slice %457 {offsets = [0, 24], sizes = [8, 4], strides = [1, 1]} : vector<8x32xf32> to vector<8x4xf32>
    %578 = vector.extract_strided_slice %460 {offsets = [24, 0], sizes = [4, 8], strides = [1, 1]} : vector<32x8xf32> to vector<4x8xf32>
    %cst_214 = arith.constant dense<0.000000e+00> : vector<8x8xf32>
    %579 = tpu.matmul %577, %578, %cst_214 {dimension_numbers = #tpu.dot_dimension_numbers<[1], [0], [0], [1], [0, 0, 1, 1], [], []>} : vector<8x4xf32>, vector<4x8xf32>, vector<8x8xf32> -> vector<8x8xf32>
    %580 = arith.addf %579, %3 : vector<8x8xf32>
    %cst_215 = arith.constant dense<0xFF800000> : vector<8xf32>
    %581 = vector.multi_reduction <maximumf>, %580, %cst_215 [1] : vector<8x8xf32> to vector<8xf32>
    %582 = vector.shape_cast %581 : vector<8xf32> to vector<8x1xf32>
    %583 = vector.broadcast %582 : vector<8x1xf32> to vector<8x8xf32>
    %584 = arith.subf %580, %583 : vector<8x8xf32>
    %585 = math.exp %584 : vector<8x8xf32>
    %cst_216 = arith.constant dense<0.000000e+00> : vector<8xf32>
    %586 = vector.multi_reduction <add>, %585, %cst_216 [1] : vector<8x8xf32> to vector<8xf32>
    %587 = vector.shape_cast %586 : vector<8xf32> to vector<8x1xf32>
    %588 = tpu.reciprocal %587 : vector<8x1xf32> -> vector<8x1xf32>
    %589 = vector.broadcast %588 : vector<8x1xf32> to vector<8x8xf32>
    %590 = arith.mulf %585, %589 : vector<8x8xf32>
    %591 = vector.extract_strided_slice %461 {offsets = [0, 24], sizes = [8, 4], strides = [1, 1]} : vector<8x32xf32> to vector<8x4xf32>
    %cst_217 = arith.constant dense<0.000000e+00> : vector<8x4xf32>
    %592 = tpu.matmul %590, %591, %cst_217 {dimension_numbers = #tpu.dot_dimension_numbers<[1], [0], [0], [1], [0, 0, 1, 1], [], []>} : vector<8x8xf32>, vector<8x4xf32>, vector<8x4xf32> -> vector<8x4xf32>
    %593 = vector.extract_strided_slice %436 {offsets = [24, 0], sizes = [4, 32], strides = [1, 1]} : vector<32x32xf32> to vector<4x32xf32>
    %cst_218 = arith.constant dense<0.000000e+00> : vector<8x32xf32>
    %594 = tpu.matmul %592, %593, %cst_218 {dimension_numbers = #tpu.dot_dimension_numbers<[1], [0], [0], [1], [0, 0, 1, 1], [], []>} : vector<8x4xf32>, vector<4x32xf32>, vector<8x32xf32> -> vector<8x32xf32>
    %595 = arith.addf %576, %594 : vector<8x32xf32>
    %596 = vector.extract_strided_slice %457 {offsets = [0, 28], sizes = [8, 4], strides = [1, 1]} : vector<8x32xf32> to vector<8x4xf32>
    %597 = vector.extract_strided_slice %460 {offsets = [28, 0], sizes = [4, 8], strides = [1, 1]} : vector<32x8xf32> to vector<4x8xf32>
    %cst_219 = arith.constant dense<0.000000e+00> : vector<8x8xf32>
    %598 = tpu.matmul %596, %597, %cst_219 {dimension_numbers = #tpu.dot_dimension_numbers<[1], [0], [0], [1], [0, 0, 1, 1], [], []>} : vector<8x4xf32>, vector<4x8xf32>, vector<8x8xf32> -> vector<8x8xf32>
    %599 = arith.addf %598, %3 : vector<8x8xf32>
    %cst_220 = arith.constant dense<0xFF800000> : vector<8xf32>
    %600 = vector.multi_reduction <maximumf>, %599, %cst_220 [1] : vector<8x8xf32> to vector<8xf32>
    %601 = vector.shape_cast %600 : vector<8xf32> to vector<8x1xf32>
    %602 = vector.broadcast %601 : vector<8x1xf32> to vector<8x8xf32>
    %603 = arith.subf %599, %602 : vector<8x8xf32>
    %604 = math.exp %603 : vector<8x8xf32>
    %cst_221 = arith.constant dense<0.000000e+00> : vector<8xf32>
    %605 = vector.multi_reduction <add>, %604, %cst_221 [1] : vector<8x8xf32> to vector<8xf32>
    %606 = vector.shape_cast %605 : vector<8xf32> to vector<8x1xf32>
    %607 = tpu.reciprocal %606 : vector<8x1xf32> -> vector<8x1xf32>
    %608 = vector.broadcast %607 : vector<8x1xf32> to vector<8x8xf32>
    %609 = arith.mulf %604, %608 : vector<8x8xf32>
    %610 = vector.extract_strided_slice %461 {offsets = [0, 28], sizes = [8, 4], strides = [1, 1]} : vector<8x32xf32> to vector<8x4xf32>
    %cst_222 = arith.constant dense<0.000000e+00> : vector<8x4xf32>
    %611 = tpu.matmul %609, %610, %cst_222 {dimension_numbers = #tpu.dot_dimension_numbers<[1], [0], [0], [1], [0, 0, 1, 1], [], []>} : vector<8x8xf32>, vector<8x4xf32>, vector<8x4xf32> -> vector<8x4xf32>
    %612 = vector.extract_strided_slice %436 {offsets = [28, 0], sizes = [4, 32], strides = [1, 1]} : vector<32x32xf32> to vector<4x32xf32>
    %cst_223 = arith.constant dense<0.000000e+00> : vector<8x32xf32>
    %613 = tpu.matmul %611, %612, %cst_223 {dimension_numbers = #tpu.dot_dimension_numbers<[1], [0], [0], [1], [0, 0, 1, 1], [], []>} : vector<8x4xf32>, vector<4x32xf32>, vector<8x32xf32> -> vector<8x32xf32>
    %614 = arith.addf %595, %613 : vector<8x32xf32>
    %615 = arith.addf %426, %614 : vector<8x32xf32>
    %c1_224 = arith.constant 1 : index
    %c0_225 = arith.constant 0 : index
    %c0_226 = arith.constant 0 : index
    %616 = vector.load %arg10[%c1_224, %c0_225, %c0_226] : memref<2x1x32xf32, #tpu.memory_space<vmem>>, vector<1x1x32xf32>
    %617 = vector.shape_cast %616 : vector<1x1x32xf32> to vector<1x32xf32>
    %c1_227 = arith.constant 1 : index
    %c0_228 = arith.constant 0 : index
    %c0_229 = arith.constant 0 : index
    %618 = vector.load %arg11[%c1_227, %c0_228, %c0_229] : memref<2x1x32xf32, #tpu.memory_space<vmem>>, vector<1x1x32xf32>
    %619 = vector.shape_cast %618 : vector<1x1x32xf32> to vector<1x32xf32>
    %c1_230 = arith.constant 1 : index
    %c0_231 = arith.constant 0 : index
    %c0_232 = arith.constant 0 : index
    %620 = vector.load %arg12[%c1_230, %c0_231, %c0_232] : memref<2x32x32xf32, #tpu.memory_space<vmem>>, vector<1x32x32xf32>
    %621 = vector.shape_cast %620 : vector<1x32x32xf32> to vector<32x32xf32>
    %c1_233 = arith.constant 1 : index
    %c0_234 = arith.constant 0 : index
    %c0_235 = arith.constant 0 : index
    %622 = vector.load %arg13[%c1_233, %c0_234, %c0_235] : memref<2x32x64xf32, #tpu.memory_space<vmem>>, vector<1x32x64xf32>
    %623 = vector.shape_cast %622 : vector<1x32x64xf32> to vector<32x64xf32>
    %c1_236 = arith.constant 1 : index
    %c0_237 = arith.constant 0 : index
    %c0_238 = arith.constant 0 : index
    %624 = vector.load %arg14[%c1_236, %c0_237, %c0_238] : memref<2x32x32xf32, #tpu.memory_space<vmem>>, vector<1x32x32xf32>
    %625 = vector.shape_cast %624 : vector<1x32x32xf32> to vector<32x32xf32>
    %cst_239 = arith.constant dense<0.000000e+00> : vector<8xf32>
    %626 = vector.multi_reduction <add>, %615, %cst_239 [1] : vector<8x32xf32> to vector<8xf32>
    %627 = vector.shape_cast %626 : vector<8xf32> to vector<8x1xf32>
    %cst_240 = arith.constant 3.200000e+01 : f32
    %628 = vector.broadcast %cst_240 : f32 to vector<8x1xf32>
    %629 = arith.divf %627, %628 : vector<8x1xf32>
    %630 = vector.broadcast %629 : vector<8x1xf32> to vector<8x32xf32>
    %631 = arith.subf %615, %630 : vector<8x32xf32>
    %632 = arith.mulf %631, %631 : vector<8x32xf32>
    %cst_241 = arith.constant dense<0.000000e+00> : vector<8xf32>
    %633 = vector.multi_reduction <add>, %632, %cst_241 [1] : vector<8x32xf32> to vector<8xf32>
    %634 = vector.shape_cast %633 : vector<8xf32> to vector<8x1xf32>
    %cst_242 = arith.constant 3.200000e+01 : f32
    %635 = vector.broadcast %cst_242 : f32 to vector<8x1xf32>
    %636 = arith.divf %634, %635 : vector<8x1xf32>
    %cst_243 = arith.constant 9.99999997E-7 : f32
    %637 = vector.broadcast %cst_243 : f32 to vector<8x1xf32>
    %638 = arith.addf %636, %637 : vector<8x1xf32>
    %639 = math.rsqrt %638 : vector<8x1xf32>
    %640 = vector.broadcast %639 : vector<8x1xf32> to vector<8x32xf32>
    %641 = arith.mulf %631, %640 : vector<8x32xf32>
    %642 = vector.broadcast %617 : vector<1x32xf32> to vector<8x32xf32>
    %643 = arith.mulf %641, %642 : vector<8x32xf32>
    %644 = vector.broadcast %619 : vector<1x32xf32> to vector<8x32xf32>
    %645 = arith.addf %643, %644 : vector<8x32xf32>
    %cst_244 = arith.constant dense<0.000000e+00> : vector<8x32xf32>
    %646 = tpu.matmul %645, %621, %cst_244 {dimension_numbers = #tpu.dot_dimension_numbers<[1], [0], [0], [1], [0, 0, 1, 1], [], []>} : vector<8x32xf32>, vector<32x32xf32>, vector<8x32xf32> -> vector<8x32xf32>
    %cst_245 = arith.constant dense<0.000000e+00> : vector<8x64xf32>
    %647 = tpu.matmul %5, %623, %cst_245 {dimension_numbers = #tpu.dot_dimension_numbers<[1], [0], [0], [1], [0, 0, 1, 1], [], []>} : vector<8x32xf32>, vector<32x64xf32>, vector<8x64xf32> -> vector<8x64xf32>
    %648 = vector.extract_strided_slice %647 {offsets = [0, 0], sizes = [8, 32], strides = [1, 1]} : vector<8x64xf32> to vector<8x32xf32>
    %649 = tpu.transpose %648, [1, 0] : vector<8x32xf32> -> vector<32x8xf32>
    %650 = vector.extract_strided_slice %647 {offsets = [0, 32], sizes = [8, 32], strides = [1, 1]} : vector<8x64xf32> to vector<8x32xf32>
    %cst_246 = arith.constant 0.000000e+00 : f32
    %651 = vector.broadcast %cst_246 : f32 to vector<8x32xf32>
    %652 = vector.extract_strided_slice %646 {offsets = [0, 0], sizes = [8, 4], strides = [1, 1]} : vector<8x32xf32> to vector<8x4xf32>
    %653 = vector.extract_strided_slice %649 {offsets = [0, 0], sizes = [4, 8], strides = [1, 1]} : vector<32x8xf32> to vector<4x8xf32>
    %cst_247 = arith.constant dense<0.000000e+00> : vector<8x8xf32>
    %654 = tpu.matmul %652, %653, %cst_247 {dimension_numbers = #tpu.dot_dimension_numbers<[1], [0], [0], [1], [0, 0, 1, 1], [], []>} : vector<8x4xf32>, vector<4x8xf32>, vector<8x8xf32> -> vector<8x8xf32>
    %655 = arith.addf %654, %7 : vector<8x8xf32>
    %cst_248 = arith.constant dense<0xFF800000> : vector<8xf32>
    %656 = vector.multi_reduction <maximumf>, %655, %cst_248 [1] : vector<8x8xf32> to vector<8xf32>
    %657 = vector.shape_cast %656 : vector<8xf32> to vector<8x1xf32>
    %658 = vector.broadcast %657 : vector<8x1xf32> to vector<8x8xf32>
    %659 = arith.subf %655, %658 : vector<8x8xf32>
    %660 = math.exp %659 : vector<8x8xf32>
    %cst_249 = arith.constant dense<0.000000e+00> : vector<8xf32>
    %661 = vector.multi_reduction <add>, %660, %cst_249 [1] : vector<8x8xf32> to vector<8xf32>
    %662 = vector.shape_cast %661 : vector<8xf32> to vector<8x1xf32>
    %663 = tpu.reciprocal %662 : vector<8x1xf32> -> vector<8x1xf32>
    %664 = vector.broadcast %663 : vector<8x1xf32> to vector<8x8xf32>
    %665 = arith.mulf %660, %664 : vector<8x8xf32>
    %666 = vector.extract_strided_slice %650 {offsets = [0, 0], sizes = [8, 4], strides = [1, 1]} : vector<8x32xf32> to vector<8x4xf32>
    %cst_250 = arith.constant dense<0.000000e+00> : vector<8x4xf32>
    %667 = tpu.matmul %665, %666, %cst_250 {dimension_numbers = #tpu.dot_dimension_numbers<[1], [0], [0], [1], [0, 0, 1, 1], [], []>} : vector<8x8xf32>, vector<8x4xf32>, vector<8x4xf32> -> vector<8x4xf32>
    %668 = vector.extract_strided_slice %625 {offsets = [0, 0], sizes = [4, 32], strides = [1, 1]} : vector<32x32xf32> to vector<4x32xf32>
    %cst_251 = arith.constant dense<0.000000e+00> : vector<8x32xf32>
    %669 = tpu.matmul %667, %668, %cst_251 {dimension_numbers = #tpu.dot_dimension_numbers<[1], [0], [0], [1], [0, 0, 1, 1], [], []>} : vector<8x4xf32>, vector<4x32xf32>, vector<8x32xf32> -> vector<8x32xf32>
    %670 = arith.addf %651, %669 : vector<8x32xf32>
    %671 = vector.extract_strided_slice %646 {offsets = [0, 4], sizes = [8, 4], strides = [1, 1]} : vector<8x32xf32> to vector<8x4xf32>
    %672 = vector.extract_strided_slice %649 {offsets = [4, 0], sizes = [4, 8], strides = [1, 1]} : vector<32x8xf32> to vector<4x8xf32>
    %cst_252 = arith.constant dense<0.000000e+00> : vector<8x8xf32>
    %673 = tpu.matmul %671, %672, %cst_252 {dimension_numbers = #tpu.dot_dimension_numbers<[1], [0], [0], [1], [0, 0, 1, 1], [], []>} : vector<8x4xf32>, vector<4x8xf32>, vector<8x8xf32> -> vector<8x8xf32>
    %674 = arith.addf %673, %7 : vector<8x8xf32>
    %cst_253 = arith.constant dense<0xFF800000> : vector<8xf32>
    %675 = vector.multi_reduction <maximumf>, %674, %cst_253 [1] : vector<8x8xf32> to vector<8xf32>
    %676 = vector.shape_cast %675 : vector<8xf32> to vector<8x1xf32>
    %677 = vector.broadcast %676 : vector<8x1xf32> to vector<8x8xf32>
    %678 = arith.subf %674, %677 : vector<8x8xf32>
    %679 = math.exp %678 : vector<8x8xf32>
    %cst_254 = arith.constant dense<0.000000e+00> : vector<8xf32>
    %680 = vector.multi_reduction <add>, %679, %cst_254 [1] : vector<8x8xf32> to vector<8xf32>
    %681 = vector.shape_cast %680 : vector<8xf32> to vector<8x1xf32>
    %682 = tpu.reciprocal %681 : vector<8x1xf32> -> vector<8x1xf32>
    %683 = vector.broadcast %682 : vector<8x1xf32> to vector<8x8xf32>
    %684 = arith.mulf %679, %683 : vector<8x8xf32>
    %685 = vector.extract_strided_slice %650 {offsets = [0, 4], sizes = [8, 4], strides = [1, 1]} : vector<8x32xf32> to vector<8x4xf32>
    %cst_255 = arith.constant dense<0.000000e+00> : vector<8x4xf32>
    %686 = tpu.matmul %684, %685, %cst_255 {dimension_numbers = #tpu.dot_dimension_numbers<[1], [0], [0], [1], [0, 0, 1, 1], [], []>} : vector<8x8xf32>, vector<8x4xf32>, vector<8x4xf32> -> vector<8x4xf32>
    %687 = vector.extract_strided_slice %625 {offsets = [4, 0], sizes = [4, 32], strides = [1, 1]} : vector<32x32xf32> to vector<4x32xf32>
    %cst_256 = arith.constant dense<0.000000e+00> : vector<8x32xf32>
    %688 = tpu.matmul %686, %687, %cst_256 {dimension_numbers = #tpu.dot_dimension_numbers<[1], [0], [0], [1], [0, 0, 1, 1], [], []>} : vector<8x4xf32>, vector<4x32xf32>, vector<8x32xf32> -> vector<8x32xf32>
    %689 = arith.addf %670, %688 : vector<8x32xf32>
    %690 = vector.extract_strided_slice %646 {offsets = [0, 8], sizes = [8, 4], strides = [1, 1]} : vector<8x32xf32> to vector<8x4xf32>
    %691 = vector.extract_strided_slice %649 {offsets = [8, 0], sizes = [4, 8], strides = [1, 1]} : vector<32x8xf32> to vector<4x8xf32>
    %cst_257 = arith.constant dense<0.000000e+00> : vector<8x8xf32>
    %692 = tpu.matmul %690, %691, %cst_257 {dimension_numbers = #tpu.dot_dimension_numbers<[1], [0], [0], [1], [0, 0, 1, 1], [], []>} : vector<8x4xf32>, vector<4x8xf32>, vector<8x8xf32> -> vector<8x8xf32>
    %693 = arith.addf %692, %7 : vector<8x8xf32>
    %cst_258 = arith.constant dense<0xFF800000> : vector<8xf32>
    %694 = vector.multi_reduction <maximumf>, %693, %cst_258 [1] : vector<8x8xf32> to vector<8xf32>
    %695 = vector.shape_cast %694 : vector<8xf32> to vector<8x1xf32>
    %696 = vector.broadcast %695 : vector<8x1xf32> to vector<8x8xf32>
    %697 = arith.subf %693, %696 : vector<8x8xf32>
    %698 = math.exp %697 : vector<8x8xf32>
    %cst_259 = arith.constant dense<0.000000e+00> : vector<8xf32>
    %699 = vector.multi_reduction <add>, %698, %cst_259 [1] : vector<8x8xf32> to vector<8xf32>
    %700 = vector.shape_cast %699 : vector<8xf32> to vector<8x1xf32>
    %701 = tpu.reciprocal %700 : vector<8x1xf32> -> vector<8x1xf32>
    %702 = vector.broadcast %701 : vector<8x1xf32> to vector<8x8xf32>
    %703 = arith.mulf %698, %702 : vector<8x8xf32>
    %704 = vector.extract_strided_slice %650 {offsets = [0, 8], sizes = [8, 4], strides = [1, 1]} : vector<8x32xf32> to vector<8x4xf32>
    %cst_260 = arith.constant dense<0.000000e+00> : vector<8x4xf32>
    %705 = tpu.matmul %703, %704, %cst_260 {dimension_numbers = #tpu.dot_dimension_numbers<[1], [0], [0], [1], [0, 0, 1, 1], [], []>} : vector<8x8xf32>, vector<8x4xf32>, vector<8x4xf32> -> vector<8x4xf32>
    %706 = vector.extract_strided_slice %625 {offsets = [8, 0], sizes = [4, 32], strides = [1, 1]} : vector<32x32xf32> to vector<4x32xf32>
    %cst_261 = arith.constant dense<0.000000e+00> : vector<8x32xf32>
    %707 = tpu.matmul %705, %706, %cst_261 {dimension_numbers = #tpu.dot_dimension_numbers<[1], [0], [0], [1], [0, 0, 1, 1], [], []>} : vector<8x4xf32>, vector<4x32xf32>, vector<8x32xf32> -> vector<8x32xf32>
    %708 = arith.addf %689, %707 : vector<8x32xf32>
    %709 = vector.extract_strided_slice %646 {offsets = [0, 12], sizes = [8, 4], strides = [1, 1]} : vector<8x32xf32> to vector<8x4xf32>
    %710 = vector.extract_strided_slice %649 {offsets = [12, 0], sizes = [4, 8], strides = [1, 1]} : vector<32x8xf32> to vector<4x8xf32>
    %cst_262 = arith.constant dense<0.000000e+00> : vector<8x8xf32>
    %711 = tpu.matmul %709, %710, %cst_262 {dimension_numbers = #tpu.dot_dimension_numbers<[1], [0], [0], [1], [0, 0, 1, 1], [], []>} : vector<8x4xf32>, vector<4x8xf32>, vector<8x8xf32> -> vector<8x8xf32>
    %712 = arith.addf %711, %7 : vector<8x8xf32>
    %cst_263 = arith.constant dense<0xFF800000> : vector<8xf32>
    %713 = vector.multi_reduction <maximumf>, %712, %cst_263 [1] : vector<8x8xf32> to vector<8xf32>
    %714 = vector.shape_cast %713 : vector<8xf32> to vector<8x1xf32>
    %715 = vector.broadcast %714 : vector<8x1xf32> to vector<8x8xf32>
    %716 = arith.subf %712, %715 : vector<8x8xf32>
    %717 = math.exp %716 : vector<8x8xf32>
    %cst_264 = arith.constant dense<0.000000e+00> : vector<8xf32>
    %718 = vector.multi_reduction <add>, %717, %cst_264 [1] : vector<8x8xf32> to vector<8xf32>
    %719 = vector.shape_cast %718 : vector<8xf32> to vector<8x1xf32>
    %720 = tpu.reciprocal %719 : vector<8x1xf32> -> vector<8x1xf32>
    %721 = vector.broadcast %720 : vector<8x1xf32> to vector<8x8xf32>
    %722 = arith.mulf %717, %721 : vector<8x8xf32>
    %723 = vector.extract_strided_slice %650 {offsets = [0, 12], sizes = [8, 4], strides = [1, 1]} : vector<8x32xf32> to vector<8x4xf32>
    %cst_265 = arith.constant dense<0.000000e+00> : vector<8x4xf32>
    %724 = tpu.matmul %722, %723, %cst_265 {dimension_numbers = #tpu.dot_dimension_numbers<[1], [0], [0], [1], [0, 0, 1, 1], [], []>} : vector<8x8xf32>, vector<8x4xf32>, vector<8x4xf32> -> vector<8x4xf32>
    %725 = vector.extract_strided_slice %625 {offsets = [12, 0], sizes = [4, 32], strides = [1, 1]} : vector<32x32xf32> to vector<4x32xf32>
    %cst_266 = arith.constant dense<0.000000e+00> : vector<8x32xf32>
    %726 = tpu.matmul %724, %725, %cst_266 {dimension_numbers = #tpu.dot_dimension_numbers<[1], [0], [0], [1], [0, 0, 1, 1], [], []>} : vector<8x4xf32>, vector<4x32xf32>, vector<8x32xf32> -> vector<8x32xf32>
    %727 = arith.addf %708, %726 : vector<8x32xf32>
    %728 = vector.extract_strided_slice %646 {offsets = [0, 16], sizes = [8, 4], strides = [1, 1]} : vector<8x32xf32> to vector<8x4xf32>
    %729 = vector.extract_strided_slice %649 {offsets = [16, 0], sizes = [4, 8], strides = [1, 1]} : vector<32x8xf32> to vector<4x8xf32>
    %cst_267 = arith.constant dense<0.000000e+00> : vector<8x8xf32>
    %730 = tpu.matmul %728, %729, %cst_267 {dimension_numbers = #tpu.dot_dimension_numbers<[1], [0], [0], [1], [0, 0, 1, 1], [], []>} : vector<8x4xf32>, vector<4x8xf32>, vector<8x8xf32> -> vector<8x8xf32>
    %731 = arith.addf %730, %7 : vector<8x8xf32>
    %cst_268 = arith.constant dense<0xFF800000> : vector<8xf32>
    %732 = vector.multi_reduction <maximumf>, %731, %cst_268 [1] : vector<8x8xf32> to vector<8xf32>
    %733 = vector.shape_cast %732 : vector<8xf32> to vector<8x1xf32>
    %734 = vector.broadcast %733 : vector<8x1xf32> to vector<8x8xf32>
    %735 = arith.subf %731, %734 : vector<8x8xf32>
    %736 = math.exp %735 : vector<8x8xf32>
    %cst_269 = arith.constant dense<0.000000e+00> : vector<8xf32>
    %737 = vector.multi_reduction <add>, %736, %cst_269 [1] : vector<8x8xf32> to vector<8xf32>
    %738 = vector.shape_cast %737 : vector<8xf32> to vector<8x1xf32>
    %739 = tpu.reciprocal %738 : vector<8x1xf32> -> vector<8x1xf32>
    %740 = vector.broadcast %739 : vector<8x1xf32> to vector<8x8xf32>
    %741 = arith.mulf %736, %740 : vector<8x8xf32>
    %742 = vector.extract_strided_slice %650 {offsets = [0, 16], sizes = [8, 4], strides = [1, 1]} : vector<8x32xf32> to vector<8x4xf32>
    %cst_270 = arith.constant dense<0.000000e+00> : vector<8x4xf32>
    %743 = tpu.matmul %741, %742, %cst_270 {dimension_numbers = #tpu.dot_dimension_numbers<[1], [0], [0], [1], [0, 0, 1, 1], [], []>} : vector<8x8xf32>, vector<8x4xf32>, vector<8x4xf32> -> vector<8x4xf32>
    %744 = vector.extract_strided_slice %625 {offsets = [16, 0], sizes = [4, 32], strides = [1, 1]} : vector<32x32xf32> to vector<4x32xf32>
    %cst_271 = arith.constant dense<0.000000e+00> : vector<8x32xf32>
    %745 = tpu.matmul %743, %744, %cst_271 {dimension_numbers = #tpu.dot_dimension_numbers<[1], [0], [0], [1], [0, 0, 1, 1], [], []>} : vector<8x4xf32>, vector<4x32xf32>, vector<8x32xf32> -> vector<8x32xf32>
    %746 = arith.addf %727, %745 : vector<8x32xf32>
    %747 = vector.extract_strided_slice %646 {offsets = [0, 20], sizes = [8, 4], strides = [1, 1]} : vector<8x32xf32> to vector<8x4xf32>
    %748 = vector.extract_strided_slice %649 {offsets = [20, 0], sizes = [4, 8], strides = [1, 1]} : vector<32x8xf32> to vector<4x8xf32>
    %cst_272 = arith.constant dense<0.000000e+00> : vector<8x8xf32>
    %749 = tpu.matmul %747, %748, %cst_272 {dimension_numbers = #tpu.dot_dimension_numbers<[1], [0], [0], [1], [0, 0, 1, 1], [], []>} : vector<8x4xf32>, vector<4x8xf32>, vector<8x8xf32> -> vector<8x8xf32>
    %750 = arith.addf %749, %7 : vector<8x8xf32>
    %cst_273 = arith.constant dense<0xFF800000> : vector<8xf32>
    %751 = vector.multi_reduction <maximumf>, %750, %cst_273 [1] : vector<8x8xf32> to vector<8xf32>
    %752 = vector.shape_cast %751 : vector<8xf32> to vector<8x1xf32>
    %753 = vector.broadcast %752 : vector<8x1xf32> to vector<8x8xf32>
    %754 = arith.subf %750, %753 : vector<8x8xf32>
    %755 = math.exp %754 : vector<8x8xf32>
    %cst_274 = arith.constant dense<0.000000e+00> : vector<8xf32>
    %756 = vector.multi_reduction <add>, %755, %cst_274 [1] : vector<8x8xf32> to vector<8xf32>
    %757 = vector.shape_cast %756 : vector<8xf32> to vector<8x1xf32>
    %758 = tpu.reciprocal %757 : vector<8x1xf32> -> vector<8x1xf32>
    %759 = vector.broadcast %758 : vector<8x1xf32> to vector<8x8xf32>
    %760 = arith.mulf %755, %759 : vector<8x8xf32>
    %761 = vector.extract_strided_slice %650 {offsets = [0, 20], sizes = [8, 4], strides = [1, 1]} : vector<8x32xf32> to vector<8x4xf32>
    %cst_275 = arith.constant dense<0.000000e+00> : vector<8x4xf32>
    %762 = tpu.matmul %760, %761, %cst_275 {dimension_numbers = #tpu.dot_dimension_numbers<[1], [0], [0], [1], [0, 0, 1, 1], [], []>} : vector<8x8xf32>, vector<8x4xf32>, vector<8x4xf32> -> vector<8x4xf32>
    %763 = vector.extract_strided_slice %625 {offsets = [20, 0], sizes = [4, 32], strides = [1, 1]} : vector<32x32xf32> to vector<4x32xf32>
    %cst_276 = arith.constant dense<0.000000e+00> : vector<8x32xf32>
    %764 = tpu.matmul %762, %763, %cst_276 {dimension_numbers = #tpu.dot_dimension_numbers<[1], [0], [0], [1], [0, 0, 1, 1], [], []>} : vector<8x4xf32>, vector<4x32xf32>, vector<8x32xf32> -> vector<8x32xf32>
    %765 = arith.addf %746, %764 : vector<8x32xf32>
    %766 = vector.extract_strided_slice %646 {offsets = [0, 24], sizes = [8, 4], strides = [1, 1]} : vector<8x32xf32> to vector<8x4xf32>
    %767 = vector.extract_strided_slice %649 {offsets = [24, 0], sizes = [4, 8], strides = [1, 1]} : vector<32x8xf32> to vector<4x8xf32>
    %cst_277 = arith.constant dense<0.000000e+00> : vector<8x8xf32>
    %768 = tpu.matmul %766, %767, %cst_277 {dimension_numbers = #tpu.dot_dimension_numbers<[1], [0], [0], [1], [0, 0, 1, 1], [], []>} : vector<8x4xf32>, vector<4x8xf32>, vector<8x8xf32> -> vector<8x8xf32>
    %769 = arith.addf %768, %7 : vector<8x8xf32>
    %cst_278 = arith.constant dense<0xFF800000> : vector<8xf32>
    %770 = vector.multi_reduction <maximumf>, %769, %cst_278 [1] : vector<8x8xf32> to vector<8xf32>
    %771 = vector.shape_cast %770 : vector<8xf32> to vector<8x1xf32>
    %772 = vector.broadcast %771 : vector<8x1xf32> to vector<8x8xf32>
    %773 = arith.subf %769, %772 : vector<8x8xf32>
    %774 = math.exp %773 : vector<8x8xf32>
    %cst_279 = arith.constant dense<0.000000e+00> : vector<8xf32>
    %775 = vector.multi_reduction <add>, %774, %cst_279 [1] : vector<8x8xf32> to vector<8xf32>
    %776 = vector.shape_cast %775 : vector<8xf32> to vector<8x1xf32>
    %777 = tpu.reciprocal %776 : vector<8x1xf32> -> vector<8x1xf32>
    %778 = vector.broadcast %777 : vector<8x1xf32> to vector<8x8xf32>
    %779 = arith.mulf %774, %778 : vector<8x8xf32>
    %780 = vector.extract_strided_slice %650 {offsets = [0, 24], sizes = [8, 4], strides = [1, 1]} : vector<8x32xf32> to vector<8x4xf32>
    %cst_280 = arith.constant dense<0.000000e+00> : vector<8x4xf32>
    %781 = tpu.matmul %779, %780, %cst_280 {dimension_numbers = #tpu.dot_dimension_numbers<[1], [0], [0], [1], [0, 0, 1, 1], [], []>} : vector<8x8xf32>, vector<8x4xf32>, vector<8x4xf32> -> vector<8x4xf32>
    %782 = vector.extract_strided_slice %625 {offsets = [24, 0], sizes = [4, 32], strides = [1, 1]} : vector<32x32xf32> to vector<4x32xf32>
    %cst_281 = arith.constant dense<0.000000e+00> : vector<8x32xf32>
    %783 = tpu.matmul %781, %782, %cst_281 {dimension_numbers = #tpu.dot_dimension_numbers<[1], [0], [0], [1], [0, 0, 1, 1], [], []>} : vector<8x4xf32>, vector<4x32xf32>, vector<8x32xf32> -> vector<8x32xf32>
    %784 = arith.addf %765, %783 : vector<8x32xf32>
    %785 = vector.extract_strided_slice %646 {offsets = [0, 28], sizes = [8, 4], strides = [1, 1]} : vector<8x32xf32> to vector<8x4xf32>
    %786 = vector.extract_strided_slice %649 {offsets = [28, 0], sizes = [4, 8], strides = [1, 1]} : vector<32x8xf32> to vector<4x8xf32>
    %cst_282 = arith.constant dense<0.000000e+00> : vector<8x8xf32>
    %787 = tpu.matmul %785, %786, %cst_282 {dimension_numbers = #tpu.dot_dimension_numbers<[1], [0], [0], [1], [0, 0, 1, 1], [], []>} : vector<8x4xf32>, vector<4x8xf32>, vector<8x8xf32> -> vector<8x8xf32>
    %788 = arith.addf %787, %7 : vector<8x8xf32>
    %cst_283 = arith.constant dense<0xFF800000> : vector<8xf32>
    %789 = vector.multi_reduction <maximumf>, %788, %cst_283 [1] : vector<8x8xf32> to vector<8xf32>
    %790 = vector.shape_cast %789 : vector<8xf32> to vector<8x1xf32>
    %791 = vector.broadcast %790 : vector<8x1xf32> to vector<8x8xf32>
    %792 = arith.subf %788, %791 : vector<8x8xf32>
    %793 = math.exp %792 : vector<8x8xf32>
    %cst_284 = arith.constant dense<0.000000e+00> : vector<8xf32>
    %794 = vector.multi_reduction <add>, %793, %cst_284 [1] : vector<8x8xf32> to vector<8xf32>
    %795 = vector.shape_cast %794 : vector<8xf32> to vector<8x1xf32>
    %796 = tpu.reciprocal %795 : vector<8x1xf32> -> vector<8x1xf32>
    %797 = vector.broadcast %796 : vector<8x1xf32> to vector<8x8xf32>
    %798 = arith.mulf %793, %797 : vector<8x8xf32>
    %799 = vector.extract_strided_slice %650 {offsets = [0, 28], sizes = [8, 4], strides = [1, 1]} : vector<8x32xf32> to vector<8x4xf32>
    %cst_285 = arith.constant dense<0.000000e+00> : vector<8x4xf32>
    %800 = tpu.matmul %798, %799, %cst_285 {dimension_numbers = #tpu.dot_dimension_numbers<[1], [0], [0], [1], [0, 0, 1, 1], [], []>} : vector<8x8xf32>, vector<8x4xf32>, vector<8x4xf32> -> vector<8x4xf32>
    %801 = vector.extract_strided_slice %625 {offsets = [28, 0], sizes = [4, 32], strides = [1, 1]} : vector<32x32xf32> to vector<4x32xf32>
    %cst_286 = arith.constant dense<0.000000e+00> : vector<8x32xf32>
    %802 = tpu.matmul %800, %801, %cst_286 {dimension_numbers = #tpu.dot_dimension_numbers<[1], [0], [0], [1], [0, 0, 1, 1], [], []>} : vector<8x4xf32>, vector<4x32xf32>, vector<8x32xf32> -> vector<8x32xf32>
    %803 = arith.addf %784, %802 : vector<8x32xf32>
    %804 = arith.addf %615, %803 : vector<8x32xf32>
    %c1_287 = arith.constant 1 : index
    %c0_288 = arith.constant 0 : index
    %c0_289 = arith.constant 0 : index
    %805 = vector.load %arg15[%c1_287, %c0_288, %c0_289] : memref<2x1x32xf32, #tpu.memory_space<vmem>>, vector<1x1x32xf32>
    %806 = vector.shape_cast %805 : vector<1x1x32xf32> to vector<1x32xf32>
    %c1_290 = arith.constant 1 : index
    %c0_291 = arith.constant 0 : index
    %c0_292 = arith.constant 0 : index
    %807 = vector.load %arg16[%c1_290, %c0_291, %c0_292] : memref<2x1x32xf32, #tpu.memory_space<vmem>>, vector<1x1x32xf32>
    %808 = vector.shape_cast %807 : vector<1x1x32xf32> to vector<1x32xf32>
    %c1_293 = arith.constant 1 : index
    %c0_294 = arith.constant 0 : index
    %c0_295 = arith.constant 0 : index
    %809 = vector.load %arg17[%c1_293, %c0_294, %c0_295] : memref<2x32x64xf32, #tpu.memory_space<vmem>>, vector<1x32x64xf32>
    %810 = vector.shape_cast %809 : vector<1x32x64xf32> to vector<32x64xf32>
    %c1_296 = arith.constant 1 : index
    %c0_297 = arith.constant 0 : index
    %c0_298 = arith.constant 0 : index
    %811 = vector.load %arg18[%c1_296, %c0_297, %c0_298] : memref<2x1x64xf32, #tpu.memory_space<vmem>>, vector<1x1x64xf32>
    %812 = vector.shape_cast %811 : vector<1x1x64xf32> to vector<1x64xf32>
    %c1_299 = arith.constant 1 : index
    %c0_300 = arith.constant 0 : index
    %c0_301 = arith.constant 0 : index
    %813 = vector.load %arg19[%c1_299, %c0_300, %c0_301] : memref<2x64x32xf32, #tpu.memory_space<vmem>>, vector<1x64x32xf32>
    %814 = vector.shape_cast %813 : vector<1x64x32xf32> to vector<64x32xf32>
    %c1_302 = arith.constant 1 : index
    %c0_303 = arith.constant 0 : index
    %c0_304 = arith.constant 0 : index
    %815 = vector.load %arg20[%c1_302, %c0_303, %c0_304] : memref<2x1x32xf32, #tpu.memory_space<vmem>>, vector<1x1x32xf32>
    %816 = vector.shape_cast %815 : vector<1x1x32xf32> to vector<1x32xf32>
    %cst_305 = arith.constant dense<0.000000e+00> : vector<8xf32>
    %817 = vector.multi_reduction <add>, %804, %cst_305 [1] : vector<8x32xf32> to vector<8xf32>
    %818 = vector.shape_cast %817 : vector<8xf32> to vector<8x1xf32>
    %cst_306 = arith.constant 3.200000e+01 : f32
    %819 = vector.broadcast %cst_306 : f32 to vector<8x1xf32>
    %820 = arith.divf %818, %819 : vector<8x1xf32>
    %821 = vector.broadcast %820 : vector<8x1xf32> to vector<8x32xf32>
    %822 = arith.subf %804, %821 : vector<8x32xf32>
    %823 = arith.mulf %822, %822 : vector<8x32xf32>
    %cst_307 = arith.constant dense<0.000000e+00> : vector<8xf32>
    %824 = vector.multi_reduction <add>, %823, %cst_307 [1] : vector<8x32xf32> to vector<8xf32>
    %825 = vector.shape_cast %824 : vector<8xf32> to vector<8x1xf32>
    %cst_308 = arith.constant 3.200000e+01 : f32
    %826 = vector.broadcast %cst_308 : f32 to vector<8x1xf32>
    %827 = arith.divf %825, %826 : vector<8x1xf32>
    %cst_309 = arith.constant 9.99999997E-7 : f32
    %828 = vector.broadcast %cst_309 : f32 to vector<8x1xf32>
    %829 = arith.addf %827, %828 : vector<8x1xf32>
    %830 = math.rsqrt %829 : vector<8x1xf32>
    %831 = vector.broadcast %830 : vector<8x1xf32> to vector<8x32xf32>
    %832 = arith.mulf %822, %831 : vector<8x32xf32>
    %833 = vector.broadcast %806 : vector<1x32xf32> to vector<8x32xf32>
    %834 = arith.mulf %832, %833 : vector<8x32xf32>
    %835 = vector.broadcast %808 : vector<1x32xf32> to vector<8x32xf32>
    %836 = arith.addf %834, %835 : vector<8x32xf32>
    %cst_310 = arith.constant dense<0.000000e+00> : vector<8x64xf32>
    %837 = tpu.matmul %836, %810, %cst_310 {dimension_numbers = #tpu.dot_dimension_numbers<[1], [0], [0], [1], [0, 0, 1, 1], [], []>} : vector<8x32xf32>, vector<32x64xf32>, vector<8x64xf32> -> vector<8x64xf32>
    %838 = vector.broadcast %812 : vector<1x64xf32> to vector<8x64xf32>
    %839 = arith.addf %837, %838 : vector<8x64xf32>
    %cst_311 = arith.constant 0.000000e+00 : f32
    %840 = vector.broadcast %cst_311 : f32 to vector<8x64xf32>
    %841 = arith.maximumf %839, %840 : vector<8x64xf32>
    %cst_312 = arith.constant dense<0.000000e+00> : vector<8x32xf32>
    %842 = tpu.matmul %841, %814, %cst_312 {dimension_numbers = #tpu.dot_dimension_numbers<[1], [0], [0], [1], [0, 0, 1, 1], [], []>} : vector<8x64xf32>, vector<64x32xf32>, vector<8x32xf32> -> vector<8x32xf32>
    %843 = arith.addf %804, %842 : vector<8x32xf32>
    %844 = vector.broadcast %816 : vector<1x32xf32> to vector<8x32xf32>
    %845 = arith.addf %843, %844 : vector<8x32xf32>
    %c0_313 = arith.constant 0 : index
    %c0_314 = arith.constant 0 : index
    %846 = vector.load %arg21[%c0_313, %c0_314] : memref<1x32xf32, #tpu.memory_space<vmem>>, vector<1x32xf32>
    %c0_315 = arith.constant 0 : index
    %c0_316 = arith.constant 0 : index
    %847 = vector.load %arg22[%c0_315, %c0_316] : memref<1x32xf32, #tpu.memory_space<vmem>>, vector<1x32xf32>
    %cst_317 = arith.constant dense<0.000000e+00> : vector<8xf32>
    %848 = vector.multi_reduction <add>, %845, %cst_317 [1] : vector<8x32xf32> to vector<8xf32>
    %849 = vector.shape_cast %848 : vector<8xf32> to vector<8x1xf32>
    %cst_318 = arith.constant 3.200000e+01 : f32
    %850 = vector.broadcast %cst_318 : f32 to vector<8x1xf32>
    %851 = arith.divf %849, %850 : vector<8x1xf32>
    %852 = vector.broadcast %851 : vector<8x1xf32> to vector<8x32xf32>
    %853 = arith.subf %845, %852 : vector<8x32xf32>
    %854 = arith.mulf %853, %853 : vector<8x32xf32>
    %cst_319 = arith.constant dense<0.000000e+00> : vector<8xf32>
    %855 = vector.multi_reduction <add>, %854, %cst_319 [1] : vector<8x32xf32> to vector<8xf32>
    %856 = vector.shape_cast %855 : vector<8xf32> to vector<8x1xf32>
    %cst_320 = arith.constant 3.200000e+01 : f32
    %857 = vector.broadcast %cst_320 : f32 to vector<8x1xf32>
    %858 = arith.divf %856, %857 : vector<8x1xf32>
    %cst_321 = arith.constant 9.99999997E-7 : f32
    %859 = vector.broadcast %cst_321 : f32 to vector<8x1xf32>
    %860 = arith.addf %858, %859 : vector<8x1xf32>
    %861 = math.rsqrt %860 : vector<8x1xf32>
    %862 = vector.broadcast %861 : vector<8x1xf32> to vector<8x32xf32>
    %863 = arith.mulf %853, %862 : vector<8x32xf32>
    %864 = vector.broadcast %846 : vector<1x32xf32> to vector<8x32xf32>
    %865 = arith.mulf %863, %864 : vector<8x32xf32>
    %866 = vector.broadcast %847 : vector<1x32xf32> to vector<8x32xf32>
    %867 = arith.addf %865, %866 : vector<8x32xf32>
    %c0_322 = arith.constant 0 : index
    %c0_323 = arith.constant 0 : index
    %c0_324 = arith.constant 0 : index
    %868 = vector.load %arg23[%c0_322, %c0_323, %c0_324] : memref<1x8x32xf32, #tpu.memory_space<vmem>>, vector<1x8x32xf32>
    %869 = vector.shape_cast %868 : vector<1x8x32xf32> to vector<8x32xf32>
    %870 = vector.shape_cast %867 : vector<8x32xf32> to vector<1x8x32xf32>
    tpu.vector_store %arg23[%c0_322, %c0_323, %c0_324], %870 {strides = array<i32>} : memref<1x8x32xf32, #tpu.memory_space<vmem>>, vector<1x8x32xf32>,
    return
  }
  func.func @transform_0(%arg0: i32) -> (i32, i32, i32) {
    %c0_i32 = arith.constant 0 : i32
    %c0_i32_0 = arith.constant 0 : i32
    %c0_i32_1 = arith.constant 0 : i32
    return %arg0, %c0_i32, %c0_i32_0 : i32, i32, i32
  }
  func.func @transform_1(%arg0: i32) -> (i32, i32, i32) {
    %c0_i32 = arith.constant 0 : i32
    %c0_i32_0 = arith.constant 0 : i32
    %c0_i32_1 = arith.constant 0 : i32
    return %arg0, %c0_i32, %c0_i32_0 : i32, i32, i32
  }
  func.func @transform_2(%arg0: i32) -> (i32, i32, i32) {
    %c0_i32 = arith.constant 0 : i32
    %c0_i32_0 = arith.constant 0 : i32
    %c0_i32_1 = arith.constant 0 : i32
    return %arg0, %c0_i32, %c0_i32_0 : i32, i32, i32
  }
  func.func @transform_3(%arg0: i32) -> (i32, i32, i32) {
    %c0_i32 = arith.constant 0 : i32
    %c0_i32_0 = arith.constant 0 : i32
    %c0_i32_1 = arith.constant 0 : i32
    return %arg0, %c0_i32, %c0_i32_0 : i32, i32, i32
  }
  func.func @transform_4(%arg0: i32) -> (i32, i32, i32) {
    %c0_i32 = arith.constant 0 : i32
    %c0_i32_0 = arith.constant 0 : i32
    %c0_i32_1 = arith.constant 0 : i32
    %c0_i32_2 = arith.constant 0 : i32
    return %c0_i32, %c0_i32_0, %c0_i32_1 : i32, i32, i32
  }
  func.func @transform_5(%arg0: i32) -> (i32, i32, i32) {
    %c0_i32 = arith.constant 0 : i32
    %c0_i32_0 = arith.constant 0 : i32
    %c0_i32_1 = arith.constant 0 : i32
    %c0_i32_2 = arith.constant 0 : i32
    return %c0_i32, %c0_i32_0, %c0_i32_1 : i32, i32, i32
  }
  func.func @transform_6(%arg0: i32) -> (i32, i32, i32) {
    %c0_i32 = arith.constant 0 : i32
    %c0_i32_0 = arith.constant 0 : i32
    %c0_i32_1 = arith.constant 0 : i32
    %c0_i32_2 = arith.constant 0 : i32
    return %c0_i32, %c0_i32_0, %c0_i32_1 : i32, i32, i32
  }
  func.func @transform_7(%arg0: i32) -> (i32, i32, i32) {
    %c0_i32 = arith.constant 0 : i32
    %c0_i32_0 = arith.constant 0 : i32
    %c0_i32_1 = arith.constant 0 : i32
    %c0_i32_2 = arith.constant 0 : i32
    return %c0_i32, %c0_i32_0, %c0_i32_1 : i32, i32, i32
  }
  func.func @transform_8(%arg0: i32) -> (i32, i32, i32) {
    %c0_i32 = arith.constant 0 : i32
    %c0_i32_0 = arith.constant 0 : i32
    %c0_i32_1 = arith.constant 0 : i32
    %c0_i32_2 = arith.constant 0 : i32
    return %c0_i32, %c0_i32_0, %c0_i32_1 : i32, i32, i32
  }
  func.func @transform_9(%arg0: i32) -> (i32, i32, i32) {
    %c0_i32 = arith.constant 0 : i32
    %c0_i32_0 = arith.constant 0 : i32
    %c0_i32_1 = arith.constant 0 : i32
    %c0_i32_2 = arith.constant 0 : i32
    return %c0_i32, %c0_i32_0, %c0_i32_1 : i32, i32, i32
  }
  func.func @transform_10(%arg0: i32) -> (i32, i32, i32) {
    %c0_i32 = arith.constant 0 : i32
    %c0_i32_0 = arith.constant 0 : i32
    %c0_i32_1 = arith.constant 0 : i32
    %c0_i32_2 = arith.constant 0 : i32
    return %c0_i32, %c0_i32_0, %c0_i32_1 : i32, i32, i32
  }
  func.func @transform_11(%arg0: i32) -> (i32, i32, i32) {
    %c0_i32 = arith.constant 0 : i32
    %c0_i32_0 = arith.constant 0 : i32
    %c0_i32_1 = arith.constant 0 : i32
    %c0_i32_2 = arith.constant 0 : i32
    return %c0_i32, %c0_i32_0, %c0_i32_1 : i32, i32, i32
  }
  func.func @transform_12(%arg0: i32) -> (i32, i32, i32) {
    %c0_i32 = arith.constant 0 : i32
    %c0_i32_0 = arith.constant 0 : i32
    %c0_i32_1 = arith.constant 0 : i32
    %c0_i32_2 = arith.constant 0 : i32
    return %c0_i32, %c0_i32_0, %c0_i32_1 : i32, i32, i32
  }
  func.func @transform_13(%arg0: i32) -> (i32, i32, i32) {
    %c0_i32 = arith.constant 0 : i32
    %c0_i32_0 = arith.constant 0 : i32
    %c0_i32_1 = arith.constant 0 : i32
    %c0_i32_2 = arith.constant 0 : i32
    return %c0_i32, %c0_i32_0, %c0_i32_1 : i32, i32, i32
  }
  func.func @transform_14(%arg0: i32) -> (i32, i32, i32) {
    %c0_i32 = arith.constant 0 : i32
    %c0_i32_0 = arith.constant 0 : i32
    %c0_i32_1 = arith.constant 0 : i32
    %c0_i32_2 = arith.constant 0 : i32
    return %c0_i32, %c0_i32_0, %c0_i32_1 : i32, i32, i32
  }
  func.func @transform_15(%arg0: i32) -> (i32, i32, i32) {
    %c0_i32 = arith.constant 0 : i32
    %c0_i32_0 = arith.constant 0 : i32
    %c0_i32_1 = arith.constant 0 : i32
    %c0_i32_2 = arith.constant 0 : i32
    return %c0_i32, %c0_i32_0, %c0_i32_1 : i32, i32, i32
  }
  func.func @transform_16(%arg0: i32) -> (i32, i32, i32) {
    %c0_i32 = arith.constant 0 : i32
    %c0_i32_0 = arith.constant 0 : i32
    %c0_i32_1 = arith.constant 0 : i32
    %c0_i32_2 = arith.constant 0 : i32
    return %c0_i32, %c0_i32_0, %c0_i32_1 : i32, i32, i32
  }
  func.func @transform_17(%arg0: i32) -> (i32, i32, i32) {
    %c0_i32 = arith.constant 0 : i32
    %c0_i32_0 = arith.constant 0 : i32
    %c0_i32_1 = arith.constant 0 : i32
    %c0_i32_2 = arith.constant 0 : i32
    return %c0_i32, %c0_i32_0, %c0_i32_1 : i32, i32, i32
  }
  func.func @transform_18(%arg0: i32) -> (i32, i32, i32) {
    %c0_i32 = arith.constant 0 : i32
    %c0_i32_0 = arith.constant 0 : i32
    %c0_i32_1 = arith.constant 0 : i32
    %c0_i32_2 = arith.constant 0 : i32
    return %c0_i32, %c0_i32_0, %c0_i32_1 : i32, i32, i32
  }
  func.func @transform_19(%arg0: i32) -> (i32, i32, i32) {
    %c0_i32 = arith.constant 0 : i32
    %c0_i32_0 = arith.constant 0 : i32
    %c0_i32_1 = arith.constant 0 : i32
    %c0_i32_2 = arith.constant 0 : i32
    return %c0_i32, %c0_i32_0, %c0_i32_1 : i32, i32, i32
  }
  func.func @transform_20(%arg0: i32) -> (i32, i32) {
    %c0_i32 = arith.constant 0 : i32
    %c0_i32_0 = arith.constant 0 : i32
    %c0_i32_1 = arith.constant 0 : i32
    return %c0_i32, %c0_i32_0 : i32, i32
  }
  func.func @transform_21(%arg0: i32) -> (i32, i32) {
    %c0_i32 = arith.constant 0 : i32
    %c0_i32_0 = arith.constant 0 : i32
    %c0_i32_1 = arith.constant 0 : i32
    return %c0_i32, %c0_i32_0 : i32, i32
  }
  func.func @transform_22(%arg0: i32) -> (i32, i32, i32) {
    %c0_i32 = arith.constant 0 : i32
    %c0_i32_0 = arith.constant 0 : i32
    %c0_i32_1 = arith.constant 0 : i32
    return %arg0, %c0_i32, %c0_i32_0 : i32, i32, i32
  }
}

</mosaic_0001>

<bundles_post_ra>
// kernel: tpu_custom_call.1
= control target key start
LH: loop header
LB: loop body
LE: loop exit
PB: predicated region body
PF: predicated region fallthrough
CT: control target
= control target key end

     0   :  { %s7127_s0 = inlined_call_operand.hbm [shape: f32[2,8,32], index: 0, kind: input, shape index: {}]   ;;  %s7128_s1 = inlined_call_operand.hbm [shape: f32[2,8,32], index: 1, kind: input, shape index: {}]   ;;  %s7129_s2 = inlined_call_operand.hbm [shape: f32[2,8,8], index: 2, kind: input, shape index: {}]   ;;  %s7130_s3 = inlined_call_operand.hbm [shape: f32[2,8,8], index: 3, kind: input, shape index: {}]   ;;  %s7131_s4 = inlined_call_operand.vmem [shape: f32[2,1,32], index: 4, kind: input, shape index: {}]   ;;  %s7132_s5 = inlined_call_operand.hbm [shape: f32[2,1,32], index: 5, kind: input, shape index: {}]   ;;  %s7133_s6 = inlined_call_operand.vmem [shape: f32[2,32,32], index: 6, kind: input, shape index: {}]   ;;  %s7134_s7 = inlined_call_operand.vmem [shape: f32[2,32,64], index: 7, kind: input, shape index: {}]   ;;  %s7135_s8 = inlined_call_operand.vmem [shape: f32[2,32,32], index: 8, kind: input, shape index: {}]   ;;  %s7136_s9 = inlined_call_operand.vmem [shape: f32[2,1,32], index: 9, kind: input, shape index: {}]   ;;  %s7137_s10 = inlined_call_operand.vmem [shape: f32[2,1,32], index: 10, kind: input, shape index: {}]   ;;  %s7138_s11 = inlined_call_operand.hbm [shape: f32[2,32,32], index: 11, kind: input, shape index: {}]   ;;  %s7139_s12 = inlined_call_operand.hbm [shape: f32[2,32,64], index: 12, kind: input, shape index: {}]   ;;  %s7140_s13 = inlined_call_operand.hbm [shape: f32[2,32,32], index: 13, kind: input, shape index: {}]   ;;  %s7141_s14 = inlined_call_operand.vmem [shape: f32[2,1,32], index: 14, kind: input, shape index: {}]   ;;  %s7142_s15 = inlined_call_operand.vmem [shape: f32[2,1,32], index: 15, kind: input, shape index: {}]   ;;  %s7143_s16 = inlined_call_operand.hbm [shape: f32[2,32,64], index: 16, kind: input, shape index: {}]   ;;  %s7144_s17 = inlined_call_operand.vmem [shape: f32[2,1,64], index: 17, kind: input, shape index: {}]   ;;  %s7145_s18 = inlined_call_operand.vmem [shape: f32[2,64,32], index: 18, kind: input, shape index: {}]   ;;  %s7146_s19 = inlined_call_operand.vmem [shape: f32[2,1,32], index: 19, kind: input, shape index: {}]   ;;  %s7147_s20 = inlined_call_operand.vmem [shape: f32[1,32], index: 20, kind: input, shape index: {}]   ;;  %s7148_s21 = inlined_call_operand.vmem [shape: f32[1,32], index: 21, kind: input, shape index: {}]   ;;  %s7149_s22 = inlined_call_operand.hbm [shape: f32[2,8,32], index: 22, kind: output, shape index: {}]  }
   0x1   :  { %7214 = sst [smem:[#allocation31_spill]] %s7127_s0 }
   0x2   :  { %7215 = sst [smem:[#allocation32_spill]] %s7128_s1 }
   0x3   :  { %7216 = sst [smem:[#allocation33_spill]] %s7129_s2 }
   0x4   :  { %7217 = sst [smem:[#allocation34_spill]] %s7130_s3 }
   0x5   :  { %7218 = sst [smem:[#allocation35_spill]] %s7131_s4 }
   0x6   :  { %7219 = sst [smem:[#allocation36_spill]] %s7132_s5 }
   0x7   :  { %7220 = sst [smem:[#allocation37_spill]] %s7133_s6 }
   0x8   :  { %7221 = sst [smem:[#allocation38_spill]] %s7134_s7 }
   0x9   :  { %7222 = sst [smem:[#allocation39_spill]] %s7135_s8 }
   0xa   :  { %7223 = sst [smem:[#allocation40_spill]] %s7138_s11 }
   0xb   :  { %7224 = sst [smem:[#allocation41_spill]] %s7139_s12 }
   0xc   :  { %7225 = sst [smem:[#allocation42_spill]] %s7140_s13 }
   0xd   :  { %7226 = sst [smem:[#allocation43_spill]] %s7141_s14 }
   0xe   :  { %7227 = sst [smem:[#allocation44_spill]] %s7142_s15 }
   0xf   :  { %7228 = sst [smem:[#allocation45_spill]] %s7143_s16 }
  0x10   :  { %7229 = sst [smem:[#allocation46_spill]] %s7144_s17 }
  0x11   :  { %7230 = sst [smem:[#allocation47_spill]] %s7146_s19 }
  0x12   :  { %7231 = sst [smem:[#allocation48_spill]] %s7147_s20 }
  0x13   :  { %7232 = sst [smem:[#allocation49_spill]] %s7148_s21 }
  0x14   :  { %7233 = sst [smem:[#allocation50_spill]] %s7149_s22 }
  0x15   :  { %27 = vsyncpa [#allocation3], 0 }
  0x16   :  { %29 = vsyncpa [#allocation3 + $0x1], 0 }
  0x17   :  { %30 = vsyncpa [#allocation6], 0 }
  0x18   :  { %32 = vsyncpa [#allocation6 + $0x1], 0 }
  0x19   :  { %33 = vsyncpa [#allocation9], 0 }
  0x1a   :  { %35 = vsyncpa [#allocation9 + $0x1], 0 }
  0x1b   :  { %36 = vsyncpa [#allocation12], 0 }
  0x1c   :  { %37 = vsyncpa [#allocation15], 0 }
  0x1d   :  { %38 = vsyncpa [#allocation4], 0 }
  0x1e   :  { %40 = vsyncpa [#allocation4 + $0x1], 0  ;;  %s6087_s3 = smov 0   ;;  %s6089_s28 = smov 0  }
  0x1f   :  { %s6091_s29 = smov 0   ;;  %s6093_s30 = smov 0  }
  0x20 LB: > { %7234 = sst [smem:[#allocation25_spill]] %s5933_s3  ;;  %s6111_s5 = sadd.s32 4294967295, %s5945_s30   ;;  %s5945_s30 = sphi %s6093_s30, %s7299_s30   ;;  %s5941_s29 = sphi %s6091_s29, %s7304_s29   ;;  %s5937_s28 = sphi %s6089_s28, %s7303_s28   ;;  %s5933_s3 = sphi %s6087_s3, %s7302_s3  }
  0x21   : > { %7235 = sst [smem:[#allocation26_spill]] %s5941_s29  ;;  %p5063_p0 = scmp.ge.s32.totalorder %s5945_s30, 1 }
  0x22   : > { %s7236_s23 = sld [smem:[#allocation36_spill]]  ;;  %p7170_p1 = scmp.eq.s32.totalorder %s6111_s5, 0 }
  0x23   : > { %p559_p2 = scmp.lt.s32.totalorder %s5945_s30, 3  ;;  %s5947_s6 = smov [#allocation10]  }
  0x24   : > { %s575_s25 = sshll.u32 %s5947_s6, 4  ;;  %s7238_s11 = sld [smem:[#allocation40_spill]]  ;;  %s576_s25 = int_to_ptr.vmem [resolvable:$true] %s575_s25 }
  0x25   : > { %p6116_p3 = pnand %p5063_p0, %p559_p2  ;;  %s5948_s0 = smov [#allocation11]  }
  0x26   : > { %s5949_s6 = smov 16   ;;  %s5950_s21 = smov 1  }
  0x27   : > { %p5322_p4 = pneg %p6116_p3  ;;  %s7157_s26 = smov 128  }
  0x28   : > { %s573_s1 = sshll.u32 %s7236_s23, 4  ;;  %s604_s23 = sshll.u32 %s5948_s0, 4  ;;  %s574_s1 = int_to_ptr.hbm [resolvable:$true] %s573_s1  ;;  %s605_s23 = int_to_ptr.vmem [resolvable:$true] %s604_s23 }
  0x29   : > { %p6128_p6 = pnand %p5322_p4, %p7170_p1  ;;  %s7159_s2 = smov 8  }
  0x2a   : > { %s602_s27 = sshll.u32 %s7238_s11, 4  ;;  %s7240_s13 = sld [smem:[#allocation42_spill]]  ;;  %s603_s27 = int_to_ptr.hbm [resolvable:$true] %s602_s27 }
  0x2b   : > { %5325 = dma.hbm_to_vmem [thread:$0]  (!%p6128_p6), %s574_s1, 32, %s576_s25, [#allocation9], %s5949_s6, %s5949_s6, %s5950_s21  }
  0x2c   : > { %5328 = dma.hbm_to_vmem [thread:$0]  (!%p6128_p6), %s603_s27, 1024, %s605_s23, [#allocation12], %s7157_s26, %s7157_s26, %s7159_s2  }
  0x2d   : > { %s5953_s21 = smov [#allocation14]   ;;  %s5062_s25 = sadd.s32 4294967294, %s5945_s30  }
  0x2e   : > { %s632_s1 = sshll.u32 %s5953_s21, 4  ;;  %s6149_s6 = sadd.s32 1, %s5945_s30   ;;  %s633_s1 = int_to_ptr.vmem [resolvable:$true] %s632_s1 }
  0x2f   : > { %7241 = sst [smem:[#allocation27_spill]] %s6149_s6  ;;  %s53_s11 = sadd.s32 1, %s5941_s29 }
  0x30   : > { %s630_s22 = sshll.u32 %s7240_s13, 4  ;;  %s50_s27 = ssub.s32 %s5945_s30, %s6149_s6  ;;  %s631_s22 = int_to_ptr.hbm [resolvable:$true] %s630_s22 }
  0x31   : > { %5334 = dma.hbm_to_vmem [thread:$0]  (!%p6128_p6), %s631_s22, 1024, %s633_s1, [#allocation15], %s7157_s26, %s7157_s26, %s7159_s2  }
  0x32   : > { %p60_p7 = scmp.ne.s32.totalorder %s5941_s29, %s5937_s28  ;;  %p51_p8 = scmp.eq.s32.totalorder %s50_s27, 0 }
  0x33   : > { %p61_p9 = scmp.eq.s32.totalorder %s5945_s30, 0  ;;  %p66_p10 = scmp.ne.s32.totalorder %s5937_s28, %s5933_s3 }
  0x34   : > { %p546_p11 = scmp.eq.s32.totalorder %s6111_s5, 1  ;;  %p552_p2 = scmp.eq.s32.totalorder %s5062_s25, 1 }
  0x35   : > { %s6161_s23 = scalar_select %p51_p8, %s5941_s29, %s53_s11  }
  0x36   : > { %p62_p12 = por %p61_p9, %p60_p7  ;;  %p6165_p13 = por %p7170_p1, %p66_p10 }
  0x37   : > { %7242 = sst [smem:[#allocation28_spill]] %s6161_s23  ;;  %p6169_p0 = por %p546_p11, %p60_p7 }
  0x38   : > { %p5360_p4 = scmp.lt.s32.totalorder %s5945_s30, 2  ;;  %s7167_s21 = sand.u32 1, %s5941_s29  }
  0x39   : > { %s7244_s0 = scalar_select %p6169_p0, 1, 0 }
  0x3a   : > { %p6175_p5 = por %p552_p2, %p66_p10  ;;  %s6181_s11 = sshll.u32 %s7167_s21, 3 }
  0x3b   : > { %7245 = sst [smem:[#allocation29_spill]] %s7244_s0  ;;  %s6184_s27 = sshll.u32 %s5945_s30, 3 }
  0x3c   : > { %s7246_s1 = scalar_select %p6175_p5, 1, 0 }
  0x3d   : > { %p6186_p8 = pnand %p5360_p4, %p62_p12  ;;  %s7171_s25 = sand.u32 1, %s5945_s30  }
  0x3e   : > { %7247 = sst [smem:[#allocation30_spill]] %s7246_s1  ;;  %s704_s3 = scalar_lea.vmem [#allocation5], %s6181_s11 }
  0x3f   : > { %s7249_s23 = sld [smem:[#allocation32_spill]]  ;;  %s712_s1 = sshll.u32 %s704_s3, 4  ;;  %s713_s1 = int_to_ptr.vmem [resolvable:$true] %s712_s1 }
  0x40   : > { %s6198_s21 = scalar_lea.sflag [#allocation6], %s7171_s25  ;;  %p5683_p9 = pneg %p6186_p8 }
  0x45   : > { %s708_s6 = scalar_lea.hbm %s7249_s23, %s6184_s27  ;;  %s5686_s3 = scalar_lea.hbm %s7249_s23, 16 }
  0x46   : > { %s710_s0 = sshll.u32 %s708_s6, 4  ;;  %s711_s0 = int_to_ptr.hbm [resolvable:$true] %s710_s0 }
  0x47   : > { %s5679_s20 = sshra.s32 %s711_s0, 4  ;;  %s5680_s20 = int_to_ptr.hbm [resolvable:$true] %s5679_s20 }
  0x48   : > { %s5681_s19 = scalar_lea.hbm %s5680_s20, 8  ;;  %p5687_p12 = scmp.lt.s32.totalorder %s5680_s20, %s7249_s23 }
  0x49   : > { %p5682_p7 = scmp.ne.s32.totalorder %s5680_s20, %s5681_s19  ;;  %p5688_p2 = scmp.lt.s32.totalorder %s5686_s3, %s5681_s19 }
  0x4b   : > { %p5684_p10 = pnand %p5683_p9, %p5682_p7  ;;  %p5689_p4 = por %p5688_p2, %p5687_p12 }
  0x4d   : > { %p5685_p11 = pneg %p5684_p10 }
  0x4f   : > { %p5690_p1 = pnand %p5689_p4, %p5685_p11 }
  0x51   : > { %5693 = shalt.err (!%p5690_p1)
}
  0x52   : > { %5344 = dma.hbm_to_vmem [thread:$0]  (!%p6186_p8), %s711_s0, 128, %s713_s1, %s6198_s21  }
  0x53   : > { %s7250_s12 = sld [smem:[#allocation41_spill]]  ;;  %s5954_s2 = smov [#allocation13]  }
  0x54   : > { %s618_s17 = sshll.u32 %s5954_s2, 4  ;;  %s7251_s16 = sld [smem:[#allocation45_spill]]  ;;  %s619_s17 = int_to_ptr.vmem [resolvable:$true] %s618_s17 }
  0x55   : > { %s7252_s6 = smov 8   ;;  %s7253_s23 = smov 128  }
  0x56   : > { %s5955_s0 = smov [#allocation16]   ;;  %s7254_s2 = sld [smem:[#allocation31_spill]] }
  0x57   : > { %s652_s1 = sshll.u32 %s5955_s0, 4  ;;  %s685_s20 = scalar_lea.vmem [#allocation2], %s6181_s11  ;;  %s653_s1 = int_to_ptr.vmem [resolvable:$true] %s652_s1 }
  0x59   : > { %s616_s13 = sshll.u32 %s7250_s12, 4  ;;  %s693_s12 = sshll.u32 %s685_s20, 4  ;;  %s617_s13 = int_to_ptr.hbm [resolvable:$true] %s616_s13  ;;  %s694_s12 = int_to_ptr.vmem [resolvable:$true] %s693_s12 }
  0x5a   : > { %s650_s3 = sshll.u32 %s7251_s16, 4  ;;  %s651_s3 = int_to_ptr.hbm [resolvable:$true] %s650_s3 }
  0x5b   : > { %5331 = dma.hbm_to_vmem [thread:$0]  (!%p6128_p6), %s617_s13, 1024, %s619_s17, [#allocation12], %s7253_s23, %s7253_s23, %s7252_s6  }
  0x5c   : > { %5337 = dma.hbm_to_vmem [thread:$0]  (!%p6128_p6), %s651_s3, 1024, %s653_s1, [#allocation15], %s7253_s23, %s7253_s23, %s7252_s6  }
  0x5d   : > { %s689_s19 = scalar_lea.hbm %s7254_s2, %s6184_s27  ;;  %s7255_s13 = sand.u32 1, %s5941_s29  }
  0x5e   : > { %s691_s16 = sshll.u32 %s689_s19, 4  ;;  %s682_s17 = scalar_lea.sflag [#allocation3], %s7255_s13  ;;  %s692_s16 = int_to_ptr.hbm [resolvable:$true] %s691_s16 }
  0x5f   : > { %s5769_s14 = sshra.s32 %s692_s16, 4  ;;  %s5776_s3 = scalar_lea.hbm %s7254_s2, 16  ;;  %s5770_s14 = int_to_ptr.hbm [resolvable:$true] %s5769_s14 }
  0x60   : > { %s5771_s0 = scalar_lea.hbm %s5770_s14, 8  ;;  %p5777_p6 = scmp.lt.s32.totalorder %s5770_s14, %s7254_s2 }
  0x61   : > { %p5772_p1 = scmp.ne.s32.totalorder %s5770_s14, %s5771_s0  ;;  %p5778_p11 = scmp.lt.s32.totalorder %s5776_s3, %s5771_s0 }
  0x63   : > { %p5774_p7 = pnand %p5772_p1, %p5683_p9  ;;  %p5779_p12 = por %p5778_p11, %p5777_p6 }
  0x65   : > { %p5775_p10 = pneg %p5774_p7 }
  0x67   : > { %p5780_p2 = pnand %p5779_p12, %p5775_p10 }
  0x69   : > { %5783 = shalt.err (!%p5780_p2)
}
  0x6a   : > { %5341 = dma.hbm_to_vmem [thread:$0]  (!%p6186_p8), %s692_s16, 128, %s694_s12, %s682_s17  }
  0x6b   : > { %s7256_s19 = sld [smem:[#allocation33_spill]]  ;;  %s723_s13 = scalar_lea.vmem [#allocation7], %s6181_s11 }
  0x6c   : > { %s731_s4 = sshll.u32 %s723_s13, 4  ;;  %s732_s4 = int_to_ptr.vmem [resolvable:$true] %s731_s4 }
  0x71   : > { %s727_s20 = scalar_lea.hbm %s7256_s19, %s6184_s27  ;;  %s5806_s12 = scalar_lea.hbm %s7256_s19, 16 }
  0x72   : > { %s729_s23 = sshll.u32 %s727_s20, 4  ;;  %s730_s23 = int_to_ptr.hbm [resolvable:$true] %s729_s23 }
  0x73   : > { %s5799_s14 = sshra.s32 %s730_s23, 4  ;;  %s5800_s14 = int_to_ptr.hbm [resolvable:$true] %s5799_s14 }
  0x74   : > { %s5801_s0 = scalar_lea.hbm %s5800_s14, 8  ;;  %p5807_p10 = scmp.lt.s32.totalorder %s5800_s14, %s7256_s19 }
  0x75   : > { %p5802_p4 = scmp.ne.s32.totalorder %s5800_s14, %s5801_s0  ;;  %p5808_p6 = scmp.lt.s32.totalorder %s5806_s12, %s5801_s0 }
  0x77   : > { %p5804_p1 = pnand %p5802_p4, %p5683_p9  ;;  %p5809_p11 = por %p5808_p6, %p5807_p10 }
  0x79   : > { %p5805_p7 = pneg %p5804_p1 }
  0x7b   : > { %p5810_p12 = pnand %p5809_p11, %p5805_p7 }
  0x7d   : > { %5813 = shalt.err (!%p5810_p12)
}
  0x7e   : > { %5347 = dma.hbm_to_vmem [thread:$0]  (!%p6186_p8), %s730_s23, 128, %s732_s4, %s6198_s21  }
  0x7f   : > { %s7257_s25 = sld [smem:[#allocation34_spill]]  ;;  %s742_s13 = scalar_lea.vmem [#allocation8], %s6181_s11 }
  0x80   : > { %s750_s3 = sshll.u32 %s742_s13, 4  ;;  %s7258_s14 = sand.u32 1, %s5945_s30   ;;  %s751_s3 = int_to_ptr.vmem [resolvable:$true] %s750_s3 }
  0x81   : > { %s739_s0 = scalar_lea.sflag [#allocation9], %s7258_s14 }
  0x85   : > { %s746_s20 = scalar_lea.hbm %s7257_s25, %s6184_s27  ;;  %s5836_s23 = scalar_lea.hbm %s7257_s25, 16 }
  0x86   : > { %s748_s6 = sshll.u32 %s746_s20, 4  ;;  %s749_s6 = int_to_ptr.hbm [resolvable:$true] %s748_s6 }
  0x87   : > { %s5829_s12 = sshra.s32 %s749_s6, 4  ;;  %s5830_s12 = int_to_ptr.hbm [resolvable:$true] %s5829_s12 }
  0x88   : > { %s5831_s16 = scalar_lea.hbm %s5830_s12, 8  ;;  %p5837_p7 = scmp.lt.s32.totalorder %s5830_s12, %s7257_s25 }
  0x89   : > { %p5832_p2 = scmp.ne.s32.totalorder %s5830_s12, %s5831_s16  ;;  %p5838_p10 = scmp.lt.s32.totalorder %s5836_s23, %s5831_s16 }
  0x8b   : > { %p5834_p4 = pnand %p5832_p2, %p5683_p9  ;;  %p5839_p6 = por %p5838_p10, %p5837_p7 }
  0x8d   : > { %p5835_p1 = pneg %p5834_p4 }
  0x8f   : > { %p5840_p11 = pnand %p5839_p6, %p5835_p1 }
  0x91   : > { %5843 = shalt.err (!%p5840_p11)
}
  0x92   : > { %5350 = dma.hbm_to_vmem [thread:$0]  (!%p6186_p8), %s749_s6, 128, %s751_s3, %s739_s0  }
  0x93   : > { %759 = sbr.rel (%p6116_p3) target bundleno = 12166 (0x2f86), region = 108  ;;  %s6286_s17 = sand.u32 (!%p6116_p3), 1, %s5937_s28  }
  0x94   : > { %s6289_s1 = sshll.u32 (!%p6116_p3), %s6286_s17, 3  ;;  %s762_s15 = scalar_lea.sflag (!%p6116_p3), [#allocation3], %s6286_s17 }
  0x95   : > { %s765_s20 = scalar_lea.vmem (!%p6116_p3), [#allocation2], %s6289_s1 }
  0x98   : > { %5904 = dma.done.wait (%p6165_p13), %s762_s15, 128  }
  0x99   : > { %5906 = vsyncadd (%p6165_p13), %s762_s15, 4294967168  ;;  %s771_s24 = sand.u32 1, %s6111_s5   ;;  %s7184_s13 = scalar_lea.vmem [#allocation5], %s6289_s1 }
  0x9a   : > { %s772_s26 = scalar_lea.sflag [#allocation6], %s771_s24 }
  0x9b   : > { %5908 = dma.done.wait (%p6165_p13), %s772_s26, 256  }
  0x9c   : > { %5910 = vsyncadd (%p6165_p13), %s772_s26, 4294967040  ;;  %s7175_s3 = scalar_lea.vmem [#allocation7], %s6289_s1  ;;  %s792_s6 = scalar_lea.sflag [#allocation9], %s771_s24 }
  0x9d   : > { %s7187_s14 = scalar_lea.vmem [#allocation8], %s6289_s1 }
  0x9e   : > { %5912 = dma.done.wait (%p6165_p13), %s792_s6, 128  }
  0x9f   : > { %5914 = vsyncadd (%p6165_p13), %s792_s6, 4294967168  ;;  %p7259_p3 = scmp.eq.s32.totalorder %s6111_s5, 0 }
  0xa1   : > { %5916 = dma.done.wait (%p7259_p3), [#allocation9], 32   ;;  %p7260_p8 = pmov %p7259_p3 }
  0xa2   : > { %p7261_p9 = pmov %p7259_p3 }
  0xa3   : > { %5918 = vsyncadd (%p7260_p8), [#allocation9], 4294967264 }
  0xa4   : > { %5920 = dma.done.wait (%p7261_p9), [#allocation12], 2048   ;;  %p7262_p12 = pmov %p7259_p3 }
  0xa5   : > { %p7263_p2 = pmov %p7259_p3 }
  0xa6   : > { %5922 = vsyncadd (%p7262_p12), [#allocation12], 4294965248 }
  0xa7   : > { %5924 = dma.done.wait (%p7263_p2), [#allocation15], 2048   ;;  %p7264_p4 = pmov %p7263_p2 }
  0xa8   : > { %vm915_vm0 = vcmask 261120   ;;  %v6321_v0 = vld [vmem:[%s765_s20] sm:$0xff]  ;;  %v5956_v2 = vmov 32.0   ;;  %s7265_s12 = sld [smem:[#allocation37_spill]]  ;;  %vm996_vm5 = vcmask 31744   ;;  %s7200_s27 = smov 96  }
  0xa9   : > { %5926 = vsyncadd (%p7264_p4), [#allocation15], 4294965248  ;;  %v916_v1 = vsel %vm915_vm0, %v6321_v0, 0.0  ;;  %5442 = vrcp.f32 %v5956_v2  ;;  %s7266_s7 = sld [smem:[#allocation38_spill]]  ;;  %v5425_v34 = vld [vmem:[#allocation10] ss:$0 sm:$0xff] }
  0xaa   : > { %917 = vadd.xlane.f32.xlu0 %v916_v1  ;;  %s7267_s23 = sld [smem:[#allocation35_spill]]  ;;  %s7206_s11 = smov 124   ;;  %vm1157_vm6 = vcmask 1043456   ;;  %v6390_v45 = vld [vmem:[%s7175_s3] sm:$0xff]  ;;  %vm1023_vm7 = vcmask 64512  }
  0xab   : > { %s7204_s15 = smov 116   ;;  %s7202_s20 = smov 120  }
  0xac   : > { %s7268_s8 = sld [smem:[#allocation39_spill]]  ;;  %s7178_s6 = smov 92  }
  0xad   : > { %s7196_s22 = smov 108   ;;  %s7176_s0 = smov 112  }
  0xae   : > { %v906_v14 = vld [vmem:[%s7265_s12 + $0x18] sm:$0xff]  ;;  %v905_v16 = vld [vmem:[%s7265_s12 + $0x10] sm:$0xff]  ;;  %v904_v18 = vld [vmem:[%s7265_s12 + $0x8] sm:$0xff]  ;;  %s7198_s4 = smov 88   ;;  %s7194_s24 = smov 84  }
  0xaf   : > { %v5443_v3 = vpop.eup %5442  ;;  %v910_v15 = vld [vmem:[%s7266_s7 + $0x18] sm:$0xff]  ;;  %968 = vmatpush.msra.mxu0 %v906_v14  ;;  %v909_v17 = vld [vmem:[%s7266_s7 + $0x10] sm:$0xff]  ;;  %v908_v19 = vld [vmem:[%s7266_s7 + $0x8] sm:$0xff]  ;;  %s7192_s26 = smov 80   ;;  %s7190_s16 = smov 76  }
  0xb0   : > { %v920_v4 = vmul.f32 32.0, %v5443_v3  ;;  %vm924_vm1 = vweird.f32 %v5443_v3  ;;  %988 = vmatpush.msra.mxu1 %v910_v15  ;;  %v903_v20 = vld [vmem:[%s7265_s12] sm:$0xff]  ;;  %s7188_s21 = smov 100   ;;  %s7185_s3 = smov 104  }
  0xb1   : > { %969 = vmatpush.msra.mxu0 %v905_v16  ;;  %v907_v21 = vld [vmem:[%s7266_s7] sm:$0xff]  ;;  %s7276_s2 = sld [smem:[#allocation46_spill]]  ;;  %s7278_s25 = smov 124  }
  0xb2   : > { %v921_v5 = vsub.f32 1.0, %v920_v4  ;;  %989 = vmatpush.msra.mxu1 %v909_v17  ;;  %v5424_v31 = vld [vmem:[%s7267_s23] ss:$0 sm:$0xff]  ;;  %s7284_s29 = smov 108   ;;  %s7287_s19 = smov 76  }
  0xb3   : > { %970 = vmatpush.msra.mxu0 %v904_v18  ;;  %v911_v39 = vld [vmem:[%s7268_s8] sm:$0xff] }
  0xb4   : > { %v922_v6 = vmul.f32 %v5443_v3, %v921_v5  ;;  %990 = vmatpush.msra.mxu1 %v908_v19  ;;  %v1153_v40 = vrot.slane %v911_v39, 4 }
  0xb5   : > { %971 = vmatpush.msra.mxu0 %v903_v20 }
  0xb6   : > { %v923_v7 = vadd.f32 %v5443_v3, %v922_v6  ;;  %991 = vmatpush.msra.mxu1 %v907_v21 }
  0xb7   : > { %5097 = vmatpush.msk.msrb.mxu0 %vm1157_vm6, %v1153_v40 }
  0xb8   : > { %v6325_v8 = vsel %vm924_vm1, %v5443_v3, %v923_v7  ;;  %5099 = vmatpush.msk.msrb.mxu1 %vm1157_vm6, %v911_v39 }
 0x11d   : > { %v918_v9 = vpop.xlane.xlu0 %917 }
 0x11e   : > { %v926_v10 = vmul.f32 %v6325_v8, %v918_v9 }
 0x120   : > { %v927_v11 = vsub.f32 %v6321_v0, %v926_v10 }
 0x122   : > { %v928_v12 = vmul.f32 %v927_v11, %v927_v11 }
 0x124   : > { %v929_v13 = vsel %vm915_vm0, %v928_v12, 0.0 }
 0x125   : > { %930 = vadd.xlane.f32.xlu0 %v929_v13 }
 0x198   : > { %v931_v22 = vpop.xlane.xlu0 %930 }
 0x199   : > { %v932_v23 = vmul.f32 %v931_v22, %v6325_v8 }
 0x19b   : > { %v933_v24 = vadd.f32 1e-06, %v932_v23 }
 0x19d   : > { %5444 = vrsqrt.f32 %v933_v24  ;;  %vm940_vm3 = vweird.f32 %v933_v24 }
 0x1a3   : > { %v5445_v25 = vpop.eup %5444 }
 0x1a4   : > { %v935_v26 = vmul.f32 %v5445_v25, %v933_v24  ;;  %vm941_vm2 = vweird.f32 %v5445_v25 }
 0x1a5   : > { %vm942_vm4 = vmor %vm940_vm3, %vm941_vm2 }
 0x1a6   : > { %v936_v27 = vmul.f32 %v5445_v25, %v935_v26 }
 0x1a8   : > { %v937_v28 = vmul.f32 0.5, %v936_v27 }
 0x1aa   : > { %v938_v29 = vsub.f32 1.5, %v937_v28 }
 0x1ac   : > { %v939_v30 = vmul.f32 %v5445_v25, %v938_v29 }
 0x1ae   : > { %v943_v32 = vsel %vm942_vm4, %v5445_v25, %v939_v30 }
 0x1af   : > { %v944_v33 = vmul.f32 %v943_v32, %v927_v11  ;;  %v912_v32 = vld [vmem:[%s7268_s8 + $0x8] sm:$0xff] }
 0x1b1   : > { %v948_v35 = vmul.f32 %v5424_v31, %v944_v33 }
 0x1b3   : > { %v952_v36 = vadd.f32 %v5425_v34, %v948_v35 }
 0x1b5   : > { %5089 = vmatmul.msk.f32.vlgmr.msra.gmra.mxu0 %vm915_vm0, %v952_v36  ;;  %5090 = vmatmul.msk.f32.vlgmr.msra.gmra.mxu1 %vm915_vm0, %v952_v36 }
 0x1b6   : > { %5104 = vmatpush.msk.msra.mxu0 %vm1157_vm6, %v912_v32 }
 0x232   : > { %v6360_v37 = vpop.f32.mrf.mxu0  ;;  %v6362_v38 = vpop.f32.mrf.mxu1 }
 0x233   : > { %1048 = vrot.lane.b32.xlu2 %v6362_v38, %s7200_s27  ;;  %5091 = vmatpush.xpose.msk.msra.mxu2 %vm996_vm5, %v6362_v38 }
 0x234   : > { %1074 = vrot.lane.b32.xlu0 %v6360_v37, %s7206_s11 }
 0x236   : > { %5092 = vmatmul.msk.f32.vlgmr.msra.gmra.mxu2 %vm996_vm5, %v6360_v37 }
 0x23b   : > { %1076 = vrot.lane.b32.xlu2 %v6362_v38, %s7206_s11 }
 0x243   : > { %1312 = vrot.lane.b32.xlu2 %v6362_v38, %s7204_s15 }
 0x24b   : > { %1205 = vrot.lane.b32.xlu2 %v6360_v37, %s7202_s20 }
 0x253   : > { %1310 = vrot.lane.b32.xlu2 %v6360_v37, %s7204_s15 }
 0x28d   : > { %v1049_v41 = vpop.permute.xlu2 %1048 }
 0x28e   : > { %1069 = vmatpush.msrb.mxu2 %v1049_v41 }
 0x295   : > { %v1077_v42 = vpop.permute.xlu2 %1076 }
 0x296   : > { %5094 = vmatpush.xpose.msk.msra.mxu3 %vm996_vm5, %v1077_v42 }
 0x29d   : > { %v1313_v43 = vpop.permute.xlu2 %1312 }
 0x29e   : > { %5106 = vmatpush.xpose.msk.msra.mxu1 %vm996_vm5, %v1313_v43 }
 0x2a5   : > { %v1206_v13 = vpop.permute.xlu2 %1205 }
 0x2a6   : > { %v1075_v44 = vpop.permute.xlu0 %1074 }
 0x2a7   : > { %5095 = vmatmul.msk.f32.vlgmr.msra.gmra.mxu3 %vm996_vm5, %v1075_v44 }
 0x2ad   : > { %v1311_v28 = vpop.permute.xlu2 %1310 }
 0x2b9   : > { %v1020_v46 = vpop.f32.mrf.mxu2 }
 0x2ba   : > { %v1021_v47 = vadd.f32 %v1020_v46, %v6390_v45 }
 0x2bc   : > { %v1024_v48 = vsel %vm1023_vm7, %v1021_v47, -inf }
 0x2bd   : > { %1025 = vmax.xlane.f32.xlu1 %v1024_v48 }
 0x32a   : > { %v1099_v49 = vpop.f32.mrf.mxu3 }
 0x32b   : > { %v1100_v50 = vadd.f32 %v1099_v49, %v6390_v45 }
 0x32d   : > { %v1102_v51 = vsel %vm1023_vm7, %v1100_v50, -inf }
 0x32e   : > { %1103 = vmax.xlane.f32.xlu0 %v1102_v51 }
 0x330   : > { %v1026_v52 = vpop.xlane.xlu1 %1025 }
 0x331   : > { %v1027_v53 = vsub.f32 %v1021_v47, %v1026_v52 }
 0x333   : > { %v1028_v54 = vmul.f32 1.442695, %v1027_v53 }
 0x335   : > { %5446 = vpow2.f32 %v1028_v54 }
 0x33b   : > { %v5447_v55 = vpop.eup %5446 }
 0x33c   : > { %v1030_v56 = vsel %vm1023_vm7, %v5447_v55, 0.0 }
 0x33d   : > { %1031 = vadd.xlane.f32.xlu1 %v1030_v56 }
 0x356   : > { %1207 = vrot.lane.b32.xlu1 %v6362_v38, %s7202_s20 }
 0x3a1   : > { %v1104_v57 = vpop.xlane.xlu0 %1103 }
 0x3a2   : > { %v1105_v58 = vsub.f32 %v1100_v50, %v1104_v57 }
 0x3a4   : > { %v1106_v59 = vmul.f32 1.442695, %v1105_v58 }
 0x3a6   : > { %5448 = vpow2.f32 %v1106_v59 }
 0x3ac   : > { %v5449_v60 = vpop.eup %5448 }
 0x3ad   : > { %v1108_v61 = vsel %vm1023_vm7, %v5449_v60, 0.0 }
 0x3ae   : > { %1109 = vadd.xlane.f32.xlu0 %v1108_v61 }
 0x3b0   : > { %v1032_v62 = vpop.xlane.xlu1 %1031 }
 0x3b1   : > { %5450 = vrcp.f32 %v1032_v62  ;;  %v1044_v3 = vand.u32 2147483648, %v1032_v62  ;;  %v1042_v5 = vand.u32 2147483647, %v1032_v62  ;;  %vm1038_vm9 = vweird.f32 %v1032_v62 }
 0x3b3   : > { %v1045_v7 = vor.u32 1.1754944e-38, %v1044_v3  ;;  %vm1043_vm11 = vcmp.eq.f32.partialorder %v1042_v5, 8.507059e+37 }
 0x3b7   : > { %v5451_v63 = vpop.eup %5450 }
 0x3b8   : > { %v1034_v1 = vmul.f32 %v5451_v63, %v1032_v62  ;;  %vm1039_vm8 = vweird.f32 %v5451_v63 }
 0x3b9   : > { %vm1040_vm10 = vmor %vm1038_vm9, %vm1039_vm8 }
 0x3ba   : > { %v1035_v2 = vsub.f32 1.0, %v1034_v1  ;;  %v1388_v1 = vrot.slane %v912_v32, 4 }
 0x3bc   : > { %v1036_v4 = vmul.f32 %v5451_v63, %v1035_v2 }
 0x3be   : > { %v1037_v6 = vadd.f32 %v5451_v63, %v1036_v4 }
 0x3c0   : > { %v1041_v9 = vsel %vm1040_vm10, %v5451_v63, %v1037_v6 }
 0x3c1   : > { %v1046_v10 = vsel %vm1043_vm11, %v1045_v7, %v1041_v9 }
 0x3c2   : > { %1126 = vrot.lane.b32.xlu0 %v6362_v38, %s7178_s6  ;;  %v1047_v11 = vmul.f32 %v5447_v55, %v1046_v10  ;;  %s7180_s6 = smov 68  }
 0x3c4   : > { %5093 = vmatmul.msk.f32.vlgmr.msrb.gmra.mxu2 %vm1023_vm7, %v1047_v11 }
 0x3c8   : > { %v1208_v12 = vpop.permute.xlu1 %1207 }
 0x3c9   : > { %5101 = vmatpush.xpose.msk.msrb.mxu3 %vm996_vm5, %v1208_v12 }
 0x3ca   : > { %1522 = vrot.lane.b32.xlu0 %v6362_v38, %s7196_s22 }
 0x3cc   : > { %5102 = vmatmul.msk.f32.vlgmr.msrb.gmra.mxu3 %vm996_vm5, %v1206_v13 }
 0x3d2   : > { %1417 = vrot.lane.b32.xlu0 %v6362_v38, %s7176_s0 }
 0x421   : > { %v1110_v14 = vpop.xlane.xlu0 %1109 }
 0x422   : > { %5452 = vrcp.f32 %v1110_v14  ;;  %v1122_v18 = vand.u32 2147483648, %v1110_v14  ;;  %v1120_v20 = vand.u32 2147483647, %v1110_v14  ;;  %vm1116_vm13 = vweird.f32 %v1110_v14 }
 0x424   : > { %v1123_v22 = vor.u32 1.1754944e-38, %v1122_v18  ;;  %vm1121_vm15 = vcmp.eq.f32.partialorder %v1120_v20, 8.507059e+37 }
 0x428   : > { %v5453_v15 = vpop.eup %5452 }
 0x429   : > { %v1112_v16 = vmul.f32 %v5453_v15, %v1110_v14  ;;  %vm1117_vm12 = vweird.f32 %v5453_v15 }
 0x42a   : > { %vm1118_vm14 = vmor %vm1116_vm13, %vm1117_vm12 }
 0x42b   : > { %v1113_v17 = vsub.f32 1.0, %v1112_v16 }
 0x42d   : > { %v1114_v19 = vmul.f32 %v5453_v15, %v1113_v17 }
 0x42f   : > { %v1115_v21 = vadd.f32 %v5453_v15, %v1114_v19 }
 0x431   : > { %v1119_v23 = vsel %vm1118_vm14, %v5453_v15, %v1115_v21 }
 0x432   : > { %v1124_v24 = vsel %vm1121_vm15, %v1123_v22, %v1119_v23 }
 0x433   : > { %v1125_v25 = vmul.f32 %v5449_v60, %v1124_v24 }
 0x434   : > { %v1127_v26 = vpop.permute.xlu0 %1126 }
 0x435   : > { %1147 = vmatpush.msra.mxu2 %v1127_v26 }
 0x436   : > { %5096 = vmatmul.msk.f32.vlgmr.msra.gmra.mxu2 %vm1023_vm7, %v1125_v25 }
 0x43c   : > { %v1523_v33 = vpop.permute.xlu0 %1522 }
 0x444   : > { %v1418_v35 = vpop.permute.xlu0 %1417 }
 0x447   : > { %v1071_v27 = vpop.f32.mrf.mxu2 }
 0x448   : > { %5100 = vmatmul.msk.f32.vlgmr.msrb.gmra.mxu1 %vm996_vm5, %v1071_v27 }
 0x44f   : > { %v1230_v29 = vpop.f32.mrf.mxu3 }
 0x450   : > { %v1231_v30 = vadd.f32 %v1230_v29, %v6390_v45  ;;  %5107 = vmatmul.msk.f32.vlgmr.msra.gmra.mxu1 %vm996_vm5, %v1311_v28 }
 0x452   : > { %v1233_v31 = vsel %vm1023_vm7, %v1231_v30, -inf }
 0x453   : > { %1234 = vmax.xlane.f32.xlu1 %v1233_v31 }
 0x4b9   : > { %v1149_v34 = vpop.f32.mrf.mxu2 }
 0x4ba   : > { %5098 = vmatmul.msk.f32.vlgmr.msrb.gmra.mxu0 %vm996_vm5, %v1149_v34 }
 0x4bb   : > { %5111 = vmatpush.xpose.msk.msrb.mxu0 %vm996_vm5, %v1418_v35 }
 0x4c5   : > { %v6420_v36 = vpop.f32.mrf.mxu1 }
 0x4c6   : > { %v1235_v39 = vpop.xlane.xlu1 %1234 }
 0x4c7   : > { %v1236_v40 = vsub.f32 %v1231_v30, %v1235_v39  ;;  %v913_v39 = vld [vmem:[%s7268_s8 + $0x10] sm:$0xff] }
 0x4c9   : > { %v1237_v41 = vmul.f32 1.442695, %v1236_v40 }
 0x4cb   : > { %5454 = vpow2.f32 %v1237_v41 }
 0x4cd   : > { %v1335_v42 = vpop.f32.mrf.mxu1 }
 0x4ce   : > { %v1336_v43 = vadd.f32 %v1335_v42, %v6390_v45 }
 0x4d0   : > { %v1338_v44 = vsel %vm1023_vm7, %v1336_v43, -inf }
 0x4d1   : > { %v5455_v46 = vpop.eup %5454  ;;  %1339 = vmax.xlane.f32.xlu2 %v1338_v44 }
 0x4d2   : > { %v1239_v47 = vsel %vm1023_vm7, %v5455_v46, 0.0 }
 0x4d3   : > { %1240 = vadd.xlane.f32.xlu1 %v1239_v47 }
 0x4ec   : > { %1257 = vrot.lane.b32.xlu1 %v6362_v38, %s7198_s4 }
 0x4f4   : > { %1415 = vrot.lane.b32.xlu1 %v6360_v37, %s7176_s0  ;;  %s7182_s0 = smov 72  }
 0x537   : > { %v6440_v20 = vpop.f32.mrf.mxu0 }
 0x544   : > { %v1340_v48 = vpop.xlane.xlu2 %1339 }
 0x545   : > { %v1341_v49 = vsub.f32 %v1336_v43, %v1340_v48 }
 0x546   : > { %v1241_v50 = vpop.xlane.xlu1 %1240 }
 0x547   : > { %v1342_v51 = vmul.f32 1.442695, %v1341_v49  ;;  %5456 = vrcp.f32 %v1241_v50  ;;  %v1253_v59 = vand.u32 2147483648, %v1241_v50  ;;  %vm1247_vm2 = vweird.f32 %v1241_v50 }
 0x548   : > { %v1251_v60 = vand.u32 2147483647, %v1241_v50 }
 0x549   : > { %5458 = vpow2.f32 %v1342_v51  ;;  %v1254_v62 = vor.u32 1.1754944e-38, %v1253_v59 }
 0x54a   : > { %vm1252_vm4 = vcmp.eq.f32.partialorder %v1251_v60, 8.507059e+37 }
 0x54d   : > { %v5457_v52 = vpop.eup %5456 }
 0x54e   : > { %v1243_v53 = vmul.f32 %v5457_v52, %v1241_v50  ;;  %vm1248_vm1 = vweird.f32 %v5457_v52 }
 0x54f   : > { %v5459_v54 = vpop.eup %5458  ;;  %vm1249_vm3 = vmor %vm1247_vm2, %vm1248_vm1 }
 0x550   : > { %v1244_v55 = vsub.f32 1.0, %v1243_v53  ;;  %v1344_v56 = vsel %vm1023_vm7, %v5459_v54, 0.0 }
 0x551   : > { %1345 = vadd.xlane.f32.xlu2 %v1344_v56 }
 0x552   : > { %v1245_v57 = vmul.f32 %v5457_v52, %v1244_v55 }
 0x554   : > { %v1246_v58 = vadd.f32 %v5457_v52, %v1245_v57 }
 0x556   : > { %v1250_v61 = vsel %vm1249_vm3, %v5457_v52, %v1246_v58 }
 0x557   : > { %v1255_v63 = vsel %vm1252_vm4, %v1254_v62, %v1250_v61 }
 0x558   : > { %v1256_v3 = vmul.f32 %v5455_v46, %v1255_v63 }
 0x55e   : > { %v1258_v2 = vpop.permute.xlu1 %1257 }
 0x55f   : > { %1278 = vmatpush.msrb.mxu2 %v1258_v2 }
 0x560   : > { %5103 = vmatmul.msk.f32.vlgmr.msrb.gmra.mxu2 %vm1023_vm7, %v1256_v3 }
 0x561   : > { %5109 = vmatpush.msk.msra.mxu2 %vm1157_vm6, %v1388_v1 }
 0x563   : > { %5116 = vmatpush.xpose.msk.msrb.mxu2 %vm996_vm5, %v1523_v33 }
 0x566   : > { %v1416_v19 = vpop.permute.xlu1 %1415 }
 0x569   : > { %1362 = vrot.lane.b32.xlu2 %v6362_v38, %s7194_s24 }
 0x571   : > { %1520 = vrot.lane.b32.xlu2 %v6360_v37, %s7196_s22 }
 0x5c4   : > { %v1346_v4 = vpop.xlane.xlu2 %1345 }
 0x5c5   : > { %5460 = vrcp.f32 %v1346_v4  ;;  %v1358_v10 = vand.u32 2147483648, %v1346_v4  ;;  %v1356_v12 = vand.u32 2147483647, %v1346_v4  ;;  %vm1352_vm9 = vweird.f32 %v1346_v4 }
 0x5c7   : > { %v1359_v14 = vor.u32 1.1754944e-38, %v1358_v10  ;;  %vm1357_vm11 = vcmp.eq.f32.partialorder %v1356_v12, 8.507059e+37 }
 0x5cb   : > { %v5461_v5 = vpop.eup %5460 }
 0x5cc   : > { %v1348_v6 = vmul.f32 %v5461_v5, %v1346_v4  ;;  %v1363_v7 = vpop.permute.xlu2 %1362  ;;  %vm1353_vm8 = vweird.f32 %v5461_v5 }
 0x5cd   : > { %1383 = vmatpush.msra.mxu3 %v1363_v7  ;;  %vm1354_vm10 = vmor %vm1352_vm9, %vm1353_vm8 }
 0x5ce   : > { %v1349_v9 = vsub.f32 1.0, %v1348_v6 }
 0x5cf   : > { %5114 = vmatpush.msk.msrb.mxu3 %vm1157_vm6, %v913_v39 }
 0x5d0   : > { %v1350_v11 = vmul.f32 %v5461_v5, %v1349_v9 }
 0x5d2   : > { %v1351_v13 = vadd.f32 %v5461_v5, %v1350_v11 }
 0x5d4   : > { %v1355_v15 = vsel %vm1354_vm10, %v5461_v5, %v1351_v13  ;;  %v1521_v23 = vpop.permute.xlu2 %1520 }
 0x5d5   : > { %v1360_v16 = vsel %vm1357_vm11, %v1359_v14, %v1355_v15  ;;  %v1203_v15 = vadd.f32 %v6420_v36, %v6440_v20 }
 0x5d6   : > { %v1361_v17 = vmul.f32 %v5459_v54, %v1360_v16  ;;  %v1598_v54 = vrot.slane %v913_v39, 4 }
 0x5d8   : > { %5108 = vmatmul.msk.f32.vlgmr.msra.gmra.mxu3 %vm1023_vm7, %v1361_v17 }
 0x5e3   : > { %v1280_v18 = vpop.f32.mrf.mxu2 }
 0x5e4   : > { %5105 = vmatmul.msk.f32.vlgmr.msra.gmra.mxu0 %vm996_vm5, %v1280_v18 }
 0x5ec   : > { %5112 = vmatmul.msk.f32.vlgmr.msrb.gmra.mxu0 %vm996_vm5, %v1416_v19 }
 0x65b   : > { %v1385_v21 = vpop.f32.mrf.mxu3 }
 0x65c   : > { %5110 = vmatmul.msk.f32.vlgmr.msra.gmra.mxu2 %vm996_vm5, %v1385_v21 }
 0x661   : > { %v6443_v22 = vpop.f32.mrf.mxu0 }
 0x662   : > { %v1309_v16 = vadd.f32 %v6443_v22, %v1203_v15 }
 0x664   : > { %5117 = vmatmul.msk.f32.vlgmr.msrb.gmra.mxu2 %vm996_vm5, %v1521_v23 }
 0x669   : > { %v1440_v24 = vpop.f32.mrf.mxu0 }
 0x66a   : > { %v1441_v25 = vadd.f32 %v1440_v24, %v6390_v45 }
 0x66c   : > { %v1443_v26 = vsel %vm1023_vm7, %v1441_v25, -inf }
 0x66d   : > { %1444 = vmax.xlane.f32.xlu2 %v1443_v26 }
 0x6df   : > { %v6448_v27 = vpop.f32.mrf.mxu2 }
 0x6e0   : > { %v1445_v28 = vpop.xlane.xlu2 %1444  ;;  %v1414_v17 = vadd.f32 %v6448_v27, %v1309_v16 }
 0x6e1   : > { %v1446_v29 = vsub.f32 %v1441_v25, %v1445_v28 }
 0x6e3   : > { %v1447_v30 = vmul.f32 1.442695, %v1446_v29 }
 0x6e5   : > { %5462 = vpow2.f32 %v1447_v30 }
 0x6e7   : > { %v1545_v31 = vpop.f32.mrf.mxu2 }
 0x6e8   : > { %v1546_v32 = vadd.f32 %v1545_v31, %v6390_v45 }
 0x6ea   : > { %v1548_v33 = vsel %vm1023_vm7, %v1546_v32, -inf }
 0x6eb   : > { %v5463_v34 = vpop.eup %5462  ;;  %1549 = vmax.xlane.f32.xlu0 %v1548_v33 }
 0x6ec   : > { %v1449_v35 = vsel %vm1023_vm7, %v5463_v34, 0.0 }
 0x6ed   : > { %1450 = vadd.xlane.f32.xlu1 %v1449_v35 }
 0x6ff   : > { %1467 = vrot.lane.b32.xlu0 %v6362_v38, %s7192_s26 }
 0x706   : > { %1572 = vrot.lane.b32.xlu1 %v6362_v38, %s7190_s16 }
 0x707   : > { %1732 = vrot.lane.b32.xlu0 %v6362_v38, %s7188_s21 }
 0x70e   : > { %1625 = vrot.lane.b32.xlu1 %v6360_v37, %s7185_s3 }
 0x70f   : > { %1730 = vrot.lane.b32.xlu0 %v6360_v37, %s7188_s21 }
 0x75e   : > { %v1550_v40 = vpop.xlane.xlu0 %1549 }
 0x75f   : > { %v1551_v41 = vsub.f32 %v1546_v32, %v1550_v40 }
 0x760   : > { %v1451_v42 = vpop.xlane.xlu1 %1450 }
 0x761   : > { %v1552_v43 = vmul.f32 1.442695, %v1551_v41  ;;  %5464 = vrcp.f32 %v1451_v42  ;;  %v1463_v50 = vand.u32 2147483648, %v1451_v42  ;;  %v1461_v51 = vand.u32 2147483647, %v1451_v42 }
 0x762   : > { %vm1457_vm13 = vweird.f32 %v1451_v42 }
 0x763   : > { %5466 = vpow2.f32 %v1552_v43  ;;  %v1464_v53 = vor.u32 1.1754944e-38, %v1463_v50  ;;  %vm1462_vm15 = vcmp.eq.f32.partialorder %v1461_v51, 8.507059e+37 }
 0x767   : > { %v5465_v44 = vpop.eup %5464 }
 0x768   : > { %v1453_v46 = vmul.f32 %v5465_v44, %v1451_v42  ;;  %vm1458_vm12 = vweird.f32 %v5465_v44 }
 0x769   : > { %v5467_v47 = vpop.eup %5466  ;;  %vm1459_vm14 = vmor %vm1457_vm13, %vm1458_vm12 }
 0x76a   : > { %v1454_v48 = vsub.f32 1.0, %v1453_v46  ;;  %v1554_v49 = vsel %vm1023_vm7, %v5467_v47, 0.0 }
 0x76b   : > { %1555 = vadd.xlane.f32.xlu2 %v1554_v49 }
 0x76c   : > { %v1455_v37 = vmul.f32 %v5465_v44, %v1454_v48 }
 0x76e   : > { %v1456_v52 = vadd.f32 %v5465_v44, %v1455_v37 }
 0x770   : > { %v1460_v55 = vsel %vm1459_vm14, %v5465_v44, %v1456_v52 }
 0x771   : > { %v1465_v56 = vsel %vm1462_vm15, %v1464_v53, %v1460_v55  ;;  %v1468_v57 = vpop.permute.xlu0 %1467 }
 0x772   : > { %1488 = vmatpush.msrb.mxu1 %v1468_v57  ;;  %v1466_v58 = vmul.f32 %v5463_v34, %v1465_v56 }
 0x774   : > { %5119 = vmatpush.msk.msra.mxu1 %vm1157_vm6, %v1598_v54 }
 0x775   : > { %5113 = vmatmul.msk.f32.vlgmr.msrb.gmra.mxu1 %vm1023_vm7, %v1466_v58 }
 0x778   : > { %v1573_v59 = vpop.permute.xlu1 %1572 }
 0x779   : > { %v1733_v60 = vpop.permute.xlu0 %1732  ;;  %1593 = vmatpush.msra.mxu0 %v1573_v59 }
 0x77a   : > { %5126 = vmatpush.xpose.msk.msrb.mxu1 %vm996_vm5, %v1733_v60 }
 0x780   : > { %v1626_v13 = vpop.permute.xlu1 %1625 }
 0x781   : > { %v1731_v21 = vpop.permute.xlu0 %1730 }
 0x783   : > { %1627 = vrot.lane.b32.xlu2 %v6362_v38, %s7185_s3  ;;  %s7270_s3 = smov 112  }
 0x7de   : > { %v1556_v61 = vpop.xlane.xlu2 %1555 }
 0x7df   : > { %5468 = vrcp.f32 %v1556_v61  ;;  %v1568_v3 = vand.u32 2147483648, %v1556_v61  ;;  %v1566_v5 = vand.u32 2147483647, %v1556_v61  ;;  %vm1562_vm2 = vweird.f32 %v1556_v61 }
 0x7e1   : > { %v1569_v7 = vor.u32 1.1754944e-38, %v1568_v3  ;;  %vm1567_vm4 = vcmp.eq.f32.partialorder %v1566_v5, 8.507059e+37 }
 0x7e5   : > { %v5469_v62 = vpop.eup %5468 }
 0x7e6   : > { %v1558_v63 = vmul.f32 %v5469_v62, %v1556_v61  ;;  %v1628_v1 = vpop.permute.xlu2 %1627  ;;  %vm1563_vm1 = vweird.f32 %v5469_v62 }
 0x7e7   : > { %5121 = vmatpush.xpose.msk.msra.mxu3 %vm996_vm5, %v1628_v1  ;;  %vm1564_vm3 = vmor %vm1562_vm2, %vm1563_vm1 }
 0x7e8   : > { %v1559_v2 = vsub.f32 1.0, %v1558_v63 }
 0x7ea   : > { %v1560_v4 = vmul.f32 %v5469_v62, %v1559_v2  ;;  %v914_v2 = vld [vmem:[%s7268_s8 + $0x18] sm:$0xff] }
 0x7eb   : > { %v1808_v3 = vrot.slane %v914_v2, 4  ;;  %5124 = vmatpush.msk.msrb.mxu0 %vm1157_vm6, %v914_v2 }
 0x7ec   : > { %v1561_v6 = vadd.f32 %v5469_v62, %v1560_v4 }
 0x7ee   : > { %v1565_v9 = vsel %vm1564_vm3, %v5469_v62, %v1561_v6 }
 0x7ef   : > { %v1570_v10 = vsel %vm1567_vm4, %v1569_v7, %v1565_v9 }
 0x7f0   : > { %v1571_v11 = vmul.f32 %v5467_v47, %v1570_v10 }
 0x7f2   : > { %v1490_v12 = vpop.f32.mrf.mxu1  ;;  %5118 = vmatmul.msk.f32.vlgmr.msra.gmra.mxu0 %vm1023_vm7, %v1571_v11 }
 0x7f3   : > { %5115 = vmatmul.msk.f32.vlgmr.msrb.gmra.mxu3 %vm996_vm5, %v1490_v12 }
 0x7fb   : > { %5122 = vmatmul.msk.f32.vlgmr.msra.gmra.mxu3 %vm996_vm5, %v1626_v13 }
 0x86f   : > { %v1595_v14 = vpop.f32.mrf.mxu0 }
 0x870   : > { %5120 = vmatmul.msk.f32.vlgmr.msra.gmra.mxu1 %vm996_vm5, %v1595_v14 }
 0x876   : > { %v1516_v18 = vpop.f32.mrf.mxu3 }
 0x877   : > { %v1519_v19 = vadd.f32 %v1516_v18, %v1414_v17  ;;  %v1845_v18 = vld [vmem:[#allocation13 + $0x18] sm:$0xff] }
 0x878   : > { %5127 = vmatmul.msk.f32.vlgmr.msrb.gmra.mxu1 %vm996_vm5, %v1731_v21  ;;  %v1842_v21 = vld [vmem:[#allocation13] sm:$0xff] }
 0x879   : > { %1918 = vmatpush.msra.mxu1 %v1845_v18 }
 0x87e   : > { %v1650_v23 = vpop.f32.mrf.mxu3 }
 0x87f   : > { %v1651_v24 = vadd.f32 %v1650_v23, %v6390_v45  ;;  %v899_v23 = vld [vmem:[%s7184_s13] sm:$0xff]  ;;  %s7269_s13 = smov 92  }
 0x881   : > { %v1653_v25 = vsel %vm1023_vm7, %v1651_v24, -inf }
 0x882   : > { %1654 = vmax.xlane.f32.xlu1 %v1653_v25  ;;  %v1840_v25 = vld [vmem:[#allocation11 + $0x10] sm:$0xff] }
 0x89b   : > { %1782 = vrot.lane.b32.xlu1 %v6362_v38, %s7180_s6  ;;  %s7271_s6 = smov 104  }
 0x8ed   : > { %v1621_v36 = vpop.f32.mrf.mxu1 }
 0x8ee   : > { %v6487_v20 = vadd.f32 %v1621_v36, %v1519_v19  ;;  %v1844_v19 = vld [vmem:[#allocation13 + $0x10] sm:$0xff]  ;;  %v1839_v36 = vld [vmem:[#allocation11 + $0x8] sm:$0xff] }
 0x8ef   : > { %1919 = vmatpush.msra.mxu1 %v1844_v19 }
 0x8f5   : > { %v1655_v22 = vpop.xlane.xlu1 %1654  ;;  %v1755_v27 = vpop.f32.mrf.mxu1 }
 0x8f6   : > { %v1656_v26 = vsub.f32 %v1651_v24, %v1655_v22  ;;  %v1756_v28 = vadd.f32 %v1755_v27, %v6390_v45  ;;  %v1841_v24 = vld [vmem:[#allocation11 + $0x18] sm:$0xff] }
 0x8f7   : > { %1895 = vmatpush.msra.mxu0 %v1841_v24 }
 0x8f8   : > { %v1657_v29 = vmul.f32 1.442695, %v1656_v26  ;;  %v1758_v30 = vsel %vm1023_vm7, %v1756_v28, -inf }
 0x8f9   : > { %1759 = vmax.xlane.f32.xlu2 %v1758_v30  ;;  %1896 = vmatpush.msra.mxu0 %v1840_v25 }
 0x8fa   : > { %5470 = vpow2.f32 %v1657_v29 }
 0x8fb   : > { %1897 = vmatpush.msra.mxu0 %v1839_v36 }
 0x900   : > { %v5471_v31 = vpop.eup %5470 }
 0x901   : > { %v1659_v32 = vsel %vm1023_vm7, %v5471_v31, 0.0 }
 0x902   : > { %1660 = vadd.xlane.f32.xlu2 %v1659_v32 }
 0x90d   : > { %v1783_v33 = vpop.permute.xlu1 %1782 }
 0x90e   : > { %1803 = vmatpush.msrb.mxu3 %v1783_v33 }
 0x96c   : > { %v1760_v34 = vpop.xlane.xlu2 %1759 }
 0x96d   : > { %v1761_v35 = vsub.f32 %v1756_v28, %v1760_v34  ;;  %v5426_v34 = vld [vmem:[%s7136_s9] ss:$0 sm:$0xff] }
 0x96f   : > { %v1762_v39 = vmul.f32 1.442695, %v1761_v35 }
 0x971   : > { %5472 = vpow2.f32 %v1762_v39 }
 0x975   : > { %v1661_v45 = vpop.xlane.xlu2 %1660 }
 0x976   : > { %5474 = vrcp.f32 %v1661_v45  ;;  %v1673_v37 = vand.u32 2147483648, %v1661_v45  ;;  %vm1667_vm9 = vweird.f32 %v1661_v45  ;;  %v1671_v52 = vand.u32 2147483647, %v1661_v45 }
 0x977   : > { %v5473_v40 = vpop.eup %5472 }
 0x978   : > { %v1764_v41 = vsel %vm1023_vm7, %v5473_v40, 0.0  ;;  %v1674_v56 = vor.u32 1.1754944e-38, %v1673_v37  ;;  %vm1672_vm13 = vcmp.eq.f32.partialorder %v1671_v52, 8.507059e+37 }
 0x979   : > { %1765 = vadd.xlane.f32.xlu0 %v1764_v41 }
 0x97c   : > { %v5475_v42 = vpop.eup %5474 }
 0x97d   : > { %v1663_v43 = vmul.f32 %v5475_v42, %v1661_v45  ;;  %vm1668_vm8 = vweird.f32 %v5475_v42 }
 0x97e   : > { %vm1669_vm10 = vmor %vm1667_vm9, %vm1668_vm8 }
 0x97f   : > { %v1664_v46 = vsub.f32 1.0, %v1663_v43 }
 0x981   : > { %v1665_v47 = vmul.f32 %v5475_v42, %v1664_v46  ;;  %v6544_v46 = vld [vmem:[%s7187_s14] sm:$0xff]  ;;  %s7273_s14 = smov 68  }
 0x983   : > { %v1666_v50 = vadd.f32 %v5475_v42, %v1665_v47 }
 0x985   : > { %v1670_v55 = vsel %vm1669_vm10, %v5475_v42, %v1666_v50 }
 0x986   : > { %v1675_v59 = vsel %vm1672_vm13, %v1674_v56, %v1670_v55 }
 0x987   : > { %v1676_v1 = vmul.f32 %v5471_v31, %v1675_v59 }
 0x98d   : > { %1677 = vrot.lane.b32.xlu0 %v6362_v38, %s7182_s0  ;;  %s7272_s0 = smov 72  }
 0x9ec   : > { %v1766_v44 = vpop.xlane.xlu0 %1765 }
 0x9ed   : > { %5476 = vrcp.f32 %v1766_v44  ;;  %v1778_v53 = vand.u32 2147483648, %v1766_v44  ;;  %v1776_v38 = vand.u32 2147483647, %v1766_v44  ;;  %vm1772_vm12 = vweird.f32 %v1766_v44 }
 0x9ef   : > { %v1779_v58 = vor.u32 1.1754944e-38, %v1778_v53  ;;  %vm1777_vm15 = vcmp.eq.f32.partialorder %v1776_v38, 8.507059e+37 }
 0x9f3   : > { %v5477_v48 = vpop.eup %5476 }
 0x9f4   : > { %v1768_v49 = vmul.f32 %v5477_v48, %v1766_v44  ;;  %vm1773_vm11 = vweird.f32 %v5477_v48 }
 0x9f5   : > { %vm1774_vm14 = vmor %vm1772_vm12, %vm1773_vm11 }
 0x9f6   : > { %v1769_v51 = vsub.f32 1.0, %v1768_v49 }
 0x9f8   : > { %v1770_v54 = vmul.f32 %v5477_v48, %v1769_v51 }
 0x9fa   : > { %v1771_v57 = vadd.f32 %v5477_v48, %v1770_v54 }
 0x9fc   : > { %v1775_v60 = vsel %vm1774_vm14, %v5477_v48, %v1771_v57  ;;  %v1846_v57 = vld [vmem:[#allocation14] sm:$0xff] }
 0x9fd   : > { %v1780_v61 = vsel %vm1777_vm15, %v1779_v58, %v1775_v60  ;;  %v2081_v58 = vrot.slane %v1846_v57, 4 }
 0x9fe   : > { %v1781_v62 = vmul.f32 %v5473_v40, %v1780_v61  ;;  %v5427_v40 = vld [vmem:[%s7137_s10] ss:$0 sm:$0xff] }
 0x9ff   : > { %v1678_v63 = vpop.permute.xlu0 %1677 }
 0xa00   : > { %1698 = vmatpush.msra.mxu2 %v1678_v63  ;;  %5128 = vmatmul.msk.f32.vlgmr.msrb.gmra.mxu3 %vm1023_vm7, %v1781_v62 }
 0xa01   : > { %5123 = vmatmul.msk.f32.vlgmr.msra.gmra.mxu2 %vm1023_vm7, %v1676_v1 }
 0xa02   : > { %5129 = vmatpush.msk.msrb.mxu2 %vm1157_vm6, %v1808_v3 }
 0xa83   : > { %v1805_v4 = vpop.f32.mrf.mxu3 }
 0xa84   : > { %v1700_v5 = vpop.f32.mrf.mxu2  ;;  %5130 = vmatmul.msk.f32.vlgmr.msrb.gmra.mxu2 %vm996_vm5, %v1805_v4 }
 0xa85   : > { %5125 = vmatmul.msk.f32.vlgmr.msrb.gmra.mxu0 %vm996_vm5, %v1700_v5 }
 0xb02   : > { %v1726_v6 = vpop.f32.mrf.mxu0 }
 0xb03   : > { %v1729_v7 = vadd.f32 %v1726_v6, %v6487_v20  ;;  %v1838_v20 = vld [vmem:[#allocation11] sm:$0xff] }
 0xb04   : > { %1898 = vmatpush.msra.mxu0 %v1838_v20 }
 0xb07   : > { %v1831_v9 = vpop.f32.mrf.mxu2 }
 0xb08   : > { %v1834_v10 = vadd.f32 %v1831_v9, %v1729_v7 }
 0xb0a   : > { %v6506_v11 = vadd.f32 %v1834_v10, %v6321_v0  ;;  %v1843_v0 = vld [vmem:[#allocation13 + $0x8] sm:$0xff] }
 0xb0b   : > { %1920 = vmatpush.msra.mxu1 %v1843_v0 }
 0xb0c   : > { %v1850_v12 = vsel %vm915_vm0, %v6506_v11, 0.0 }
 0xb0d   : > { %1851 = vadd.xlane.f32.xlu2 %v1850_v12  ;;  %1921 = vmatpush.msra.mxu1 %v1842_v21 }
 0xb0e   : > { %5132 = vmatmul.msk.f32.vlgmr.msra.gmra.mxu1 %vm915_vm0, %v899_v23 }
 0xb80   : > { %v1852_v13 = vpop.xlane.xlu2 %1851 }
 0xb81   : > { %v1853_v14 = vmul.f32 %v1852_v13, %v6325_v8 }
 0xb83   : > { %v1854_v15 = vsub.f32 %v6506_v11, %v1853_v14 }
 0xb85   : > { %v1855_v16 = vmul.f32 %v1854_v15, %v1854_v15 }
 0xb87   : > { %v1856_v17 = vsel %vm915_vm0, %v1855_v16, 0.0 }
 0xb88   : > { %1857 = vadd.xlane.f32.xlu2 %v1856_v17 }
 0xb8b   : > { %v6524_v42 = vpop.f32.mrf.mxu1 }
 0xb8c   : > { %1976 = vrot.lane.b32.xlu1 %v6524_v42, %s7200_s27  ;;  %5133 = vmatpush.xpose.msk.msra.mxu3 %vm996_vm5, %v6524_v42  ;;  %s7282_s27 = smov 96  }
 0xb90   : > { %5139 = vmatpush.msk.msrb.mxu3 %vm1157_vm6, %v2081_v58 }
 0xbfb   : > { %v1858_v22 = vpop.xlane.xlu2 %1857 }
 0xbfc   : > { %v1859_v26 = vmul.f32 %v1858_v22, %v6325_v8 }
 0xbfe   : > { %v1860_v27 = vadd.f32 1e-06, %v1859_v26  ;;  %v1977_v44 = vpop.permute.xlu1 %1976 }
 0xbff   : > { %1997 = vmatpush.msra.mxu2 %v1977_v44  ;;  %v1847_v44 = vld [vmem:[#allocation14 + $0x8] sm:$0xff] }
 0xc00   : > { %5478 = vrsqrt.f32 %v1860_v27  ;;  %vm1867_vm2 = vweird.f32 %v1860_v27 }
 0xc01   : > { %5141 = vmatpush.msk.msrb.mxu2 %vm1157_vm6, %v1846_v57 }
 0xc06   : > { %v5479_v28 = vpop.eup %5478 }
 0xc07   : > { %v1862_v29 = vmul.f32 %v5479_v28, %v1860_v27  ;;  %vm1868_vm1 = vweird.f32 %v5479_v28 }
 0xc08   : > { %vm1869_vm3 = vmor %vm1867_vm2, %vm1868_vm1 }
 0xc09   : > { %v1863_v30 = vmul.f32 %v5479_v28, %v1862_v29 }
 0xc0b   : > { %v1864_v31 = vmul.f32 0.5, %v1863_v30 }
 0xc0d   : > { %v1865_v32 = vsub.f32 1.5, %v1864_v31 }
 0xc0f   : > { %v1866_v33 = vmul.f32 %v5479_v28, %v1865_v32 }
 0xc11   : > { %v1870_v35 = vsel %vm1869_vm3, %v5479_v28, %v1866_v33 }
 0xc12   : > { %v1871_v39 = vmul.f32 %v1870_v35, %v1854_v15 }
 0xc14   : > { %v1875_v41 = vmul.f32 %v5426_v34, %v1871_v39 }
 0xc16   : > { %v1879_v45 = vadd.f32 %v5427_v40, %v1875_v41 }
 0xc18   : > { %5131 = vmatmul.msk.f32.vlgmr.msra.gmra.mxu0 %vm915_vm0, %v1879_v45 }
 0xc95   : > { %v6530_v43 = vpop.f32.mrf.mxu0 }
 0xc96   : > { %2002 = vrot.lane.b32.xlu1 %v6530_v43, %s7206_s11  ;;  %5134 = vmatmul.msk.f32.vlgmr.msra.gmra.mxu3 %vm996_vm5, %v6530_v43 }
 0xc97   : > { %5146 = vmatpush.msk.msra.mxu3 %vm1157_vm6, %v1847_v44 }
 0xc9e   : > { %2134 = vrot.lane.b32.xlu1 %v6524_v42, %s7202_s20 }
 0xca6   : > { %2239 = vrot.lane.b32.xlu1 %v6524_v42, %s7204_s15 }
 0xcae   : > { %2237 = vrot.lane.b32.xlu1 %v6530_v43, %s7204_s15  ;;  %s7280_s15 = scalar_lea.vmem [#allocation7], %s6289_s1 }
 0xd08   : > { %v2003_v50 = vpop.permute.xlu1 %2002 }
 0xd10   : > { %v2135_v54 = vpop.permute.xlu1 %2134 }
 0xd18   : > { %v2240_v15 = vpop.permute.xlu1 %2239 }
 0xd19   : > { %v1949_v47 = vpop.f32.mrf.mxu3 }
 0xd1a   : > { %v1950_v48 = vadd.f32 %v1949_v47, %v6544_v46 }
 0xd1c   : > { %v1952_v49 = vsel %vm1023_vm7, %v1950_v48, -inf }
 0xd1d   : > { %1953 = vmax.xlane.f32.xlu2 %v1952_v49 }
 0xd20   : > { %v2238_v26 = vpop.permute.xlu1 %2237 }
 0xd35   : > { %2004 = vrot.lane.b32.xlu2 %v6524_v42, %s7206_s11  ;;  %s7277_s11 = sld [smem:[#allocation47_spill]] }
 0xd3d   : > { %2132 = vrot.lane.b32.xlu2 %v6530_v43, %s7202_s20  ;;  %s7274_s20 = sld [smem:[#allocation43_spill]] }
 0xd90   : > { %v1954_v37 = vpop.xlane.xlu2 %1953 }
 0xd91   : > { %v1955_v51 = vsub.f32 %v1950_v48, %v1954_v37 }
 0xd93   : > { %v1956_v52 = vmul.f32 1.442695, %v1955_v51 }
 0xd95   : > { %5480 = vpow2.f32 %v1956_v52 }
 0xd98   : > { %v2005_v53 = vpop.permute.xlu2 %2004 }
 0xd99   : > { %5136 = vmatpush.xpose.msk.msrb.mxu0 %vm996_vm5, %v2005_v53 }
 0xd9b   : > { %v5481_v38 = vpop.eup %5480 }
 0xd9c   : > { %5137 = vmatmul.msk.f32.vlgmr.msrb.gmra.mxu0 %vm996_vm5, %v2003_v50  ;;  %v1958_v55 = vsel %vm1023_vm7, %v5481_v38, 0.0 }
 0xd9d   : > { %5143 = vmatpush.xpose.msk.msra.mxu0 %vm996_vm5, %v2135_v54  ;;  %1959 = vadd.xlane.f32.xlu0 %v1958_v55 }
 0xda0   : > { %v2133_v56 = vpop.permute.xlu2 %2132 }
 0xda4   : > { %5144 = vmatmul.msk.f32.vlgmr.msra.gmra.mxu0 %vm996_vm5, %v2133_v56 }
 0xe10   : > { %v1960_v59 = vpop.xlane.xlu0 %1959 }
 0xe11   : > { %5482 = vrcp.f32 %v1960_v59  ;;  %v1972_v2 = vand.u32 2147483648, %v1960_v59  ;;  %v1970_v4 = vand.u32 2147483647, %v1960_v59  ;;  %vm1966_vm8 = vweird.f32 %v1960_v59 }
 0xe13   : > { %v1973_v7 = vor.u32 1.1754944e-38, %v1972_v2  ;;  %vm1971_vm10 = vcmp.eq.f32.partialorder %v1970_v4, 8.507059e+37 }
 0xe17   : > { %v5483_v60 = vpop.eup %5482 }
 0xe18   : > { %v1962_v61 = vmul.f32 %v5483_v60, %v1960_v59  ;;  %vm1967_vm4 = vweird.f32 %v5483_v60 }
 0xe19   : > { %v2027_v62 = vpop.f32.mrf.mxu0  ;;  %vm1968_vm9 = vmor %vm1966_vm8, %vm1967_vm4 }
 0xe1a   : > { %v1963_v63 = vsub.f32 1.0, %v1962_v61  ;;  %v2028_v1 = vadd.f32 %v2027_v62, %v6544_v46 }
 0xe1c   : > { %v1964_v3 = vmul.f32 %v5483_v60, %v1963_v63  ;;  %v2030_v5 = vsel %vm1023_vm7, %v2028_v1, -inf }
 0xe1d   : > { %2031 = vmax.xlane.f32.xlu2 %v2030_v5 }
 0xe1e   : > { %v1965_v6 = vadd.f32 %v5483_v60, %v1964_v3 }
 0xe20   : > { %v1969_v9 = vsel %vm1968_vm9, %v5483_v60, %v1965_v6 }
 0xe21   : > { %v1974_v10 = vsel %vm1971_vm10, %v1973_v7, %v1969_v9  ;;  %v2157_v12 = vpop.f32.mrf.mxu0 }
 0xe22   : > { %v2158_v13 = vadd.f32 %v2157_v12, %v6544_v46  ;;  %v1975_v14 = vmul.f32 %v5481_v38, %v1974_v10 }
 0xe24   : > { %5135 = vmatmul.msk.f32.vlgmr.msra.gmra.mxu2 %vm1023_vm7, %v1975_v14  ;;  %v2160_v16 = vsel %vm1023_vm7, %v2158_v13, -inf }
 0xe25   : > { %5148 = vmatpush.xpose.msk.msra.mxu2 %vm996_vm5, %v2240_v15  ;;  %2161 = vmax.xlane.f32.xlu0 %v2160_v16  ;;  %v2315_v15 = vrot.slane %v1847_v44, 4 }
 0xe35   : > { %2184 = vrot.lane.b32.xlu2 %v6524_v42, %s7198_s4  ;;  %s7285_s4 = smov 84  }
 0xe3d   : > { %2449 = vrot.lane.b32.xlu2 %v6524_v42, %s7196_s22 }
 0xe90   : > { %v2032_v17 = vpop.xlane.xlu2 %2031 }
 0xe91   : > { %v2033_v18 = vsub.f32 %v2028_v1, %v2032_v17 }
 0xe93   : > { %v2034_v19 = vmul.f32 1.442695, %v2033_v18 }
 0xe95   : > { %5484 = vpow2.f32 %v2034_v19 }
 0xe98   : > { %v2162_v0 = vpop.xlane.xlu0 %2161  ;;  %v2185_v10 = vpop.permute.xlu2 %2184 }
 0xe99   : > { %v2163_v21 = vsub.f32 %v2158_v13, %v2162_v0 }
 0xe9b   : > { %v6569_v23 = vpop.eup %5484  ;;  %v2164_v24 = vmul.f32 1.442695, %v2163_v21 }
 0xe9c   : > { %v2036_v25 = vsel %vm1023_vm7, %v6569_v23, 0.0 }
 0xe9d   : > { %5486 = vpow2.f32 %v2164_v24  ;;  %2037 = vadd.xlane.f32.xlu0 %v2036_v25 }
 0xea0   : > { %v2450_v0 = vpop.permute.xlu2 %2449 }
 0xea3   : > { %v6573_v36 = vpop.eup %5486 }
 0xea4   : > { %v2166_v20 = vsel %vm1023_vm7, %v6573_v36, 0.0 }
 0xea5   : > { %2167 = vadd.xlane.f32.xlu0 %v2166_v20 }
 0xea7   : > { %v1999_v22 = vpop.f32.mrf.mxu2 }
 0xea8   : > { %5142 = vmatmul.msk.f32.vlgmr.msrb.gmra.mxu2 %vm996_vm5, %v1999_v22 }
 0xeb0   : > { %5149 = vmatmul.msk.f32.vlgmr.msra.gmra.mxu2 %vm996_vm5, %v2238_v26 }
 0xf10   : > { %v2038_v40 = vpop.xlane.xlu0 %2037 }
 0xf11   : > { %v2050_v55 = vand.u32 2147483648, %v2038_v40  ;;  %vm2044_vm12 = vweird.f32 %v2038_v40  ;;  %v2048_v57 = vand.u32 2147483647, %v2038_v40 }
 0xf13   : > { %v2051_v63 = vor.u32 1.1754944e-38, %v2050_v55  ;;  %vm2049_vm1 = vcmp.eq.f32.partialorder %v2048_v57, 8.507059e+37 }
 0xf18   : > { %v2168_v41 = vpop.xlane.xlu0 %2167 }
 0xf19   : > { %v2180_v7 = vand.u32 2147483648, %v2168_v41  ;;  %vm2174_vm8 = vweird.f32 %v2168_v41  ;;  %v2178_v12 = vand.u32 2147483647, %v2168_v41 }
 0xf1b   : > { %v2181_v17 = vor.u32 1.1754944e-38, %v2180_v7  ;;  %vm2179_vm10 = vcmp.eq.f32.partialorder %v2178_v12, 8.507059e+37 }
 0xf2b   : > { %v6579_v27 = vpop.f32.mrf.mxu2 }
 0xf33   : > { %v2262_v28 = vpop.f32.mrf.mxu2 }
 0xf34   : > { %v2263_v29 = vadd.f32 %v2262_v28, %v6544_v46 }
 0xf36   : > { %v2265_v30 = vsel %vm1023_vm7, %v2263_v29, -inf }
 0xf37   : > { %2266 = vmax.xlane.f32.xlu1 %v2265_v30 }
 0xf50   : > { %2289 = vrot.lane.b32.xlu1 %v6524_v42, %s7194_s24  ;;  %s7286_s24 = smov 80  }
 0xfaa   : > { %v2267_v31 = vpop.xlane.xlu1 %2266 }
 0xfab   : > { %v2268_v32 = vsub.f32 %v2263_v29, %v2267_v31 }
 0xfad   : > { %v2269_v33 = vmul.f32 1.442695, %v2268_v32 }
 0xfaf   : > { %5488 = vpow2.f32 %v2269_v33 }
 0xfb0   : > { %5490 = vrcp.f32 %v2038_v40 }
 0xfb1   : > { %5492 = vrcp.f32 %v2168_v41 }
 0xfb5   : > { %v5489_v34 = vpop.eup %5488 }
 0xfb6   : > { %v2271_v35 = vsel %vm1023_vm7, %v5489_v34, 0.0  ;;  %v5491_v45 = vpop.eup %5490 }
 0xfb7   : > { %2272 = vadd.xlane.f32.xlu0 %v2271_v35  ;;  %v2040_v47 = vmul.f32 %v5491_v45, %v2038_v40  ;;  %v5493_v50 = vpop.eup %5492  ;;  %vm2045_vm11 = vweird.f32 %v5491_v45 }
 0xfb8   : > { %v2170_v51 = vmul.f32 %v5493_v50, %v2168_v41  ;;  %vm2046_vm13 = vmor %vm2044_vm12, %vm2045_vm11  ;;  %vm2175_vm4 = vweird.f32 %v5493_v50 }
 0xfb9   : > { %v2041_v49 = vsub.f32 1.0, %v2040_v47  ;;  %vm2176_vm9 = vmor %vm2174_vm8, %vm2175_vm4 }
 0xfba   : > { %v2171_v38 = vsub.f32 1.0, %v2170_v51 }
 0xfbb   : > { %v2042_v37 = vmul.f32 %v5491_v45, %v2041_v49 }
 0xfbc   : > { %v2172_v62 = vmul.f32 %v5493_v50, %v2171_v38 }
 0xfbd   : > { %v2043_v54 = vadd.f32 %v5491_v45, %v2042_v37 }
 0xfbe   : > { %v2173_v5 = vadd.f32 %v5493_v50, %v2172_v62 }
 0xfbf   : > { %v2047_v61 = vsel %vm2046_vm13, %v5491_v45, %v2043_v54  ;;  %v1848_v54 = vld [vmem:[#allocation14 + $0x10] sm:$0xff] }
 0xfc0   : > { %v2052_v3 = vsel %vm2049_vm1, %v2051_v63, %v2047_v61  ;;  %v2177_v16 = vsel %vm2176_vm9, %v5493_v50, %v2173_v5  ;;  %v2525_v38 = vrot.slane %v1848_v54, 4 }
 0xfc1   : > { %v2053_v14 = vmul.f32 %v6569_v23, %v2052_v3  ;;  %v2182_v18 = vsel %vm2179_vm10, %v2181_v17, %v2177_v16 }
 0xfc2   : > { %v2290_v39 = vpop.permute.xlu1 %2289  ;;  %v2183_v19 = vmul.f32 %v6573_v36, %v2182_v18 }
 0xfc3   : > { %2310 = vmatpush.msrb.mxu0 %v2290_v39 }
 0xfc5   : > { %5156 = vmatpush.msk.msra.mxu0 %vm1157_vm6, %v1848_v54 }
 0xfcb   : > { %2054 = vrot.lane.b32.xlu0 %v6524_v42, %s7269_s13 }
 0xfd3   : > { %2344 = vrot.lane.b32.xlu0 %v6524_v42, %s7270_s3 }
 0xfdb   : > { %2342 = vrot.lane.b32.xlu0 %v6530_v43, %s7270_s3 }
 0xfe3   : > { %2447 = vrot.lane.b32.xlu0 %v6530_v43, %s7196_s22  ;;  %s7281_s22 = smov 120  }
0x102a   : > { %v2273_v48 = vpop.xlane.xlu0 %2272 }
0x102b   : > { %5494 = vrcp.f32 %v2273_v48  ;;  %v2285_v58 = vand.u32 2147483648, %v2273_v48  ;;  %v2283_v60 = vand.u32 2147483647, %v2273_v48  ;;  %vm2279_vm15 = vweird.f32 %v2273_v48 }
0x102d   : > { %v2286_v2 = vor.u32 1.1754944e-38, %v2285_v58  ;;  %vm2284_vm3 = vcmp.eq.f32.partialorder %v2283_v60, 8.507059e+37 }
0x1031   : > { %v5495_v52 = vpop.eup %5494 }
0x1032   : > { %v2275_v53 = vmul.f32 %v5495_v52, %v2273_v48  ;;  %vm2280_vm14 = vweird.f32 %v5495_v52 }
0x1033   : > { %vm2281_vm2 = vmor %vm2279_vm15, %vm2280_vm14 }
0x1034   : > { %v2276_v56 = vsub.f32 1.0, %v2275_v53 }
0x1036   : > { %v2277_v59 = vmul.f32 %v5495_v52, %v2276_v56 }
0x1038   : > { %v2278_v1 = vadd.f32 %v5495_v52, %v2277_v59 }
0x103a   : > { %v2282_v4 = vsel %vm2281_vm2, %v5495_v52, %v2278_v1 }
0x103b   : > { %v2287_v6 = vsel %vm2284_vm3, %v2286_v2, %v2282_v4 }
0x103c   : > { %v2288_v9 = vmul.f32 %v5489_v34, %v2287_v6 }
0x103d   : > { %v2055_v13 = vpop.permute.xlu0 %2054 }
0x103e   : > { %2075 = vmatpush.msrb.mxu1 %v2055_v13  ;;  %5150 = vmatmul.msk.f32.vlgmr.msrb.gmra.mxu0 %vm1023_vm7, %v2288_v9 }
0x103f   : > { %5138 = vmatmul.msk.f32.vlgmr.msrb.gmra.mxu1 %vm1023_vm7, %v2053_v14 }
0x1040   : > { %2205 = vmatpush.msra.mxu1 %v2185_v10 }
0x1042   : > { %5151 = vmatpush.msk.msrb.mxu1 %vm1157_vm6, %v2315_v15 }
0x1045   : > { %v2345_v21 = vpop.permute.xlu0 %2344 }
0x1047   : > { %5145 = vmatmul.msk.f32.vlgmr.msra.gmra.mxu1 %vm1023_vm7, %v2183_v19 }
0x1048   : > { %5158 = vmatpush.xpose.msk.msra.mxu1 %vm996_vm5, %v2450_v0 }
0x104d   : > { %v2343_v23 = vpop.permute.xlu0 %2342 }
0x1055   : > { %v2448_v20 = vpop.permute.xlu0 %2447 }
0x10bb   : > { %v2312_v24 = vpop.f32.mrf.mxu0 }
0x10bc   : > { %v2077_v25 = vpop.f32.mrf.mxu1  ;;  %5152 = vmatmul.msk.f32.vlgmr.msrb.gmra.mxu1 %vm996_vm5, %v2312_v24 }
0x10bd   : > { %5140 = vmatmul.msk.f32.vlgmr.msrb.gmra.mxu3 %vm996_vm5, %v2077_v25 }
0x10be   : > { %5153 = vmatpush.xpose.msk.msrb.mxu3 %vm996_vm5, %v2345_v21 }
0x10c4   : > { %v2207_v22 = vpop.f32.mrf.mxu1  ;;  %5159 = vmatmul.msk.f32.vlgmr.msra.gmra.mxu1 %vm996_vm5, %v2448_v20 }
0x10c5   : > { %5147 = vmatmul.msk.f32.vlgmr.msra.gmra.mxu3 %vm996_vm5, %v2207_v22 }
0x10cd   : > { %5154 = vmatmul.msk.f32.vlgmr.msrb.gmra.mxu3 %vm996_vm5, %v2343_v23 }
0x1139   : > { %v2338_v36 = vpop.f32.mrf.mxu1 }
0x1140   : > { %v2104_v26 = vpop.f32.mrf.mxu3 }
0x1141   : > { %v2472_v28 = vpop.f32.mrf.mxu1  ;;  %v2130_v31 = vadd.f32 %v6579_v27, %v2104_v26 }
0x1142   : > { %v2473_v29 = vadd.f32 %v2472_v28, %v6544_v46 }
0x1144   : > { %v2475_v30 = vsel %vm1023_vm7, %v2473_v29, -inf }
0x1145   : > { %2476 = vmax.xlane.f32.xlu1 %v2475_v30 }
0x1148   : > { %v2233_v32 = vpop.f32.mrf.mxu3 }
0x1149   : > { %v2236_v33 = vadd.f32 %v2233_v32, %v2130_v31 }
0x114b   : > { %v6611_v34 = vadd.f32 %v2338_v36, %v2236_v33 }
0x1150   : > { %v2367_v35 = vpop.f32.mrf.mxu3 }
0x1151   : > { %v2368_v39 = vadd.f32 %v2367_v35, %v6544_v46 }
0x1153   : > { %v2370_v40 = vsel %vm1023_vm7, %v2368_v39, -inf }
0x1154   : > { %2371 = vmax.xlane.f32.xlu2 %v2370_v40 }
0x115e   : > { %2394 = vrot.lane.b32.xlu1 %v6524_v42, %s7192_s26  ;;  %s7275_s26 = sld [smem:[#allocation44_spill]] }
0x1166   : > { %2659 = vrot.lane.b32.xlu1 %v6524_v42, %s7188_s21 }
0x11b8   : > { %v2477_v41 = vpop.xlane.xlu1 %2476 }
0x11b9   : > { %v2478_v45 = vsub.f32 %v2473_v29, %v2477_v41 }
0x11bb   : > { %v2479_v44 = vmul.f32 1.442695, %v2478_v45 }
0x11bd   : > { %5496 = vpow2.f32 %v2479_v44 }
0x11c3   : > { %v5497_v27 = vpop.eup %5496 }
0x11c4   : > { %v2481_v47 = vsel %vm1023_vm7, %v5497_v27, 0.0 }
0x11c5   : > { %2482 = vadd.xlane.f32.xlu2 %v2481_v47 }
0x11c7   : > { %v2372_v48 = vpop.xlane.xlu2 %2371 }
0x11c8   : > { %v2373_v49 = vsub.f32 %v2368_v39, %v2372_v48 }
0x11ca   : > { %v2374_v50 = vmul.f32 1.442695, %v2373_v49 }
0x11cc   : > { %5498 = vpow2.f32 %v2374_v50 }
0x11d0   : > { %v2395_v37 = vpop.permute.xlu1 %2394 }
0x11d1   : > { %2415 = vmatpush.msrb.mxu2 %v2395_v37 }
0x11d2   : > { %v5499_v51 = vpop.eup %5498 }
0x11d3   : > { %v2376_v52 = vsel %vm1023_vm7, %v5499_v51, 0.0  ;;  %5161 = vmatpush.msk.msra.mxu2 %vm1157_vm6, %v2525_v38 }
0x11d4   : > { %2377 = vadd.xlane.f32.xlu0 %v2376_v52 }
0x11d8   : > { %v2660_v18 = vpop.permute.xlu1 %2659 }
0x11dd   : > { %2499 = vrot.lane.b32.xlu2 %v6524_v42, %s7190_s16  ;;  %s7283_s16 = smov 88  }
0x11e5   : > { %2657 = vrot.lane.b32.xlu2 %v6530_v43, %s7188_s21  ;;  %s7279_s21 = smov 116  }
0x11e8   : > { %2554 = vrot.lane.b32.xlu0 %v6524_v42, %s7271_s6 }
0x11f0   : > { %2552 = vrot.lane.b32.xlu0 %v6530_v43, %s7271_s6 }
0x1238   : > { %v2483_v53 = vpop.xlane.xlu2 %2482 }
0x1239   : > { %5500 = vrcp.f32 %v2483_v53  ;;  %v2495_v59 = vand.u32 2147483648, %v2483_v53  ;;  %v2493_v61 = vand.u32 2147483647, %v2483_v53  ;;  %vm2489_vm12 = vweird.f32 %v2483_v53 }
0x123b   : > { %v2496_v43 = vor.u32 1.1754944e-38, %v2495_v59  ;;  %vm2494_vm14 = vcmp.eq.f32.partialorder %v2493_v61, 8.507059e+37 }
0x123f   : > { %v5501_v55 = vpop.eup %5500 }
0x1240   : > { %v2485_v56 = vmul.f32 %v5501_v55, %v2483_v53  ;;  %v2500_v57 = vpop.permute.xlu2 %2499  ;;  %vm2490_vm11 = vweird.f32 %v5501_v55 }
0x1241   : > { %2520 = vmatpush.msra.mxu3 %v2500_v57  ;;  %vm2491_vm13 = vmor %vm2489_vm12, %vm2490_vm11 }
0x1242   : > { %v2486_v58 = vsub.f32 1.0, %v2485_v56 }
0x1244   : > { %v2487_v60 = vmul.f32 %v5501_v55, %v2486_v58 }
0x1246   : > { %v2488_v62 = vadd.f32 %v5501_v55, %v2487_v60 }
0x1247   : > { %v2378_v63 = vpop.xlane.xlu0 %2377 }
0x1248   : > { %v2492_v1 = vsel %vm2491_vm13, %v5501_v55, %v2488_v62  ;;  %5502 = vrcp.f32 %v2378_v63  ;;  %v2390_v7 = vand.u32 2147483648, %v2378_v63  ;;  %v2388_v10 = vand.u32 2147483647, %v2378_v63  ;;  %v2658_v0 = vpop.permute.xlu2 %2657 }
0x1249   : > { %v2497_v2 = vsel %vm2494_vm14, %v2496_v43, %v2492_v1  ;;  %vm2384_vm1 = vweird.f32 %v2378_v63 }
0x124a   : > { %v2498_v3 = vmul.f32 %v5497_v27, %v2497_v2  ;;  %v2391_v13 = vor.u32 1.1754944e-38, %v2390_v7  ;;  %vm2389_vm3 = vcmp.eq.f32.partialorder %v2388_v10, 8.507059e+37 }
0x124c   : > { %5160 = vmatmul.msk.f32.vlgmr.msra.gmra.mxu3 %vm1023_vm7, %v2498_v3 }
0x124e   : > { %v5503_v4 = vpop.eup %5502 }
0x124f   : > { %v2380_v5 = vmul.f32 %v5503_v4, %v2378_v63  ;;  %vm2385_vm15 = vweird.f32 %v5503_v4 }
0x1250   : > { %vm2386_vm2 = vmor %vm2384_vm1, %vm2385_vm15 }
0x1251   : > { %v2381_v6 = vsub.f32 1.0, %v2380_v5  ;;  %v1849_v5 = vld [vmem:[#allocation14 + $0x18] sm:$0xff] }
0x1252   : > { %5166 = vmatpush.msk.msrb.mxu3 %vm1157_vm6, %v1849_v5 }
0x1253   : > { %v2382_v9 = vmul.f32 %v5503_v4, %v2381_v6  ;;  %v2735_v6 = vrot.slane %v1849_v5, 4  ;;  %v5180_v5 = vld [vmem:[%s7266_s7 + $0x20] sm:$0xff] }
0x1255   : > { %v2383_v12 = vadd.f32 %v5503_v4, %v2382_v9 }
0x1257   : > { %v2387_v14 = vsel %vm2386_vm2, %v5503_v4, %v2383_v12 }
0x1258   : > { %v2392_v15 = vsel %vm2389_vm3, %v2391_v13, %v2387_v14  ;;  %vm2836_vm3 = vcmask 523264  }
0x1259   : > { %v2393_v16 = vmul.f32 %v5499_v51, %v2392_v15 }
0x125a   : > { %v2555_v17 = vpop.permute.xlu0 %2554 }
0x125b   : > { %5155 = vmatmul.msk.f32.vlgmr.msrb.gmra.mxu2 %vm1023_vm7, %v2393_v16  ;;  %5163 = vmatpush.xpose.msk.msrb.mxu0 %vm996_vm5, %v2555_v17 }
0x125c   : > { %5168 = vmatpush.xpose.msk.msrb.mxu2 %vm996_vm5, %v2660_v18 }
0x1262   : > { %v2553_v23 = vpop.permute.xlu0 %2552 }
0x12cf   : > { %v2522_v19 = vpop.f32.mrf.mxu3 }
0x12d0   : > { %5162 = vmatmul.msk.f32.vlgmr.msra.gmra.mxu2 %vm996_vm5, %v2522_v19 }
0x12d8   : > { %5169 = vmatmul.msk.f32.vlgmr.msrb.gmra.mxu2 %vm996_vm5, %v2658_v0 }
0x12de   : > { %v2417_v21 = vpop.f32.mrf.mxu2 }
0x12df   : > { %5157 = vmatmul.msk.f32.vlgmr.msra.gmra.mxu0 %vm996_vm5, %v2417_v21 }
0x12e7   : > { %5164 = vmatmul.msk.f32.vlgmr.msrb.gmra.mxu0 %vm996_vm5, %v2553_v23  ;;  %v2768_v23 = vld [vmem:[#allocation16 + $0x18] sm:$0xff] }
0x12e8   : > { %2827 = vmatpush.msra.mxu3 %v2768_v23 }
0x1353   : > { %v2548_v24 = vpop.f32.mrf.mxu2 }
0x135b   : > { %v2682_v25 = vpop.f32.mrf.mxu2 }
0x135c   : > { %v2683_v20 = vadd.f32 %v2682_v25, %v6544_v46  ;;  %v2443_v22 = vpop.f32.mrf.mxu0  ;;  %v2766_v25 = vld [vmem:[#allocation16 + $0x8] sm:$0xff] }
0x135d   : > { %v2446_v36 = vadd.f32 %v2443_v22, %v6611_v34  ;;  %v2776_v22 = vld [vmem:[%s7145_s18 + $0x30] sm:$0xff] }
0x135e   : > { %v2685_v26 = vsel %vm1023_vm7, %v2683_v20, -inf }
0x135f   : > { %2686 = vmax.xlane.f32.xlu0 %v2685_v26  ;;  %v6642_v28 = vadd.f32 %v2548_v24, %v2446_v36  ;;  %v2767_v24 = vld [vmem:[#allocation16 + $0x10] sm:$0xff]  ;;  %v2775_v36 = vld [vmem:[%s7145_s18 + $0x28] sm:$0xff] }
0x1360   : > { %2828 = vmatpush.msra.mxu3 %v2767_v24 }
0x1362   : > { %2829 = vmatpush.msra.mxu3 %v2766_v25 }
0x1364   : > { %v2577_v29 = vpop.f32.mrf.mxu0 }
0x1365   : > { %v2578_v30 = vadd.f32 %v2577_v29, %v6544_v46  ;;  %v2774_v29 = vld [vmem:[%s7145_s18 + $0x20] sm:$0xff] }
0x1367   : > { %v2580_v31 = vsel %vm1023_vm7, %v2578_v30, -inf }
0x1368   : > { %2581 = vmax.xlane.f32.xlu1 %v2580_v31  ;;  %v2773_v31 = vld [vmem:[%s7145_s18 + $0x18] sm:$0xff] }
0x1373   : > { %2604 = vrot.lane.b32.xlu0 %v6524_v42, %s7272_s0 }
0x13d2   : > { %v2687_v32 = vpop.xlane.xlu0 %2686 }
0x13d3   : > { %v2688_v33 = vsub.f32 %v2683_v20, %v2687_v32  ;;  %v2765_v20 = vld [vmem:[#allocation16] sm:$0xff] }
0x13d4   : > { %2830 = vmatpush.msra.mxu3 %v2765_v20 }
0x13d5   : > { %v2689_v35 = vmul.f32 1.442695, %v2688_v33 }
0x13d7   : > { %5504 = vpow2.f32 %v2689_v35 }
0x13db   : > { %v2582_v39 = vpop.xlane.xlu1 %2581 }
0x13dc   : > { %v2583_v34 = vsub.f32 %v2578_v30, %v2582_v39 }
0x13dd   : > { %v5505_v40 = vpop.eup %5504 }
0x13de   : > { %v2584_v41 = vmul.f32 1.442695, %v2583_v34  ;;  %v2691_v45 = vsel %vm1023_vm7, %v5505_v40, 0.0 }
0x13df   : > { %2692 = vadd.xlane.f32.xlu1 %v2691_v45 }
0x13e0   : > { %5506 = vpow2.f32 %v2584_v41  ;;  %v5428_v41 = vld [vmem:[%s7274_s20] ss:$0 sm:$0xff] }
0x13e5   : > { %v2605_v44 = vpop.permute.xlu0 %2604 }
0x13e6   : > { %v5507_v46 = vpop.eup %5506  ;;  %2625 = vmatpush.msrb.mxu1 %v2605_v44 }
0x13e7   : > { %v2586_v27 = vsel %vm1023_vm7, %v5507_v46, 0.0 }
0x13e8   : > { %2587 = vadd.xlane.f32.xlu2 %v2586_v27  ;;  %5171 = vmatpush.msk.msra.mxu1 %vm1157_vm6, %v2735_v6 }
0x1400   : > { %2709 = vrot.lane.b32.xlu2 %v6524_v42, %s7273_s14 }
0x1452   : > { %v2693_v47 = vpop.xlane.xlu1 %2692 }
0x1453   : > { %5508 = vrcp.f32 %v2693_v47  ;;  %v2705_v51 = vand.u32 2147483648, %v2693_v47  ;;  %v2703_v53 = vand.u32 2147483647, %v2693_v47  ;;  %vm2699_vm8 = vweird.f32 %v2693_v47 }
0x1455   : > { %v2706_v38 = vor.u32 1.1754944e-38, %v2705_v51  ;;  %vm2704_vm10 = vcmp.eq.f32.partialorder %v2703_v53, 8.507059e+37 }
0x1459   : > { %v5509_v48 = vpop.eup %5508 }
0x145a   : > { %v2695_v49 = vmul.f32 %v5509_v48, %v2693_v47  ;;  %vm2700_vm4 = vweird.f32 %v5509_v48 }
0x145b   : > { %v2588_v50 = vpop.xlane.xlu2 %2587  ;;  %vm2701_vm9 = vmor %vm2699_vm8, %vm2700_vm4 }
0x145c   : > { %v2696_v37 = vsub.f32 1.0, %v2695_v49  ;;  %5510 = vrcp.f32 %v2588_v50  ;;  %v2600_v61 = vand.u32 2147483648, %v2588_v50  ;;  %v2598_v43 = vand.u32 2147483647, %v2588_v50  ;;  %v2771_v49 = vld [vmem:[%s7145_s18 + $0x8] sm:$0xff] }
0x145d   : > { %vm2594_vm12 = vweird.f32 %v2588_v50 }
0x145e   : > { %v2697_v52 = vmul.f32 %v5509_v48, %v2696_v37  ;;  %v2601_v1 = vor.u32 1.1754944e-38, %v2600_v61  ;;  %vm2599_vm14 = vcmp.eq.f32.partialorder %v2598_v43, 8.507059e+37  ;;  %v5430_v37 = vld [vmem:[%s7276_s2] ss:$0 sm:$0xff]  ;;  %v5183_v43 = vld [vmem:[%s7266_s7 + $0x38] sm:$0xff] }
0x1460   : > { %v2698_v54 = vadd.f32 %v5509_v48, %v2697_v52 }
0x1462   : > { %v5511_v55 = vpop.eup %5510  ;;  %v2702_v56 = vsel %vm2701_vm9, %v5509_v48, %v2698_v54  ;;  %v2772_v48 = vld [vmem:[%s7145_s18 + $0x10] sm:$0xff]  ;;  %v5431_v54 = vld [vmem:[%s7277_s11] ss:$0 sm:$0xff] }
0x1463   : > { %v2707_v57 = vsel %vm2704_vm10, %v2706_v38, %v2702_v56  ;;  %v2590_v42 = vmul.f32 %v5511_v55, %v2588_v50  ;;  %v2710_v58 = vpop.permute.xlu2 %2709  ;;  %vm2595_vm11 = vweird.f32 %v5511_v55  ;;  %v2770_v50 = vld [vmem:[%s7145_s18] sm:$0xff] }
0x1464   : > { %2730 = vmatpush.msra.mxu0 %v2710_v58  ;;  %v2708_v59 = vmul.f32 %v5505_v40, %v2707_v57  ;;  %vm2596_vm13 = vmor %vm2594_vm12, %vm2595_vm11 }
0x1465   : > { %v2591_v60 = vsub.f32 1.0, %v2590_v42 }
0x1466   : > { %5170 = vmatmul.msk.f32.vlgmr.msra.gmra.mxu0 %vm1023_vm7, %v2708_v59 }
0x1467   : > { %v2592_v62 = vmul.f32 %v5511_v55, %v2591_v60 }
0x1469   : > { %v2593_v63 = vadd.f32 %v5511_v55, %v2592_v62  ;;  %v5179_v62 = vld [vmem:[%s7265_s12 + $0x38] sm:$0xff] }
0x146a   : > { %2929 = vmatpush.msrb.mxu0 %v5179_v62 }
0x146b   : > { %v2597_v2 = vsel %vm2596_vm13, %v5511_v55, %v2593_v63  ;;  %v5178_v63 = vld [vmem:[%s7265_s12 + $0x30] sm:$0xff] }
0x146c   : > { %v2602_v3 = vsel %vm2599_vm14, %v2601_v1, %v2597_v2  ;;  %v5182_v1 = vld [vmem:[%s7266_s7 + $0x30] sm:$0xff]  ;;  %v5177_v2 = vld [vmem:[%s7265_s12 + $0x28] sm:$0xff]  ;;  %2930 = vmatpush.msrb.mxu0 %v5178_v63 }
0x146d   : > { %v2603_v4 = vmul.f32 %v5507_v46, %v2602_v3  ;;  %v5429_v46 = vld [vmem:[%s7275_s26] ss:$0 sm:$0xff]  ;;  %v5181_v3 = vld [vmem:[%s7266_s7 + $0x28] sm:$0xff]  ;;  %s7289_s7 = scalar_lea.vmem [#allocation5], %s6289_s1 }
0x146e   : > { %2931 = vmatpush.msrb.mxu0 %v5177_v2 }
0x146f   : > { %5165 = vmatmul.msk.f32.vlgmr.msrb.gmra.mxu1 %vm1023_vm7, %v2603_v4  ;;  %v5176_v4 = vld [vmem:[%s7265_s12 + $0x20] sm:$0xff] }
0x1470   : > { %2949 = vmatpush.msrb.mxu1 %v5183_v43  ;;  %2932 = vmatpush.msrb.mxu0 %v5176_v4 }
0x1472   : > { %2950 = vmatpush.msrb.mxu1 %v5182_v1 }
0x1474   : > { %2951 = vmatpush.msrb.mxu1 %v5181_v3 }
0x1476   : > { %2952 = vmatpush.msrb.mxu1 %v5180_v5 }
0x14e3   : > { %v2732_v7 = vpop.f32.mrf.mxu0 }
0x14e4   : > { %5172 = vmatmul.msk.f32.vlgmr.msra.gmra.mxu1 %vm996_vm5, %v2732_v7 }
0x14ec   : > { %v2627_v9 = vpop.f32.mrf.mxu1 }
0x14ed   : > { %5167 = vmatmul.msk.f32.vlgmr.msrb.gmra.mxu3 %vm996_vm5, %v2627_v9 }
0x1561   : > { %v2758_v13 = vpop.f32.mrf.mxu1 }
0x1570   : > { %v2653_v10 = vpop.f32.mrf.mxu3 }
0x1571   : > { %v2656_v12 = vadd.f32 %v2653_v10, %v6642_v28 }
0x1573   : > { %v2761_v14 = vadd.f32 %v2758_v13, %v2656_v12 }
0x1575   : > { %v2762_v15 = vadd.f32 %v2761_v14, %v6506_v11  ;;  %v2777_v11 = vld [vmem:[%s7145_s18 + $0x38] sm:$0xff] }
0x1576   : > { %2848 = vmatpush.msra.mxu2 %v2777_v11 }
0x1577   : > { %v2779_v16 = vsel %vm915_vm0, %v2762_v15, 0.0 }
0x1578   : > { %2780 = vadd.xlane.f32.xlu1 %v2779_v16  ;;  %2849 = vmatpush.msra.mxu2 %v2776_v22  ;;  %v6754_v22 = vld [vmem:[%s7280_s15] sm:$0xff]  ;;  %s7288_s15 = smov 100  }
0x157a   : > { %2850 = vmatpush.msra.mxu2 %v2775_v36 }
0x157c   : > { %2851 = vmatpush.msra.mxu2 %v2774_v29 }
0x157e   : > { %2852 = vmatpush.msra.mxu2 %v2773_v31 }
0x1580   : > { %2853 = vmatpush.msra.mxu2 %v2772_v48 }
0x1582   : > { %2854 = vmatpush.msra.mxu2 %v2771_v49 }
0x1584   : > { %2855 = vmatpush.msra.mxu2 %v2770_v50 }
0x15eb   : > { %v2781_v17 = vpop.xlane.xlu1 %2780 }
0x15ec   : > { %v2782_v18 = vmul.f32 %v2781_v17, %v6325_v8  ;;  %v5432_v17 = vld [vmem:[%s7267_s23 + $0x1] ss:$0 sm:$0xff]  ;;  %s4864_s23 = scalar_lea.sflag [#allocation4], %s6286_s17 }
0x15ee   : > { %v2783_v19 = vsub.f32 %v2762_v15, %v2782_v18 }
0x15f0   : > { %v2784_v0 = vmul.f32 %v2783_v19, %v2783_v19 }
0x15f2   : > { %v2785_v21 = vsel %vm915_vm0, %v2784_v0, 0.0  ;;  %v5433_v0 = vld [vmem:[#allocation10 + $0x1] ss:$0 sm:$0xff] }
0x15f3   : > { %2786 = vadd.xlane.f32.xlu1 %v2785_v21 }
0x1666   : > { %v2787_v26 = vpop.xlane.xlu1 %2786 }
0x1667   : > { %v2788_v28 = vmul.f32 %v2787_v26, %v6325_v8 }
0x1669   : > { %v2789_v30 = vadd.f32 1e-06, %v2788_v28 }
0x166b   : > { %5512 = vrsqrt.f32 %v2789_v30  ;;  %vm2796_vm1 = vweird.f32 %v2789_v30 }
0x1671   : > { %v5513_v32 = vpop.eup %5512 }
0x1672   : > { %v2791_v33 = vmul.f32 %v5513_v32, %v2789_v30  ;;  %vm2797_vm15 = vweird.f32 %v5513_v32 }
0x1673   : > { %vm2798_vm2 = vmor %vm2796_vm1, %vm2797_vm15 }
0x1674   : > { %v2792_v35 = vmul.f32 %v5513_v32, %v2791_v33 }
0x1676   : > { %v2793_v39 = vmul.f32 0.5, %v2792_v35 }
0x1678   : > { %v2794_v34 = vsub.f32 1.5, %v2793_v39 }
0x167a   : > { %v2795_v40 = vmul.f32 %v5513_v32, %v2794_v34 }
0x167c   : > { %v2799_v45 = vsel %vm2798_vm2, %v5513_v32, %v2795_v40  ;;  %v5184_v40 = vld [vmem:[%s7268_s8 + $0x20] sm:$0xff] }
0x167d   : > { %v2800_v44 = vmul.f32 %v2799_v45, %v2783_v19  ;;  %v3112_v45 = vrot.slane %v5184_v40, 4 }
0x167f   : > { %v2804_v27 = vmul.f32 %v5428_v41, %v2800_v44  ;;  %5196 = vmatpush.msk.msrb.mxu2 %vm1157_vm6, %v3112_v45 }
0x1681   : > { %v2808_v47 = vadd.f32 %v5429_v46, %v2804_v27 }
0x1683   : > { %5173 = vmatmul.msk.f32.vlgmr.msra.gmra.mxu3 %vm915_vm0, %v2808_v47 }
0x1706   : > { %v2832_v51 = vpop.f32.mrf.mxu3 }
0x1707   : > { %v2833_v52 = vadd.f32 %v5430_v37, %v2832_v51 }
0x1709   : > { %v2835_v53 = vmax.f32 %v2833_v52, 0.0 }
0x170b   : > { %5174 = vmatmul.msk.f32.vlgmr.msra.gmra.mxu2 %vm2836_vm3, %v2835_v53 }
0x178e   : > { %v2857_v38 = vpop.f32.mrf.mxu2 }
0x178f   : > { %v2860_v55 = vadd.f32 %v2857_v38, %v2762_v15 }
0x1791   : > { %v6702_v56 = vadd.f32 %v5431_v54, %v2860_v55 }
0x1793   : > { %v2884_v57 = vsel %vm915_vm0, %v6702_v56, 0.0 }
0x1794   : > { %2885 = vadd.xlane.f32.xlu0 %v2884_v57 }
0x1807   : > { %v2886_v42 = vpop.xlane.xlu0 %2885 }
0x1808   : > { %v2887_v58 = vmul.f32 %v2886_v42, %v6325_v8 }
0x180a   : > { %v2888_v59 = vsub.f32 %v6702_v56, %v2887_v58 }
0x180c   : > { %v2889_v60 = vmul.f32 %v2888_v59, %v2888_v59 }
0x180e   : > { %v2890_v61 = vsel %vm915_vm0, %v2889_v60, 0.0 }
0x180f   : > { %2891 = vadd.xlane.f32.xlu1 %v2890_v61 }
0x1882   : > { %v2892_v6 = vpop.xlane.xlu1 %2891 }
0x1883   : > { %v2893_v7 = vmul.f32 %v2892_v6, %v6325_v8 }
0x1885   : > { %v2894_v9 = vadd.f32 1e-06, %v2893_v7 }
0x1887   : > { %5514 = vrsqrt.f32 %v2894_v9  ;;  %vm2901_vm8 = vweird.f32 %v2894_v9 }
0x188d   : > { %v5515_v10 = vpop.eup %5514 }
0x188e   : > { %v2896_v12 = vmul.f32 %v5515_v10, %v2894_v9  ;;  %vm2902_vm4 = vweird.f32 %v5515_v10 }
0x188f   : > { %vm2903_vm9 = vmor %vm2901_vm8, %vm2902_vm4 }
0x1890   : > { %v2897_v13 = vmul.f32 %v5515_v10, %v2896_v12 }
0x1892   : > { %v2898_v14 = vmul.f32 0.5, %v2897_v13 }
0x1894   : > { %v2899_v15 = vsub.f32 1.5, %v2898_v14 }
0x1896   : > { %v2900_v16 = vmul.f32 %v5515_v10, %v2899_v15 }
0x1898   : > { %v2904_v18 = vsel %vm2903_vm9, %v5515_v10, %v2900_v16 }
0x1899   : > { %v2905_v19 = vmul.f32 %v2904_v18, %v2888_v59 }
0x189b   : > { %v2909_v21 = vmul.f32 %v5432_v17, %v2905_v19  ;;  %v5185_v17 = vld [vmem:[%s7268_s8 + $0x28] sm:$0xff] }
0x189c   : > { %5203 = vmatpush.msk.msra.mxu2 %vm1157_vm6, %v5185_v17 }
0x189d   : > { %v2913_v23 = vadd.f32 %v5433_v0, %v2909_v21 }
0x189f   : > { %5188 = vmatmul.msk.f32.vlgmr.msrb.gmra.mxu0 %vm915_vm0, %v2913_v23  ;;  %5189 = vmatmul.msk.f32.vlgmr.msrb.gmra.mxu1 %vm915_vm0, %v2913_v23 }
0x191c   : > { %v6739_v24 = vpop.f32.mrf.mxu1  ;;  %v6745_v25 = vpop.f32.mrf.mxu0 }
0x191d   : > { %3035 = vrot.lane.b32.xlu0 %v6739_v24, %s7278_s25  ;;  %5190 = vmatpush.xpose.msk.msrb.mxu3 %vm996_vm5, %v6739_v24 }
0x1920   : > { %5191 = vmatmul.msk.f32.vlgmr.msrb.gmra.mxu3 %vm996_vm5, %v6745_v25 }
0x1925   : > { %3268 = vrot.lane.b32.xlu0 %v6745_v25, %s7279_s21 }
0x198f   : > { %v3036_v20 = vpop.permute.xlu0 %3035 }
0x1990   : > { %5193 = vmatpush.xpose.msk.msra.mxu1 %vm996_vm5, %v3036_v20 }
0x1997   : > { %v3269_v57 = vpop.permute.xlu0 %3268 }
0x19a3   : > { %v2980_v11 = vpop.f32.mrf.mxu3 }
0x19a4   : > { %v2981_v36 = vadd.f32 %v6754_v22, %v2980_v11 }
0x19a6   : > { %v2983_v26 = vsel %vm1023_vm7, %v2981_v36, -inf }
0x19a7   : > { %2984 = vmax.xlane.f32.xlu2 %v2983_v26 }
0x19bf   : > { %3165 = vrot.lane.b32.xlu2 %v6739_v24, %s7281_s22 }
0x1a1a   : > { %v2985_v28 = vpop.xlane.xlu2 %2984 }
0x1a1b   : > { %v2986_v29 = vsub.f32 %v2981_v36, %v2985_v28 }
0x1a1d   : > { %v2987_v30 = vmul.f32 1.442695, %v2986_v29 }
0x1a1f   : > { %5516 = vpow2.f32 %v2987_v30 }
0x1a22   : > { %v3166_v31 = vpop.permute.xlu2 %3165 }
0x1a23   : > { %5200 = vmatpush.xpose.msk.msrb.mxu1 %vm996_vm5, %v3166_v31 }
0x1a25   : > { %v5517_v32 = vpop.eup %5516 }
0x1a26   : > { %v2989_v33 = vsel %vm1023_vm7, %v5517_v32, 0.0 }
0x1a27   : > { %2990 = vadd.xlane.f32.xlu1 %v2989_v33 }
0x1a40   : > { %3007 = vrot.lane.b32.xlu1 %v6739_v24, %s7282_s27 }
0x1a48   : > { %3033 = vrot.lane.b32.xlu1 %v6745_v25, %s7278_s25 }
0x1a50   : > { %3163 = vrot.lane.b32.xlu1 %v6745_v25, %s7281_s22 }
0x1a58   : > { %3270 = vrot.lane.b32.xlu1 %v6739_v24, %s7279_s21 }
0x1a9a   : > { %v2991_v35 = vpop.xlane.xlu1 %2990 }
0x1a9b   : > { %5518 = vrcp.f32 %v2991_v35  ;;  %v3003_v27 = vand.u32 2147483648, %v2991_v35  ;;  %vm2997_vm11 = vweird.f32 %v2991_v35  ;;  %v3001_v47 = vand.u32 2147483647, %v2991_v35 }
0x1a9d   : > { %v3004_v49 = vor.u32 1.1754944e-38, %v3003_v27  ;;  %vm3002_vm13 = vcmp.eq.f32.partialorder %v3001_v47, 8.507059e+37  ;;  %v3346_v27 = vrot.slane %v5185_v17, 4 }
0x1aa1   : > { %v5519_v39 = vpop.eup %5518 }
0x1aa2   : > { %v2993_v34 = vmul.f32 %v5519_v39, %v2991_v35  ;;  %vm2998_vm10 = vweird.f32 %v5519_v39 }
0x1aa3   : > { %vm2999_vm12 = vmor %vm2997_vm11, %vm2998_vm10 }
0x1aa4   : > { %v2994_v41 = vsub.f32 1.0, %v2993_v34 }
0x1aa6   : > { %v2995_v44 = vmul.f32 %v5519_v39, %v2994_v41 }
0x1aa8   : > { %v2996_v46 = vadd.f32 %v5519_v39, %v2995_v44 }
0x1aaa   : > { %v3000_v48 = vsel %vm2999_vm12, %v5519_v39, %v2996_v46 }
0x1aab   : > { %v3005_v50 = vsel %vm3002_vm13, %v3004_v49, %v3000_v48 }
0x1aac   : > { %v3006_v51 = vmul.f32 %v5517_v32, %v3005_v50 }
0x1ab2   : > { %v3008_v37 = vpop.permute.xlu1 %3007 }
0x1ab3   : > { %3028 = vmatpush.msra.mxu0 %v3008_v37 }
0x1ab4   : > { %5192 = vmatmul.msk.f32.vlgmr.msra.gmra.mxu0 %vm1023_vm7, %v3006_v51 }
0x1ab5   : > { %5198 = vmatpush.msk.msrb.mxu0 %vm1157_vm6, %v5184_v40 }
0x1aba   : > { %v3034_v52 = vpop.permute.xlu1 %3033 }
0x1abb   : > { %5194 = vmatmul.msk.f32.vlgmr.msra.gmra.mxu1 %vm996_vm5, %v3034_v52 }
0x1ac2   : > { %v3164_v53 = vpop.permute.xlu1 %3163 }
0x1ac3   : > { %5201 = vmatmul.msk.f32.vlgmr.msrb.gmra.mxu1 %vm996_vm5, %v3164_v53 }
0x1aca   : > { %v3271_v54 = vpop.permute.xlu1 %3270 }
0x1acb   : > { %5205 = vmatpush.xpose.msk.msra.mxu0 %vm996_vm5, %v3271_v54 }
0x1b31   : > { %v3030_v38 = vpop.f32.mrf.mxu0 }
0x1b32   : > { %5199 = vmatmul.msk.f32.vlgmr.msrb.gmra.mxu0 %vm996_vm5, %v3030_v38 }
0x1b38   : > { %v3058_v55 = vpop.f32.mrf.mxu1 }
0x1b39   : > { %v3059_v42 = vadd.f32 %v6754_v22, %v3058_v55 }
0x1b3a   : > { %5206 = vmatmul.msk.f32.vlgmr.msra.gmra.mxu0 %vm996_vm5, %v3269_v57 }
0x1b3b   : > { %v3061_v58 = vsel %vm1023_vm7, %v3059_v42, -inf }
0x1b3c   : > { %3062 = vmax.xlane.f32.xlu1 %v3061_v58 }
0x1b40   : > { %v3188_v59 = vpop.f32.mrf.mxu1 }
0x1b41   : > { %v3189_v60 = vadd.f32 %v6754_v22, %v3188_v59 }
0x1b43   : > { %v3191_v61 = vsel %vm1023_vm7, %v3189_v60, -inf }
0x1b44   : > { %3192 = vmax.xlane.f32.xlu0 %v3191_v61 }
0x1baf   : > { %v6785_v62 = vpop.f32.mrf.mxu0  ;;  %v3063_v43 = vpop.xlane.xlu1 %3062 }
0x1bb0   : > { %v3064_v63 = vsub.f32 %v3059_v42, %v3063_v43 }
0x1bb2   : > { %v3065_v1 = vmul.f32 1.442695, %v3064_v63 }
0x1bb4   : > { %5520 = vpow2.f32 %v3065_v1 }
0x1bb7   : > { %v3293_v2 = vpop.f32.mrf.mxu0  ;;  %v3193_v3 = vpop.xlane.xlu0 %3192 }
0x1bb8   : > { %v3294_v4 = vadd.f32 %v6754_v22, %v3293_v2  ;;  %v3194_v5 = vsub.f32 %v3189_v60, %v3193_v3 }
0x1bba   : > { %v5521_v6 = vpop.eup %5520  ;;  %v3195_v7 = vmul.f32 1.442695, %v3194_v5  ;;  %v3296_v9 = vsel %vm1023_vm7, %v3294_v4, -inf }
0x1bbb   : > { %3297 = vmax.xlane.f32.xlu2 %v3296_v9  ;;  %v3067_v10 = vsel %vm1023_vm7, %v5521_v6, 0.0 }
0x1bbc   : > { %5522 = vpow2.f32 %v3195_v7  ;;  %3068 = vadd.xlane.f32.xlu1 %v3067_v10 }
0x1bc2   : > { %v5523_v12 = vpop.eup %5522 }
0x1bc3   : > { %v3197_v13 = vsel %vm1023_vm7, %v5523_v12, 0.0 }
0x1bc4   : > { %3198 = vadd.xlane.f32.xlu0 %v3197_v13 }
0x1bd5   : > { %3085 = vrot.lane.b32.xlu1 %v6739_v24, %s7269_s13 }
0x1bd8   : > { %3215 = vrot.lane.b32.xlu0 %v6739_v24, %s7283_s16 }
0x1bdd   : > { %3480 = vrot.lane.b32.xlu1 %v6739_v24, %s7284_s29 }
0x1be0   : > { %3375 = vrot.lane.b32.xlu0 %v6739_v24, %s7270_s3 }
0x1be8   : > { %3478 = vrot.lane.b32.xlu0 %v6745_v25, %s7284_s29 }
0x1c2e   : > { %v3298_v14 = vpop.xlane.xlu2 %3297 }
0x1c2f   : > { %v3299_v15 = vsub.f32 %v3294_v4, %v3298_v14  ;;  %v3069_v16 = vpop.xlane.xlu1 %3068 }
0x1c30   : > { %5524 = vrcp.f32 %v3069_v16  ;;  %v3081_v29 = vand.u32 2147483648, %v3069_v16  ;;  %vm3075_vm15 = vweird.f32 %v3069_v16  ;;  %v3079_v30 = vand.u32 2147483647, %v3069_v16 }
0x1c31   : > { %v3300_v18 = vmul.f32 1.442695, %v3299_v15 }
0x1c32   : > { %v3082_v35 = vor.u32 1.1754944e-38, %v3081_v29  ;;  %vm3080_vm2 = vcmp.eq.f32.partialorder %v3079_v30, 8.507059e+37 }
0x1c33   : > { %5526 = vpow2.f32 %v3300_v18 }
0x1c36   : > { %v5525_v19 = vpop.eup %5524 }
0x1c37   : > { %v3071_v0 = vmul.f32 %v5525_v19, %v3069_v16  ;;  %v3199_v21 = vpop.xlane.xlu0 %3198  ;;  %vm3076_vm14 = vweird.f32 %v5525_v19 }
0x1c38   : > { %5528 = vrcp.f32 %v3199_v21  ;;  %vm3077_vm1 = vmor %vm3075_vm15, %vm3076_vm14  ;;  %v3211_v41 = vand.u32 2147483648, %v3199_v21  ;;  %vm3205_vm8 = vweird.f32 %v3199_v21  ;;  %v3209_v45 = vand.u32 2147483647, %v3199_v21 }
0x1c39   : > { %v5527_v23 = vpop.eup %5526  ;;  %v3072_v20 = vsub.f32 1.0, %v3071_v0 }
0x1c3a   : > { %v3302_v11 = vsel %vm1023_vm7, %v5527_v23, 0.0  ;;  %v3212_v48 = vor.u32 1.1754944e-38, %v3211_v41  ;;  %vm3210_vm10 = vcmp.eq.f32.partialorder %v3209_v45, 8.507059e+37 }
0x1c3b   : > { %v3073_v36 = vmul.f32 %v5525_v19, %v3072_v20  ;;  %3303 = vadd.xlane.f32.xlu2 %v3302_v11 }
0x1c3d   : > { %v3074_v26 = vadd.f32 %v5525_v19, %v3073_v36 }
0x1c3e   : > { %v5529_v28 = vpop.eup %5528 }
0x1c3f   : > { %v3201_v31 = vmul.f32 %v5529_v28, %v3199_v21  ;;  %v3078_v32 = vsel %vm3077_vm1, %v5525_v19, %v3074_v26  ;;  %vm3206_vm4 = vweird.f32 %v5529_v28 }
0x1c40   : > { %v3083_v34 = vsel %vm3080_vm2, %v3082_v35, %v3078_v32  ;;  %vm3207_vm9 = vmor %vm3205_vm8, %vm3206_vm4  ;;  %v5186_v32 = vld [vmem:[%s7268_s8 + $0x30] sm:$0xff] }
0x1c41   : > { %v3202_v33 = vsub.f32 1.0, %v3201_v31  ;;  %v3084_v46 = vmul.f32 %v5521_v6, %v3083_v34 }
0x1c43   : > { %v3203_v39 = vmul.f32 %v5529_v28, %v3202_v33  ;;  %v3556_v33 = vrot.slane %v5186_v32, 4 }
0x1c45   : > { %v3204_v40 = vadd.f32 %v5529_v28, %v3203_v39 }
0x1c47   : > { %v3086_v44 = vpop.permute.xlu1 %3085  ;;  %v3208_v47 = vsel %vm3207_vm9, %v5529_v28, %v3204_v40 }
0x1c48   : > { %3106 = vmatpush.msra.mxu3 %v3086_v44  ;;  %v3213_v50 = vsel %vm3210_vm10, %v3212_v48, %v3208_v47 }
0x1c49   : > { %5195 = vmatmul.msk.f32.vlgmr.msra.gmra.mxu3 %vm1023_vm7, %v3084_v46  ;;  %v3214_v51 = vmul.f32 %v5523_v12, %v3213_v50 }
0x1c4a   : > { %v3216_v49 = vpop.permute.xlu0 %3215 }
0x1c4b   : > { %3236 = vmatpush.msrb.mxu3 %v3216_v49 }
0x1c4d   : > { %5208 = vmatpush.msk.msra.mxu3 %vm1157_vm6, %v3346_v27 }
0x1c4f   : > { %v3481_v37 = vpop.permute.xlu1 %3480 }
0x1c51   : > { %5202 = vmatmul.msk.f32.vlgmr.msrb.gmra.mxu3 %vm1023_vm7, %v3214_v51 }
0x1c52   : > { %5215 = vmatpush.xpose.msk.msrb.mxu3 %vm996_vm5, %v3481_v37  ;;  %v3376_v2 = vpop.permute.xlu0 %3375 }
0x1c53   : > { %3320 = vrot.lane.b32.xlu2 %v6739_v24, %s7285_s4 }
0x1c5a   : > { %v3479_v6 = vpop.permute.xlu0 %3478 }
0x1c5b   : > { %3373 = vrot.lane.b32.xlu2 %v6745_v25, %s7270_s3 }
0x1cae   : > { %v3304_v52 = vpop.xlane.xlu2 %3303 }
0x1caf   : > { %5530 = vrcp.f32 %v3304_v52  ;;  %v3316_v57 = vand.u32 2147483648, %v3304_v52  ;;  %v3314_v58 = vand.u32 2147483647, %v3304_v52  ;;  %vm3310_vm12 = vweird.f32 %v3304_v52 }
0x1cb1   : > { %v3317_v60 = vor.u32 1.1754944e-38, %v3316_v57  ;;  %vm3315_vm14 = vcmp.eq.f32.partialorder %v3314_v58, 8.507059e+37 }
0x1cb5   : > { %v5531_v53 = vpop.eup %5530 }
0x1cb6   : > { %v3306_v54 = vmul.f32 %v5531_v53, %v3304_v52  ;;  %v3321_v38 = vpop.permute.xlu2 %3320  ;;  %vm3311_vm11 = vweird.f32 %v5531_v53 }
0x1cb7   : > { %3341 = vmatpush.msra.mxu1 %v3321_v38  ;;  %vm3312_vm13 = vmor %vm3310_vm12, %vm3311_vm11 }
0x1cb8   : > { %v3307_v55 = vsub.f32 1.0, %v3306_v54 }
0x1cb9   : > { %5213 = vmatpush.msk.msrb.mxu1 %vm1157_vm6, %v5186_v32 }
0x1cba   : > { %v3308_v42 = vmul.f32 %v5531_v53, %v3307_v55 }
0x1cbc   : > { %v3309_v59 = vadd.f32 %v5531_v53, %v3308_v42 }
0x1cbe   : > { %v3313_v61 = vsel %vm3312_vm13, %v5531_v53, %v3309_v59  ;;  %v3374_v4 = vpop.permute.xlu2 %3373 }
0x1cbf   : > { %v3318_v43 = vsel %vm3315_vm14, %v3317_v60, %v3313_v61 }
0x1cc0   : > { %v3319_v63 = vmul.f32 %v5527_v23, %v3318_v43 }
0x1cc2   : > { %5207 = vmatmul.msk.f32.vlgmr.msra.gmra.mxu1 %vm1023_vm7, %v3319_v63 }
0x1ccc   : > { %v3108_v1 = vpop.f32.mrf.mxu3 }
0x1ccd   : > { %5197 = vmatmul.msk.f32.vlgmr.msrb.gmra.mxu2 %vm996_vm5, %v3108_v1 }
0x1cce   : > { %5210 = vmatpush.xpose.msk.msrb.mxu2 %vm996_vm5, %v3376_v2 }
0x1cd4   : > { %v3238_v3 = vpop.f32.mrf.mxu3 }
0x1cd5   : > { %5204 = vmatmul.msk.f32.vlgmr.msra.gmra.mxu2 %vm996_vm5, %v3238_v3 }
0x1cdd   : > { %5211 = vmatmul.msk.f32.vlgmr.msrb.gmra.mxu2 %vm996_vm5, %v3374_v4 }
0x1d3f   : > { %v3343_v5 = vpop.f32.mrf.mxu1 }
0x1d40   : > { %5209 = vmatmul.msk.f32.vlgmr.msra.gmra.mxu3 %vm996_vm5, %v3343_v5 }
0x1d48   : > { %5216 = vmatmul.msk.f32.vlgmr.msrb.gmra.mxu3 %vm996_vm5, %v3479_v6 }
0x1d50   : > { %v3135_v7 = vpop.f32.mrf.mxu2 }
0x1d51   : > { %v3161_v9 = vadd.f32 %v6785_v62, %v3135_v7 }
0x1d58   : > { %v3264_v10 = vpop.f32.mrf.mxu2 }
0x1d59   : > { %v3267_v12 = vadd.f32 %v3264_v10, %v3161_v9 }
0x1d60   : > { %v3398_v13 = vpop.f32.mrf.mxu2 }
0x1d61   : > { %v3399_v14 = vadd.f32 %v6754_v22, %v3398_v13 }
0x1d63   : > { %v3401_v15 = vsel %vm1023_vm7, %v3399_v14, -inf }
0x1d64   : > { %3402 = vmax.xlane.f32.xlu1 %v3401_v15 }
0x1dc3   : > { %v3369_v16 = vpop.f32.mrf.mxu3 }
0x1dc4   : > { %v6824_v17 = vadd.f32 %v3369_v16, %v3267_v12 }
0x1dcb   : > { %v3503_v18 = vpop.f32.mrf.mxu3 }
0x1dcc   : > { %v3504_v19 = vadd.f32 %v6754_v22, %v3503_v18 }
0x1dce   : > { %v3506_v0 = vsel %vm1023_vm7, %v3504_v19, -inf }
0x1dcf   : > { %3507 = vmax.xlane.f32.xlu2 %v3506_v0 }
0x1dd7   : > { %v3403_v21 = vpop.xlane.xlu1 %3402 }
0x1dd8   : > { %v3404_v23 = vsub.f32 %v3399_v14, %v3403_v21 }
0x1dda   : > { %v3405_v62 = vmul.f32 1.442695, %v3404_v23 }
0x1ddc   : > { %5532 = vpow2.f32 %v3405_v62 }
0x1de2   : > { %v5533_v20 = vpop.eup %5532 }
0x1de3   : > { %v3407_v11 = vsel %vm1023_vm7, %v5533_v20, 0.0 }
0x1de4   : > { %3408 = vadd.xlane.f32.xlu0 %v3407_v11 }
0x1de7   : > { %3425 = vrot.lane.b32.xlu2 %v6739_v24, %s7286_s24 }
0x1def   : > { %3583 = vrot.lane.b32.xlu2 %v6745_v25, %s7271_s6 }
0x1df8   : > { %3530 = vrot.lane.b32.xlu0 %v6739_v24, %s7287_s19 }
0x1e00   : > { %3690 = vrot.lane.b32.xlu0 %v6739_v24, %s7288_s15 }
0x1e42   : > { %v3508_v36 = vpop.xlane.xlu2 %3507 }
0x1e43   : > { %v3509_v26 = vsub.f32 %v3504_v19, %v3508_v36 }
0x1e45   : > { %v3510_v28 = vmul.f32 1.442695, %v3509_v26 }
0x1e47   : > { %5534 = vpow2.f32 %v3510_v28 }
0x1e4a   : > { %v3426_v29 = vpop.permute.xlu2 %3425 }
0x1e4b   : > { %3446 = vmatpush.msrb.mxu0 %v3426_v29 }
0x1e4d   : > { %v5535_v30 = vpop.eup %5534  ;;  %5218 = vmatpush.msk.msra.mxu0 %vm1157_vm6, %v3556_v33 }
0x1e4e   : > { %v3512_v31 = vsel %vm1023_vm7, %v5535_v30, 0.0 }
0x1e4f   : > { %3513 = vadd.xlane.f32.xlu1 %v3512_v31 }
0x1e52   : > { %v3584_v63 = vpop.permute.xlu2 %3583 }
0x1e57   : > { %v3409_v35 = vpop.xlane.xlu0 %3408 }
0x1e58   : > { %5536 = vrcp.f32 %v3409_v35  ;;  %v3421_v41 = vand.u32 2147483648, %v3409_v35  ;;  %v3419_v44 = vand.u32 2147483647, %v3409_v35  ;;  %vm3415_vm1 = vweird.f32 %v3409_v35 }
0x1e5a   : > { %v3422_v27 = vor.u32 1.1754944e-38, %v3421_v41  ;;  %vm3420_vm4 = vcmp.eq.f32.partialorder %v3419_v44, 8.507059e+37  ;;  %v5187_v41 = vld [vmem:[%s7268_s8 + $0x38] sm:$0xff]  ;;  %s7290_s8 = scalar_lea.vmem [#allocation8], %s6289_s1 }
0x1e5b   : > { %v3766_v44 = vrot.slane %v5187_v41, 4 }
0x1e5e   : > { %v5537_v39 = vpop.eup %5536 }
0x1e5f   : > { %v3411_v34 = vmul.f32 %v5537_v39, %v3409_v35  ;;  %vm3416_vm15 = vweird.f32 %v5537_v39 }
0x1e60   : > { %vm3417_vm2 = vmor %vm3415_vm1, %vm3416_vm15 }
0x1e61   : > { %v3412_v40 = vsub.f32 1.0, %v3411_v34 }
0x1e63   : > { %v3413_v45 = vmul.f32 %v5537_v39, %v3412_v40 }
0x1e65   : > { %v3414_v46 = vadd.f32 %v5537_v39, %v3413_v45 }
0x1e67   : > { %v3418_v47 = vsel %vm3417_vm2, %v5537_v39, %v3414_v46 }
0x1e68   : > { %v3423_v48 = vsel %vm3420_vm4, %v3422_v27, %v3418_v47  ;;  %3585 = vrot.lane.b32.xlu1 %v6739_v24, %s7271_s6 }
0x1e69   : > { %v3424_v49 = vmul.f32 %v5533_v20, %v3423_v48 }
0x1e6a   : > { %v3531_v50 = vpop.permute.xlu0 %3530 }
0x1e6b   : > { %5212 = vmatmul.msk.f32.vlgmr.msrb.gmra.mxu0 %vm1023_vm7, %v3424_v49  ;;  %3551 = vmatpush.msra.mxu2 %v3531_v50 }
0x1e6d   : > { %5223 = vmatpush.msk.msrb.mxu2 %vm1157_vm6, %v5187_v41  ;;  %v3809_v41 = vld [vmem:[#allocation14 + $0x20] sm:$0xff] }
0x1e70   : > { %3688 = vrot.lane.b32.xlu1 %v6745_v25, %s7288_s15 }
0x1e72   : > { %v3691_v37 = vpop.permute.xlu0 %3690 }
0x1e73   : > { %5225 = vmatpush.xpose.msk.msrb.mxu0 %vm996_vm5, %v3691_v37 }
0x1ec2   : > { %v3514_v51 = vpop.xlane.xlu1 %3513 }
0x1ec3   : > { %5538 = vrcp.f32 %v3514_v51  ;;  %v3526_v38 = vand.u32 2147483648, %v3514_v51  ;;  %v3524_v57 = vand.u32 2147483647, %v3514_v51  ;;  %vm3520_vm9 = vweird.f32 %v3514_v51 }
0x1ec5   : > { %v3527_v58 = vor.u32 1.1754944e-38, %v3526_v38  ;;  %vm3525_vm11 = vcmp.eq.f32.partialorder %v3524_v57, 8.507059e+37 }
0x1ec9   : > { %v5539_v52 = vpop.eup %5538 }
0x1eca   : > { %v3516_v53 = vmul.f32 %v5539_v52, %v3514_v51  ;;  %vm3521_vm8 = vweird.f32 %v5539_v52 }
0x1ecb   : > { %vm3522_vm10 = vmor %vm3520_vm9, %vm3521_vm8 }
0x1ecc   : > { %v3517_v54 = vsub.f32 1.0, %v3516_v53 }
0x1ece   : > { %v3518_v55 = vmul.f32 %v5539_v52, %v3517_v54 }
0x1ed0   : > { %v3519_v42 = vadd.f32 %v5539_v52, %v3518_v55 }
0x1ed2   : > { %v3523_v59 = vsel %vm3522_vm10, %v5539_v52, %v3519_v42 }
0x1ed3   : > { %v3528_v60 = vsel %vm3525_vm11, %v3527_v58, %v3523_v59 }
0x1ed4   : > { %v3529_v25 = vmul.f32 %v5535_v30, %v3528_v60 }
0x1ed6   : > { %5217 = vmatmul.msk.f32.vlgmr.msra.gmra.mxu2 %vm1023_vm7, %v3529_v25 }
0x1eda   : > { %v3586_v61 = vpop.permute.xlu1 %3585 }
0x1edb   : > { %5220 = vmatpush.xpose.msk.msra.mxu1 %vm996_vm5, %v3586_v61 }
0x1ee2   : > { %v3689_v2 = vpop.permute.xlu1 %3688 }
0x1ee8   : > { %v3448_v43 = vpop.f32.mrf.mxu0 }
0x1ee9   : > { %5214 = vmatmul.msk.f32.vlgmr.msrb.gmra.mxu1 %vm996_vm5, %v3448_v43 }
0x1ef1   : > { %5221 = vmatmul.msk.f32.vlgmr.msra.gmra.mxu1 %vm996_vm5, %v3584_v63 }
0x1f59   : > { %v3553_v1 = vpop.f32.mrf.mxu2 }
0x1f5a   : > { %5219 = vmatmul.msk.f32.vlgmr.msra.gmra.mxu0 %vm996_vm5, %v3553_v1 }
0x1f62   : > { %5226 = vmatmul.msk.f32.vlgmr.msrb.gmra.mxu0 %vm996_vm5, %v3689_v2  ;;  %v3807_v2 = vld [vmem:[#allocation13 + $0x38] sm:$0xff] }
0x1f63   : > { %3878 = vmatpush.msra.mxu0 %v3807_v2 }
0x1f66   : > { %v3474_v3 = vpop.f32.mrf.mxu1 }
0x1f67   : > { %v3477_v4 = vadd.f32 %v3474_v3, %v6824_v17  ;;  %v3802_v3 = vld [vmem:[#allocation11 + $0x38] sm:$0xff] }
0x1f68   : > { %3858 = vmatpush.msra.mxu2 %v3802_v3 }
0x1f6e   : > { %v3608_v5 = vpop.f32.mrf.mxu1 }
0x1f6f   : > { %v3609_v6 = vadd.f32 %v6754_v22, %v3608_v5  ;;  %v3805_v5 = vld [vmem:[#allocation13 + $0x28] sm:$0xff] }
0x1f71   : > { %v3611_v7 = vsel %vm1023_vm7, %v3609_v6, -inf }
0x1f72   : > { %3612 = vmax.xlane.f32.xlu2 %v3611_v7  ;;  %v3804_v7 = vld [vmem:[#allocation13 + $0x20] sm:$0xff] }
0x1fd7   : > { %v3579_v9 = vpop.f32.mrf.mxu0 }
0x1fd8   : > { %v6858_v10 = vadd.f32 %v3579_v9, %v3477_v4  ;;  %v3806_v4 = vld [vmem:[#allocation13 + $0x30] sm:$0xff]  ;;  %v3799_v9 = vld [vmem:[#allocation11 + $0x20] sm:$0xff] }
0x1fd9   : > { %3879 = vmatpush.msra.mxu0 %v3806_v4 }
0x1fdb   : > { %3880 = vmatpush.msra.mxu0 %v3805_v5 }
0x1fdd   : > { %3881 = vmatpush.msra.mxu0 %v3804_v7 }
0x1fdf   : > { %v3713_v12 = vpop.f32.mrf.mxu0 }
0x1fe0   : > { %v3714_v13 = vadd.f32 %v6754_v22, %v3713_v12 }
0x1fe2   : > { %v3716_v14 = vsel %vm1023_vm7, %v3714_v13, -inf }
0x1fe3   : > { %3717 = vmax.xlane.f32.xlu0 %v3716_v14 }
0x1fe5   : > { %v3613_v15 = vpop.xlane.xlu2 %3612 }
0x1fe6   : > { %v3614_v16 = vsub.f32 %v3609_v6, %v3613_v15  ;;  %v3800_v6 = vld [vmem:[#allocation11 + $0x28] sm:$0xff] }
0x1fe8   : > { %v3615_v18 = vmul.f32 1.442695, %v3614_v16 }
0x1fea   : > { %5540 = vpow2.f32 %v3615_v18 }
0x1ff0   : > { %v5541_v17 = vpop.eup %5540 }
0x1ff1   : > { %v3617_v19 = vsel %vm1023_vm7, %v5541_v17, 0.0 }
0x1ff2   : > { %3618 = vadd.xlane.f32.xlu1 %v3617_v19 }
0x1ff7   : > { %3635 = vrot.lane.b32.xlu0 %v6739_v24, %s7272_s0 }
0x2056   : > { %v3718_v0 = vpop.xlane.xlu0 %3717 }
0x2057   : > { %v3719_v21 = vsub.f32 %v3714_v13, %v3718_v0 }
0x2059   : > { %v3720_v23 = vmul.f32 1.442695, %v3719_v21  ;;  %v5434_v21 = vld [vmem:[%s7136_s9 + $0x1] ss:$0 sm:$0xff] }
0x205b   : > { %5542 = vpow2.f32 %v3720_v23 }
0x2061   : > { %v5543_v62 = vpop.eup %5542 }
0x2062   : > { %v3722_v22 = vsel %vm1023_vm7, %v5543_v62, 0.0 }
0x2063   : > { %3723 = vadd.xlane.f32.xlu2 %v3722_v22  ;;  %v5435_v22 = vld [vmem:[%s7137_s10 + $0x1] ss:$0 sm:$0xff] }
0x2065   : > { %v3619_v20 = vpop.xlane.xlu1 %3618 }
0x2066   : > { %5544 = vrcp.f32 %v3619_v20  ;;  %v3631_v29 = vand.u32 2147483648, %v3619_v20  ;;  %v3629_v31 = vand.u32 2147483647, %v3619_v20  ;;  %vm3625_vm13 = vweird.f32 %v3619_v20 }
0x2068   : > { %v3632_v33 = vor.u32 1.1754944e-38, %v3631_v29  ;;  %vm3630_vm15 = vcmp.eq.f32.partialorder %v3629_v31, 8.507059e+37 }
0x2069   : > { %v3636_v11 = vpop.permute.xlu0 %3635 }
0x206a   : > { %3656 = vmatpush.msra.mxu3 %v3636_v11 }
0x206c   : > { %v5545_v36 = vpop.eup %5544  ;;  %5228 = vmatpush.msk.msrb.mxu3 %vm1157_vm6, %v3766_v44 }
0x206d   : > { %v3621_v26 = vmul.f32 %v5545_v36, %v3619_v20  ;;  %vm3626_vm12 = vweird.f32 %v5545_v36 }
0x206e   : > { %vm3627_vm14 = vmor %vm3625_vm13, %vm3626_vm12 }
0x206f   : > { %v3622_v28 = vsub.f32 1.0, %v3621_v26 }
0x2071   : > { %v3623_v30 = vmul.f32 %v5545_v36, %v3622_v28 }
0x2073   : > { %v3624_v32 = vadd.f32 %v5545_v36, %v3623_v30  ;;  %v6915_v30 = vld [vmem:[%s7290_s8] sm:$0xff] }
0x2075   : > { %v3628_v35 = vsel %vm3627_vm14, %v5545_v36, %v3624_v32 }
0x2076   : > { %v3633_v39 = vsel %vm3630_vm15, %v3632_v33, %v3628_v35 }
0x2077   : > { %v3634_v34 = vmul.f32 %v5541_v17, %v3633_v39 }
0x2079   : > { %5222 = vmatmul.msk.f32.vlgmr.msra.gmra.mxu3 %vm1023_vm7, %v3634_v34 }
0x207b   : > { %3740 = vrot.lane.b32.xlu2 %v6739_v24, %s7273_s14 }
0x20d6   : > { %v3724_v40 = vpop.xlane.xlu2 %3723 }
0x20d7   : > { %5546 = vrcp.f32 %v3724_v40  ;;  %v3736_v48 = vand.u32 2147483648, %v3724_v40  ;;  %v3734_v24 = vand.u32 2147483647, %v3724_v40  ;;  %vm3730_vm2 = vweird.f32 %v3724_v40 }
0x20d9   : > { %v3737_v37 = vor.u32 1.1754944e-38, %v3736_v48  ;;  %vm3735_vm8 = vcmp.eq.f32.partialorder %v3734_v24, 8.507059e+37 }
0x20dd   : > { %v5547_v45 = vpop.eup %5546 }
0x20de   : > { %v3726_v46 = vmul.f32 %v5547_v45, %v3724_v40  ;;  %v3741_v27 = vpop.permute.xlu2 %3740  ;;  %vm3731_vm1 = vweird.f32 %v5547_v45 }
0x20df   : > { %3761 = vmatpush.msrb.mxu1 %v3741_v27  ;;  %vm3732_vm4 = vmor %vm3730_vm2, %vm3731_vm1 }
0x20e0   : > { %v3727_v47 = vsub.f32 1.0, %v3726_v46 }
0x20e2   : > { %v3728_v49 = vmul.f32 %v5547_v45, %v3727_v47 }
0x20e4   : > { %v3729_v50 = vadd.f32 %v5547_v45, %v3728_v49 }
0x20e6   : > { %v3733_v51 = vsel %vm3732_vm4, %v5547_v45, %v3729_v50  ;;  %v4041_v45 = vrot.slane %v3809_v41, 4 }
0x20e7   : > { %v3738_v52 = vsel %vm3735_vm8, %v3737_v37, %v3733_v51 }
0x20e8   : > { %v3739_v53 = vmul.f32 %v5543_v62, %v3738_v52 }
0x20ea   : > { %5227 = vmatmul.msk.f32.vlgmr.msrb.gmra.mxu1 %vm1023_vm7, %v3739_v53 }
0x20fc   : > { %v3658_v54 = vpop.f32.mrf.mxu3 }
0x20fd   : > { %5224 = vmatmul.msk.f32.vlgmr.msrb.gmra.mxu2 %vm996_vm5, %v3658_v54 }
0x2167   : > { %v3763_v38 = vpop.f32.mrf.mxu1 }
0x2168   : > { %5229 = vmatmul.msk.f32.vlgmr.msrb.gmra.mxu3 %vm996_vm5, %v3763_v38 }
0x2180   : > { %v3684_v55 = vpop.f32.mrf.mxu2 }
0x2181   : > { %v3687_v57 = vadd.f32 %v3684_v55, %v6858_v10  ;;  %v5587_v10 = vld [vmem:[%s7289_s7] sm:$0xff]  ;;  %s7295_s7 = sld [smem:[#allocation49_spill]] }
0x2182   : > { %5233 = vmatmul.msk.f32.vlgmr.msra.gmra.mxu0 %vm915_vm0, %v5587_v10 }
0x21eb   : > { %v3789_v42 = vpop.f32.mrf.mxu3 }
0x21ec   : > { %v3792_v58 = vadd.f32 %v3789_v42, %v3687_v57 }
0x21ee   : > { %v6879_v59 = vadd.f32 %v3792_v58, %v6702_v56  ;;  %v3801_v56 = vld [vmem:[#allocation11 + $0x30] sm:$0xff] }
0x21ef   : > { %3859 = vmatpush.msra.mxu2 %v3801_v56 }
0x21f0   : > { %v3813_v60 = vsel %vm915_vm0, %v6879_v59, 0.0 }
0x21f1   : > { %3814 = vadd.xlane.f32.xlu1 %v3813_v60  ;;  %3860 = vmatpush.msra.mxu2 %v3800_v6 }
0x21f3   : > { %3861 = vmatpush.msra.mxu2 %v3799_v9 }
0x21ff   : > { %v6897_v36 = vpop.f32.mrf.mxu0 }
0x2200   : > { %3936 = vrot.lane.b32.xlu2 %v6897_v36, %s7282_s27  ;;  %5234 = vmatpush.xpose.msk.msra.mxu1 %vm996_vm5, %v6897_v36 }
0x2204   : > { %5240 = vmatpush.msk.msrb.mxu1 %vm1157_vm6, %v4041_v45 }
0x225a   : > { %v3937_v28 = vpop.permute.xlu2 %3936 }
0x225b   : > { %3957 = vmatpush.msra.mxu3 %v3937_v28 }
0x225d   : > { %5242 = vmatpush.msk.msrb.mxu3 %vm1157_vm6, %v3809_v41 }
0x2264   : > { %v3815_v25 = vpop.xlane.xlu1 %3814 }
0x2265   : > { %v3816_v61 = vmul.f32 %v3815_v25, %v6325_v8 }
0x2267   : > { %v3817_v43 = vsub.f32 %v6879_v59, %v3816_v61 }
0x2269   : > { %v3818_v63 = vmul.f32 %v3817_v43, %v3817_v43 }
0x226b   : > { %v3819_v1 = vsel %vm915_vm0, %v3818_v63, 0.0 }
0x226c   : > { %3820 = vadd.xlane.f32.xlu1 %v3819_v1 }
0x22df   : > { %v3821_v12 = vpop.xlane.xlu1 %3820 }
0x22e0   : > { %v3822_v13 = vmul.f32 %v3821_v12, %v6325_v8 }
0x22e2   : > { %v3823_v14 = vadd.f32 1e-06, %v3822_v13 }
0x22e4   : > { %5548 = vrsqrt.f32 %v3823_v14  ;;  %vm3830_vm10 = vweird.f32 %v3823_v14 }
0x22ea   : > { %v5549_v15 = vpop.eup %5548 }
0x22eb   : > { %v3825_v16 = vmul.f32 %v5549_v15, %v3823_v14  ;;  %vm3831_vm9 = vweird.f32 %v5549_v15 }
0x22ec   : > { %vm3832_vm11 = vmor %vm3830_vm10, %vm3831_vm9 }
0x22ed   : > { %v3826_v18 = vmul.f32 %v5549_v15, %v3825_v16 }
0x22ef   : > { %v3827_v17 = vmul.f32 0.5, %v3826_v18 }
0x22f1   : > { %v3828_v19 = vsub.f32 1.5, %v3827_v17 }
0x22f3   : > { %v3829_v0 = vmul.f32 %v5549_v15, %v3828_v19 }
0x22f5   : > { %v3833_v23 = vsel %vm3832_vm11, %v5549_v15, %v3829_v0 }
0x22f6   : > { %v3834_v62 = vmul.f32 %v3833_v23, %v3817_v43 }
0x22f8   : > { %v3838_v20 = vmul.f32 %v5434_v21, %v3834_v62 }
0x22fa   : > { %v3842_v11 = vadd.f32 %v5435_v22, %v3838_v20 }
0x22fc   : > { %5232 = vmatmul.msk.f32.vlgmr.msra.gmra.mxu2 %vm915_vm0, %v3842_v11 }
0x237f   : > { %v6903_v26 = vpop.f32.mrf.mxu2 }
0x2380   : > { %3962 = vrot.lane.b32.xlu2 %v6903_v26, %s7278_s25  ;;  %5235 = vmatmul.msk.f32.vlgmr.msra.gmra.mxu1 %vm996_vm5, %v6903_v26 }
0x2388   : > { %4199 = vrot.lane.b32.xlu2 %v6897_v36, %s7279_s21 }
0x2390   : > { %4197 = vrot.lane.b32.xlu2 %v6903_v26, %s7279_s21 }
0x23da   : > { %v3963_v47 = vpop.permute.xlu2 %3962 }
0x23e2   : > { %v4200_v38 = vpop.permute.xlu2 %4199 }
0x23ea   : > { %v4198_v60 = vpop.permute.xlu2 %4197 }
0x23fd   : > { %v3909_v29 = vpop.f32.mrf.mxu1 }
0x23fe   : > { %v3910_v31 = vadd.f32 %v6915_v30, %v3909_v29  ;;  %v3810_v29 = vld [vmem:[#allocation14 + $0x28] sm:$0xff] }
0x23ff   : > { %5247 = vmatpush.msk.msra.mxu1 %vm1157_vm6, %v3810_v29 }
0x2400   : > { %v3912_v32 = vsel %vm1023_vm7, %v3910_v31, -inf }
0x2401   : > { %3913 = vmax.xlane.f32.xlu0 %v3912_v32 }
0x2415   : > { %4092 = vrot.lane.b32.xlu0 %v6903_v26, %s7281_s22 }
0x2474   : > { %v3914_v33 = vpop.xlane.xlu0 %3913 }
0x2475   : > { %v3915_v35 = vsub.f32 %v3910_v31, %v3914_v33 }
0x2477   : > { %v3916_v39 = vmul.f32 1.442695, %v3915_v35 }
0x2479   : > { %5550 = vpow2.f32 %v3916_v39 }
0x247f   : > { %v5551_v34 = vpop.eup %5550 }
0x2480   : > { %v3918_v40 = vsel %vm1023_vm7, %v5551_v34, 0.0 }
0x2481   : > { %3919 = vadd.xlane.f32.xlu1 %v3918_v40 }
0x2487   : > { %v4093_v42 = vpop.permute.xlu0 %4092 }
0x249a   : > { %3964 = vrot.lane.b32.xlu1 %v6897_v36, %s7278_s25 }
0x24a2   : > { %4094 = vrot.lane.b32.xlu1 %v6897_v36, %s7281_s22  ;;  %s7291_s22 = sld [smem:[#allocation48_spill]] }
0x24f4   : > { %v3920_v44 = vpop.xlane.xlu1 %3919 }
0x24f5   : > { %5552 = vrcp.f32 %v3920_v44  ;;  %v3932_v49 = vand.u32 2147483648, %v3920_v44  ;;  %v3930_v50 = vand.u32 2147483647, %v3920_v44  ;;  %vm3926_vm13 = vweird.f32 %v3920_v44 }
0x24f7   : > { %v3933_v51 = vor.u32 1.1754944e-38, %v3932_v49  ;;  %vm3931_vm15 = vcmp.eq.f32.partialorder %v3930_v50, 8.507059e+37 }
0x24fb   : > { %v5553_v46 = vpop.eup %5552 }
0x24fc   : > { %v3922_v27 = vmul.f32 %v5553_v46, %v3920_v44  ;;  %vm3927_vm12 = vweird.f32 %v5553_v46 }
0x24fd   : > { %vm3928_vm14 = vmor %vm3926_vm13, %vm3927_vm12 }
0x24fe   : > { %v3923_v48 = vsub.f32 1.0, %v3922_v27 }
0x2500   : > { %v3924_v24 = vmul.f32 %v5553_v46, %v3923_v48 }
0x2502   : > { %v3925_v37 = vadd.f32 %v5553_v46, %v3924_v24 }
0x2504   : > { %v3929_v52 = vsel %vm3928_vm14, %v5553_v46, %v3925_v37 }
0x2505   : > { %v3934_v53 = vsel %vm3931_vm15, %v3933_v51, %v3929_v52 }
0x2506   : > { %v3935_v54 = vmul.f32 %v5551_v34, %v3934_v53 }
0x2508   : > { %5236 = vmatmul.msk.f32.vlgmr.msra.gmra.mxu3 %vm1023_vm7, %v3935_v54 }
0x2509   : > { %5249 = vmatpush.xpose.msk.msra.mxu3 %vm996_vm5, %v4200_v38 }
0x250c   : > { %v3965_v55 = vpop.permute.xlu1 %3964 }
0x250d   : > { %5237 = vmatpush.xpose.msk.msrb.mxu2 %vm996_vm5, %v3965_v55 }
0x2510   : > { %5238 = vmatmul.msk.f32.vlgmr.msrb.gmra.mxu2 %vm996_vm5, %v3963_v47 }
0x2514   : > { %v4095_v57 = vpop.permute.xlu1 %4094 }
0x2515   : > { %5244 = vmatpush.xpose.msk.msra.mxu2 %vm996_vm5, %v4095_v57 }
0x2518   : > { %5245 = vmatmul.msk.f32.vlgmr.msra.gmra.mxu2 %vm996_vm5, %v4093_v42 }
0x258b   : > { %v3959_v58 = vpop.f32.mrf.mxu3 }
0x258c   : > { %5243 = vmatmul.msk.f32.vlgmr.msrb.gmra.mxu3 %vm996_vm5, %v3959_v58 }
0x2593   : > { %v3987_v25 = vpop.f32.mrf.mxu2 }
0x2594   : > { %v3988_v61 = vadd.f32 %v6915_v30, %v3987_v25  ;;  %5250 = vmatmul.msk.f32.vlgmr.msra.gmra.mxu3 %vm996_vm5, %v4198_v60 }
0x2596   : > { %v3990_v43 = vsel %vm1023_vm7, %v3988_v61, -inf }
0x2597   : > { %3991 = vmax.xlane.f32.xlu2 %v3990_v43 }
0x259b   : > { %v4117_v63 = vpop.f32.mrf.mxu2 }
0x259c   : > { %v4118_v1 = vadd.f32 %v6915_v30, %v4117_v63 }
0x259e   : > { %v4120_v2 = vsel %vm1023_vm7, %v4118_v1, -inf }
0x259f   : > { %4121 = vmax.xlane.f32.xlu0 %v4120_v2 }
0x25b3   : > { %4144 = vrot.lane.b32.xlu0 %v6897_v36, %s7283_s16 }
0x25bb   : > { %4302 = vrot.lane.b32.xlu0 %v6903_v26, %s7270_s3 }
0x260a   : > { %v3992_v3 = vpop.xlane.xlu2 %3991 }
0x260b   : > { %v3993_v4 = vsub.f32 %v3988_v61, %v3992_v3  ;;  %v4275_v61 = vrot.slane %v3810_v29, 4 }
0x260d   : > { %v3994_v56 = vmul.f32 1.442695, %v3993_v4 }
0x260f   : > { %5554 = vpow2.f32 %v3994_v56  ;;  %v6944_v5 = vpop.f32.mrf.mxu3 }
0x2612   : > { %v4122_v6 = vpop.xlane.xlu0 %4121 }
0x2613   : > { %v4123_v7 = vsub.f32 %v4118_v1, %v4122_v6 }
0x2615   : > { %v6946_v9 = vpop.eup %5554  ;;  %v4124_v10 = vmul.f32 1.442695, %v4123_v7 }
0x2616   : > { %v3996_v12 = vsel %vm1023_vm7, %v6946_v9, 0.0 }
0x2617   : > { %5556 = vpow2.f32 %v4124_v10  ;;  %v4222_v13 = vpop.f32.mrf.mxu3  ;;  %3997 = vadd.xlane.f32.xlu2 %v3996_v12 }
0x2618   : > { %v4223_v14 = vadd.f32 %v6915_v30, %v4222_v13 }
0x261a   : > { %v4225_v15 = vsel %vm1023_vm7, %v4223_v14, -inf }
0x261b   : > { %4226 = vmax.xlane.f32.xlu1 %v4225_v15 }
0x261d   : > { %v6952_v16 = vpop.eup %5556 }
0x261e   : > { %v4126_v18 = vsel %vm1023_vm7, %v6952_v16, 0.0 }
0x261f   : > { %4127 = vadd.xlane.f32.xlu2 %v4126_v18 }
0x2625   : > { %v4145_v43 = vpop.permute.xlu0 %4144 }
0x262d   : > { %v4303_v12 = vpop.permute.xlu0 %4302 }
0x2637   : > { %4249 = vrot.lane.b32.xlu2 %v6897_v36, %s7285_s4 }
0x263f   : > { %4409 = vrot.lane.b32.xlu2 %v6897_v36, %s7284_s29 }
0x268a   : > { %v3998_v17 = vpop.xlane.xlu2 %3997 }
0x268b   : > { %v4010_v49 = vand.u32 2147483648, %v3998_v17  ;;  %vm4004_vm9 = vweird.f32 %v3998_v17  ;;  %v4008_v50 = vand.u32 2147483647, %v3998_v17 }
0x268d   : > { %v4011_v38 = vor.u32 1.1754944e-38, %v4010_v49  ;;  %vm4009_vm12 = vcmp.eq.f32.partialorder %v4008_v50, 8.507059e+37 }
0x268e   : > { %v4227_v19 = vpop.xlane.xlu1 %4226 }
0x268f   : > { %v4228_v0 = vsub.f32 %v4223_v14, %v4227_v19 }
0x2691   : > { %v4229_v21 = vmul.f32 1.442695, %v4228_v0 }
0x2692   : > { %v6960_v23 = vpop.xlane.xlu2 %4127 }
0x2693   : > { %5558 = vpow2.f32 %v4229_v21  ;;  %v4140_v42 = vand.u32 2147483648, %v6960_v23  ;;  %vm4134_vm14 = vweird.f32 %v6960_v23  ;;  %v4138_v58 = vand.u32 2147483647, %v6960_v23 }
0x2694   : > { %5560 = vrcp.f32 %v3998_v17 }
0x2695   : > { %5562 = vrcp.f32 %v6960_v23  ;;  %v4141_v1 = vor.u32 1.1754944e-38, %v4140_v42 }
0x2699   : > { %v5559_v62 = vpop.eup %5558 }
0x269a   : > { %v4250_v22 = vpop.permute.xlu2 %4249  ;;  %v4231_v20 = vsel %vm1023_vm7, %v5559_v62, 0.0  ;;  %v5561_v11 = vpop.eup %5560 }
0x269b   : > { %4232 = vadd.xlane.f32.xlu1 %v4231_v20  ;;  %4270 = vmatpush.msrb.mxu2 %v4250_v22  ;;  %v4000_v31 = vmul.f32 %v5561_v11, %v3998_v17  ;;  %v5563_v32 = vpop.eup %5562  ;;  %vm4005_vm2 = vweird.f32 %v5561_v11 }
0x269c   : > { %v4130_v40 = vmul.f32 %v5563_v32, %v6960_v23  ;;  %vm4006_vm11 = vmor %vm4004_vm9, %vm4005_vm2  ;;  %vm4135_vm13 = vweird.f32 %v5563_v32 }
0x269d   : > { %v4001_v33 = vsub.f32 1.0, %v4000_v31  ;;  %vm4136_vm15 = vmor %vm4134_vm14, %vm4135_vm13 }
0x269e   : > { %v4131_v47 = vsub.f32 1.0, %v4130_v40 }
0x269f   : > { %v4002_v34 = vmul.f32 %v5561_v11, %v4001_v33 }
0x26a0   : > { %v4132_v53 = vmul.f32 %v5563_v32, %v4131_v47 }
0x26a1   : > { %v4003_v27 = vadd.f32 %v5561_v11, %v4002_v34 }
0x26a2   : > { %v4133_v57 = vadd.f32 %v5563_v32, %v4132_v53  ;;  %v4410_v4 = vpop.permute.xlu2 %4409 }
0x26a3   : > { %v4007_v52 = vsel %vm4006_vm11, %v5561_v11, %v4003_v27 }
0x26a4   : > { %v4012_v55 = vsel %vm4009_vm12, %v4011_v38, %v4007_v52  ;;  %v4137_v63 = vsel %vm4136_vm15, %v5563_v32, %v4133_v57 }
0x26a5   : > { %v4013_v25 = vmul.f32 %v6946_v9, %v4012_v55 }
0x26b4   : > { %4014 = vrot.lane.b32.xlu1 %v6897_v36, %s7269_s13 }
0x26bc   : > { %4304 = vrot.lane.b32.xlu1 %v6897_v36, %s7270_s3 }
0x26c4   : > { %4407 = vrot.lane.b32.xlu1 %v6903_v26, %s7284_s29  ;;  %s7292_s29 = sld [smem:[#allocation50_spill]] }
0x26ca   : > { %s7293_s4 = smov %s7292_s29 }
0x270e   : > { %v4233_v28 = vpop.xlane.xlu1 %4232 }
0x270f   : > { %5564 = vrcp.f32 %v4233_v28  ;;  %v4245_v45 = vand.u32 2147483648, %v4233_v28  ;;  %v4243_v46 = vand.u32 2147483647, %v4233_v28  ;;  %vm4239_vm4 = vweird.f32 %v4233_v28 }
0x2711   : > { %v4246_v24 = vor.u32 1.1754944e-38, %v4245_v45  ;;  %vm4244_vm10 = vcmp.eq.f32.partialorder %v4243_v46, 8.507059e+37 }
0x2715   : > { %v5565_v35 = vpop.eup %5564 }
0x2716   : > { %v4235_v39 = vmul.f32 %v5565_v35, %v4233_v28  ;;  %vm4240_vm1 = vweird.f32 %v5565_v35 }
0x2717   : > { %vm4241_vm8 = vmor %vm4239_vm4, %vm4240_vm1  ;;  %vm4139_vm1 = vcmp.eq.f32.partialorder %v4138_v58, 8.507059e+37 }
0x2718   : > { %v4236_v41 = vsub.f32 1.0, %v4235_v39  ;;  %v4142_v2 = vsel %vm4139_vm1, %v4141_v1, %v4137_v63 }
0x2719   : > { %v4143_v3 = vmul.f32 %v6952_v16, %v4142_v2 }
0x271a   : > { %v4237_v44 = vmul.f32 %v5565_v35, %v4236_v41 }
0x271c   : > { %v4238_v48 = vadd.f32 %v5565_v35, %v4237_v44 }
0x271e   : > { %v4242_v37 = vsel %vm4241_vm8, %v5565_v35, %v4238_v48 }
0x271f   : > { %v4247_v51 = vsel %vm4244_vm10, %v4246_v24, %v4242_v37 }
0x2720   : > { %v4248_v54 = vmul.f32 %v5559_v62, %v4247_v51 }
0x2722   : > { %5251 = vmatmul.msk.f32.vlgmr.msrb.gmra.mxu2 %vm1023_vm7, %v4248_v54 }
0x2726   : > { %v4015_v60 = vpop.permute.xlu1 %4014 }
0x2727   : > { %4035 = vmatpush.msrb.mxu0 %v4015_v60 }
0x2728   : > { %5239 = vmatmul.msk.f32.vlgmr.msrb.gmra.mxu0 %vm1023_vm7, %v4013_v25 }
0x2729   : > { %4165 = vmatpush.msra.mxu0 %v4145_v43 }
0x272b   : > { %5252 = vmatpush.msk.msrb.mxu0 %vm1157_vm6, %v4275_v61 }
0x272e   : > { %v4305_v56 = vpop.permute.xlu1 %4304 }
0x2730   : > { %5246 = vmatmul.msk.f32.vlgmr.msra.gmra.mxu0 %vm1023_vm7, %v4143_v3 }
0x2731   : > { %5259 = vmatpush.xpose.msk.msra.mxu0 %vm996_vm5, %v4410_v4 }
0x2736   : > { %v4408_v9 = vpop.permute.xlu1 %4407 }
0x27a5   : > { %v4037_v6 = vpop.f32.mrf.mxu0  ;;  %v4272_v7 = vpop.f32.mrf.mxu2 }
0x27a6   : > { %5241 = vmatmul.msk.f32.vlgmr.msrb.gmra.mxu1 %vm996_vm5, %v4037_v6  ;;  %5253 = vmatmul.msk.f32.vlgmr.msrb.gmra.mxu0 %vm996_vm5, %v4272_v7 }
0x27a7   : > { %5254 = vmatpush.xpose.msk.msrb.mxu1 %vm996_vm5, %v4305_v56 }
0x27ad   : > { %v4167_v10 = vpop.f32.mrf.mxu0 }
0x27ae   : > { %5248 = vmatmul.msk.f32.vlgmr.msra.gmra.mxu1 %vm996_vm5, %v4167_v10  ;;  %5260 = vmatmul.msk.f32.vlgmr.msra.gmra.mxu0 %vm996_vm5, %v4408_v9 }
0x27b6   : > { %5255 = vmatmul.msk.f32.vlgmr.msrb.gmra.mxu1 %vm996_vm5, %v4303_v12 }
0x2823   : > { %v4064_v13 = vpop.f32.mrf.mxu1  ;;  %v4298_v14 = vpop.f32.mrf.mxu0 }
0x2824   : > { %v4090_v15 = vadd.f32 %v6944_v5, %v4064_v13  ;;  %v3811_v5 = vld [vmem:[#allocation14 + $0x30] sm:$0xff] }
0x2825   : > { %5257 = vmatpush.msk.msra.mxu2 %vm1157_vm6, %v3811_v5  ;;  %v4485_v39 = vrot.slane %v3811_v5, 4 }
0x282b   : > { %v4193_v16 = vpop.f32.mrf.mxu1  ;;  %v4432_v18 = vpop.f32.mrf.mxu0 }
0x282c   : > { %v4196_v17 = vadd.f32 %v4193_v16, %v4090_v15  ;;  %v4433_v19 = vadd.f32 %v6915_v30, %v4432_v18 }
0x282e   : > { %v4435_v0 = vsel %vm1023_vm7, %v4433_v19, -inf  ;;  %v6991_v21 = vadd.f32 %v4298_v14, %v4196_v17 }
0x282f   : > { %4436 = vmax.xlane.f32.xlu0 %v4435_v0 }
0x2833   : > { %v4327_v23 = vpop.f32.mrf.mxu1 }
0x2834   : > { %v4328_v62 = vadd.f32 %v6915_v30, %v4327_v23 }
0x2836   : > { %v4330_v22 = vsel %vm1023_vm7, %v4328_v62, -inf }
0x2837   : > { %4331 = vmax.xlane.f32.xlu2 %v4330_v22 }
0x2843   : > { %4354 = vrot.lane.b32.xlu0 %v6897_v36, %s7286_s24 }
0x284b   : > { %4617 = vrot.lane.b32.xlu0 %v6903_v26, %s7288_s15 }
0x2853   : > { %4514 = vrot.lane.b32.xlu0 %v6897_v36, %s7271_s6 }
0x28a2   : > { %v4437_v20 = vpop.xlane.xlu0 %4436 }
0x28a3   : > { %v4438_v11 = vsub.f32 %v4433_v19, %v4437_v20 }
0x28a5   : > { %v4439_v28 = vmul.f32 1.442695, %v4438_v11 }
0x28a7   : > { %5566 = vpow2.f32 %v4439_v28 }
0x28aa   : > { %v4332_v29 = vpop.xlane.xlu2 %4331 }
0x28ab   : > { %v4333_v31 = vsub.f32 %v4328_v62, %v4332_v29 }
0x28ad   : > { %v5567_v32 = vpop.eup %5566  ;;  %v4334_v33 = vmul.f32 1.442695, %v4333_v31 }
0x28ae   : > { %v4441_v35 = vsel %vm1023_vm7, %v5567_v32, 0.0 }
0x28af   : > { %5568 = vpow2.f32 %v4334_v33  ;;  %4442 = vadd.xlane.f32.xlu2 %v4441_v35 }
0x28b5   : > { %v5569_v34 = vpop.eup %5568  ;;  %v4355_v40 = vpop.permute.xlu0 %4354 }
0x28b6   : > { %4375 = vmatpush.msrb.mxu3 %v4355_v40  ;;  %v4336_v41 = vsel %vm1023_vm7, %v5569_v34, 0.0 }
0x28b7   : > { %4337 = vadd.xlane.f32.xlu1 %v4336_v41 }
0x28b8   : > { %5262 = vmatpush.msk.msra.mxu3 %vm1157_vm6, %v4485_v39 }
0x28bd   : > { %v4618_v45 = vpop.permute.xlu0 %4617 }
0x28c5   : > { %v4515_v44 = vpop.permute.xlu0 %4514 }
0x28c6   : > { %5264 = vmatpush.xpose.msk.msrb.mxu2 %vm996_vm5, %v4515_v44 }
0x28c7   : > { %4619 = vrot.lane.b32.xlu2 %v6897_v36, %s7288_s15 }
0x28d0   : > { %4459 = vrot.lane.b32.xlu1 %v6897_v36, %s7287_s19 }
0x28d8   : > { %4512 = vrot.lane.b32.xlu1 %v6903_v26, %s7271_s6 }
0x2922   : > { %v4443_v46 = vpop.xlane.xlu2 %4442 }
0x2923   : > { %5570 = vrcp.f32 %v4443_v46  ;;  %v4455_v26 = vand.u32 2147483648, %v4443_v46  ;;  %vm4449_vm10 = vweird.f32 %v4443_v46  ;;  %v4453_v42 = vand.u32 2147483647, %v4443_v46 }
0x2925   : > { %v4456_v43 = vor.u32 1.1754944e-38, %v4455_v26  ;;  %vm4454_vm13 = vcmp.eq.f32.partialorder %v4453_v42, 8.507059e+37 }
0x2929   : > { %v5571_v27 = vpop.eup %5570 }
0x292a   : > { %v4338_v47 = vpop.xlane.xlu1 %4337  ;;  %v4445_v48 = vmul.f32 %v5571_v27, %v4443_v46  ;;  %vm4450_vm4 = vweird.f32 %v5571_v27  ;;  %v4620_v63 = vpop.permute.xlu2 %4619 }
0x292b   : > { %5572 = vrcp.f32 %v4338_v47  ;;  %v4350_v52 = vand.u32 2147483648, %v4338_v47  ;;  %v4348_v54 = vand.u32 2147483647, %v4338_v47  ;;  %vm4344_vm8 = vweird.f32 %v4338_v47  ;;  %vm4451_vm12 = vmor %vm4449_vm10, %vm4450_vm4 }
0x292c   : > { %v4446_v49 = vsub.f32 1.0, %v4445_v48 }
0x292d   : > { %v4351_v57 = vor.u32 1.1754944e-38, %v4350_v52  ;;  %vm4349_vm11 = vcmp.eq.f32.partialorder %v4348_v54, 8.507059e+37 }
0x292e   : > { %v4447_v37 = vmul.f32 %v5571_v27, %v4446_v49 }
0x2930   : > { %v4448_v38 = vadd.f32 %v5571_v27, %v4447_v37 }
0x2931   : > { %v5573_v24 = vpop.eup %5572 }
0x2932   : > { %v4340_v50 = vmul.f32 %v5573_v24, %v4338_v47  ;;  %vm4345_vm2 = vweird.f32 %v5573_v24  ;;  %v4452_v25 = vsel %vm4451_vm12, %v5571_v27, %v4448_v38 }
0x2933   : > { %vm4346_vm9 = vmor %vm4344_vm8, %vm4345_vm2  ;;  %v4457_v1 = vsel %vm4454_vm13, %v4456_v43, %v4452_v25 }
0x2934   : > { %v4341_v51 = vsub.f32 1.0, %v4340_v50  ;;  %v4458_v2 = vmul.f32 %v5567_v32, %v4457_v1 }
0x2936   : > { %v4342_v53 = vmul.f32 %v5573_v24, %v4341_v51 }
0x2938   : > { %v4343_v55 = vadd.f32 %v5573_v24, %v4342_v53 }
0x293a   : > { %v4347_v58 = vsel %vm4346_vm9, %v5573_v24, %v4343_v55  ;;  %v3812_v55 = vld [vmem:[#allocation14 + $0x38] sm:$0xff] }
0x293b   : > { %v4352_v60 = vsel %vm4349_vm11, %v4351_v57, %v4347_v58  ;;  %v4695_v26 = vrot.slane %v3812_v55, 4 }
0x293c   : > { %v4353_v61 = vmul.f32 %v5569_v34, %v4352_v60 }
0x293e   : > { %5256 = vmatmul.msk.f32.vlgmr.msrb.gmra.mxu3 %vm1023_vm7, %v4353_v61 }
0x293f   : > { %5269 = vmatpush.xpose.msk.msrb.mxu3 %vm996_vm5, %v4620_v63 }
0x2942   : > { %v4460_v3 = vpop.permute.xlu1 %4459 }
0x2943   : > { %4480 = vmatpush.msra.mxu1 %v4460_v3 }
0x2944   : > { %5261 = vmatmul.msk.f32.vlgmr.msra.gmra.mxu1 %vm1023_vm7, %v4458_v2 }
0x2945   : > { %5267 = vmatpush.msk.msrb.mxu1 %vm1157_vm6, %v3812_v55 }
0x294a   : > { %v4513_v6 = vpop.permute.xlu1 %4512 }
0x29c1   : > { %v4377_v4 = vpop.f32.mrf.mxu3  ;;  %v4482_v56 = vpop.f32.mrf.mxu1 }
0x29c2   : > { %5258 = vmatmul.msk.f32.vlgmr.msra.gmra.mxu2 %vm996_vm5, %v4377_v4  ;;  %5263 = vmatmul.msk.f32.vlgmr.msra.gmra.mxu3 %vm996_vm5, %v4482_v56 }
0x29ca   : > { %5265 = vmatmul.msk.f32.vlgmr.msrb.gmra.mxu2 %vm996_vm5, %v4513_v6  ;;  %5270 = vmatmul.msk.f32.vlgmr.msrb.gmra.mxu3 %vm996_vm5, %v4618_v45  ;;  %v4731_v6 = vld [vmem:[#allocation16 + $0x38] sm:$0xff] }
0x29cb   : > { %4793 = vmatpush.msra.mxu1 %v4731_v6 }
0x2a45   : > { %v4403_v7 = vpop.f32.mrf.mxu2  ;;  %v4508_v9 = vpop.f32.mrf.mxu3 }
0x2a46   : > { %v4406_v10 = vadd.f32 %v4403_v7, %v6991_v21  ;;  %v4730_v7 = vld [vmem:[#allocation16 + $0x30] sm:$0xff] }
0x2a47   : > { %4794 = vmatpush.msra.mxu1 %v4730_v7 }
0x2a48   : > { %v7020_v12 = vadd.f32 %v4508_v9, %v4406_v10  ;;  %v4729_v9 = vld [vmem:[#allocation16 + $0x28] sm:$0xff]  ;;  %v4728_v10 = vld [vmem:[#allocation16 + $0x20] sm:$0xff] }
0x2a49   : > { %4795 = vmatpush.msra.mxu1 %v4729_v9 }
0x2a4b   : > { %4796 = vmatpush.msra.mxu1 %v4728_v10 }
0x2a4d   : > { %v4537_v13 = vpop.f32.mrf.mxu2  ;;  %v4642_v14 = vpop.f32.mrf.mxu3 }
0x2a4e   : > { %v4538_v15 = vadd.f32 %v6915_v30, %v4537_v13  ;;  %v4643_v16 = vadd.f32 %v6915_v30, %v4642_v14  ;;  %v5282_v13 = vld [vmem:[%s7145_s18 + $0x68] sm:$0xff] }
0x2a50   : > { %v4540_v18 = vsel %vm1023_vm7, %v4538_v15, -inf  ;;  %v4645_v17 = vsel %vm1023_vm7, %v4643_v16, -inf }
0x2a51   : > { %4541 = vmax.xlane.f32.xlu0 %v4540_v18  ;;  %4646 = vmax.xlane.f32.xlu2 %v4645_v17  ;;  %v5280_v17 = vld [vmem:[%s7145_s18 + $0x58] sm:$0xff] }
0x2a65   : > { %4669 = vrot.lane.b32.xlu0 %v6897_v36, %s7273_s14 }
0x2ac4   : > { %v4542_v19 = vpop.xlane.xlu0 %4541  ;;  %v4647_v0 = vpop.xlane.xlu2 %4646 }
0x2ac5   : > { %v4543_v21 = vsub.f32 %v4538_v15, %v4542_v19  ;;  %v4648_v23 = vsub.f32 %v4643_v16, %v4647_v0  ;;  %v5281_v16 = vld [vmem:[%s7145_s18 + $0x60] sm:$0xff] }
0x2ac7   : > { %v4544_v62 = vmul.f32 1.442695, %v4543_v21  ;;  %v4649_v22 = vmul.f32 1.442695, %v4648_v23 }
0x2ac9   : > { %5574 = vpow2.f32 %v4544_v62 }
0x2aca   : > { %5576 = vpow2.f32 %v4649_v22 }
0x2acf   : > { %v5575_v5 = vpop.eup %5574 }
0x2ad0   : > { %v5577_v20 = vpop.eup %5576  ;;  %v4546_v30 = vsel %vm1023_vm7, %v5575_v5, 0.0 }
0x2ad1   : > { %4547 = vadd.xlane.f32.xlu2 %v4546_v30  ;;  %v4651_v11 = vsel %vm1023_vm7, %v5577_v20, 0.0  ;;  %v5437_v30 = vld [vmem:[%s7275_s26 + $0x1] ss:$0 sm:$0xff] }
0x2ad2   : > { %4652 = vadd.xlane.f32.xlu1 %v4651_v11 }
0x2ad7   : > { %v4670_v28 = vpop.permute.xlu0 %4669 }
0x2ad8   : > { %4690 = vmatpush.msra.mxu2 %v4670_v28 }
0x2aeb   : > { %4564 = vrot.lane.b32.xlu1 %v6897_v36, %s7272_s0  ;;  %s5289_s0 = sshll.u32 %s6111_s5, 3  ;;  %s896_s5 = scalar_lea.vmem [#allocation17], %s6289_s1 }
0x2aec   : > { %s4874_s24 = scalar_lea.hbm %s7292_s29, %s5289_s0  ;;  %s4876_s8 = sshll.u32 %s896_s5, 4  ;;  %s4877_s8 = int_to_ptr.vmem [resolvable:$true] %s4876_s8 }
0x2aed   : > { %s4878_s14 = sshll.u32 %s4874_s24, 4  ;;  %s5879_s1 = scalar_lea.hbm %s7293_s4, 16  ;;  %s4879_s14 = int_to_ptr.hbm [resolvable:$true] %s4878_s14 }
0x2aee   : > { %s5873_s13 = sshra.s32 %s4879_s14, 4  ;;  %s5874_s13 = int_to_ptr.hbm [resolvable:$true] %s5873_s13 }
0x2aef   : > { %s5875_s3 = scalar_lea.hbm %s5874_s13, 8  ;;  %p5880_p10 = scmp.lt.s32.totalorder %s5874_s13, %s7293_s4 }
0x2af0   : > { %p5876_p13 = scmp.ne.s32.totalorder %s5874_s13, %s5875_s3  ;;  %p5881_p6 = scmp.lt.s32.totalorder %s5879_s1, %s5875_s3 }
0x2af2   : > { %p5877_p1 = pnand %p5876_p13, %p6169_p0  ;;  %p5882_p11 = por %p5881_p6, %p5880_p10 }
0x2af4   : > { %p5878_p7 = pneg %p5877_p1 }
0x2af6   : > { %p5883_p3 = pnand %p5882_p11, %p5878_p7 }
0x2b44   : > { %v4548_v29 = vpop.xlane.xlu2 %4547 }
0x2b45   : > { %v4653_v31 = vpop.xlane.xlu1 %4652  ;;  %5578 = vrcp.f32 %v4548_v29  ;;  %v4560_v48 = vand.u32 2147483648, %v4548_v29  ;;  %vm4554_vm8 = vweird.f32 %v4548_v29  ;;  %v4558_v24 = vand.u32 2147483647, %v4548_v29 }
0x2b46   : > { %5580 = vrcp.f32 %v4653_v31  ;;  %v4665_v41 = vand.u32 2147483648, %v4653_v31  ;;  %v4663_v46 = vand.u32 2147483647, %v4653_v31  ;;  %vm4659_vm15 = vweird.f32 %v4653_v31 }
0x2b47   : > { %v4561_v52 = vor.u32 1.1754944e-38, %v4560_v48  ;;  %vm4559_vm10 = vcmp.eq.f32.partialorder %v4558_v24, 8.507059e+37 }
0x2b48   : > { %v4666_v36 = vor.u32 1.1754944e-38, %v4665_v41  ;;  %vm4664_vm4 = vcmp.eq.f32.partialorder %v4663_v46, 8.507059e+37  ;;  %v5439_v41 = vld [vmem:[%s7277_s11 + $0x1] ss:$0 sm:$0xff] }
0x2b4b   : > { %v5579_v32 = vpop.eup %5578 }
0x2b4c   : > { %v5581_v33 = vpop.eup %5580  ;;  %v4550_v35 = vmul.f32 %v5579_v32, %v4548_v29  ;;  %vm4555_vm1 = vweird.f32 %v5579_v32 }
0x2b4d   : > { %v4655_v39 = vmul.f32 %v5581_v33, %v4653_v31  ;;  %vm4660_vm14 = vweird.f32 %v5581_v33  ;;  %vm4556_vm9 = vmor %vm4554_vm8, %vm4555_vm1  ;;  %v5279_v31 = vld [vmem:[%s7145_s18 + $0x50] sm:$0xff] }
0x2b4e   : > { %v4551_v34 = vsub.f32 1.0, %v4550_v35  ;;  %vm4661_vm2 = vmor %vm4659_vm15, %vm4660_vm14  ;;  %v5438_v35 = vld [vmem:[%s7276_s2 + $0x1] ss:$0 sm:$0xff] }
0x2b4f   : > { %v4656_v40 = vsub.f32 1.0, %v4655_v39 }
0x2b50   : > { %v4552_v45 = vmul.f32 %v5579_v32, %v4551_v34 }
0x2b51   : > { %v4657_v44 = vmul.f32 %v5581_v33, %v4656_v40 }
0x2b52   : > { %v4553_v47 = vadd.f32 %v5579_v32, %v4552_v45 }
0x2b53   : > { %v4658_v27 = vadd.f32 %v5581_v33, %v4657_v44 }
0x2b54   : > { %v4557_v51 = vsel %vm4556_vm9, %v5579_v32, %v4553_v47  ;;  %v5278_v32 = vld [vmem:[%s7145_s18 + $0x48] sm:$0xff] }
0x2b55   : > { %v4662_v49 = vsel %vm4661_vm2, %v5581_v33, %v4658_v27  ;;  %v4562_v53 = vsel %vm4559_vm10, %v4561_v52, %v4557_v51  ;;  %v5277_v33 = vld [vmem:[%s7145_s18 + $0x40] sm:$0xff] }
0x2b56   : > { %v4667_v50 = vsel %vm4664_vm4, %v4666_v36, %v4662_v49  ;;  %v4563_v54 = vmul.f32 %v5575_v5, %v4562_v53  ;;  %v5436_v5 = vld [vmem:[%s7274_s20 + $0x1] ss:$0 sm:$0xff] }
0x2b57   : > { %v4668_v37 = vmul.f32 %v5577_v20, %v4667_v50 }
0x2b59   : > { %5271 = vmatmul.msk.f32.vlgmr.msra.gmra.mxu2 %vm1023_vm7, %v4668_v37 }
0x2b5d   : > { %v4565_v38 = vpop.permute.xlu1 %4564 }
0x2b5e   : > { %4585 = vmatpush.msrb.mxu0 %v4565_v38 }
0x2b5f   : > { %5266 = vmatmul.msk.f32.vlgmr.msrb.gmra.mxu0 %vm1023_vm7, %v4563_v54 }
0x2b60   : > { %5272 = vmatpush.msk.msra.mxu0 %vm1157_vm6, %v4695_v26 }
0x2bdc   : > { %v4587_v57 = vpop.f32.mrf.mxu0  ;;  %v4692_v42 = vpop.f32.mrf.mxu2 }
0x2bdd   : > { %5268 = vmatmul.msk.f32.vlgmr.msrb.gmra.mxu1 %vm996_vm5, %v4587_v57  ;;  %5273 = vmatmul.msk.f32.vlgmr.msra.gmra.mxu0 %vm996_vm5, %v4692_v42  ;;  %v5440_v57 = vld [vmem:[%s7291_s22] ss:$0 sm:$0xff] }
0x2c5a   : > { %v4613_v58 = vpop.f32.mrf.mxu1  ;;  %v4718_v25 = vpop.f32.mrf.mxu0 }
0x2c5b   : > { %v4616_v60 = vadd.f32 %v4613_v58, %v7020_v12  ;;  %v5283_v12 = vld [vmem:[%s7145_s18 + $0x70] sm:$0xff]  ;;  %v5441_v58 = vld [vmem:[%s7295_s7] ss:$0 sm:$0xff] }
0x2c5d   : > { %v4721_v61 = vadd.f32 %v4718_v25, %v4616_v60 }
0x2c5f   : > { %v4722_v43 = vadd.f32 %v4721_v61, %v6879_v59  ;;  %v5284_v59 = vld [vmem:[%s7145_s18 + $0x78] sm:$0xff] }
0x2c60   : > { %4813 = vmatpush.msra.mxu3 %v5284_v59 }
0x2c61   : > { %v4745_v63 = vsel %vm915_vm0, %v4722_v43, 0.0 }
0x2c62   : > { %4746 = vadd.xlane.f32.xlu2 %v4745_v63  ;;  %4814 = vmatpush.msra.mxu3 %v5283_v12 }
0x2c64   : > { %4815 = vmatpush.msra.mxu3 %v5282_v13 }
0x2c66   : > { %4816 = vmatpush.msra.mxu3 %v5281_v16 }
0x2c68   : > { %4817 = vmatpush.msra.mxu3 %v5280_v17 }
0x2c6a   : > { %4818 = vmatpush.msra.mxu3 %v5279_v31 }
0x2c6c   : > { %4819 = vmatpush.msra.mxu3 %v5278_v32 }
0x2c6e   : > { %4820 = vmatpush.msra.mxu3 %v5277_v33 }
0x2cd5   : > { %v4747_v1 = vpop.xlane.xlu2 %4746 }
0x2cd6   : > { %v4748_v2 = vmul.f32 %v4747_v1, %v6325_v8 }
0x2cd8   : > { %v4749_v3 = vsub.f32 %v4722_v43, %v4748_v2 }
0x2cda   : > { %v4750_v4 = vmul.f32 %v4749_v3, %v4749_v3 }
0x2cdc   : > { %v4751_v56 = vsel %vm915_vm0, %v4750_v4, 0.0 }
0x2cdd   : > { %4752 = vadd.xlane.f32.xlu2 %v4751_v56 }
0x2d50   : > { %v4753_v14 = vpop.xlane.xlu2 %4752 }
0x2d51   : > { %v4754_v15 = vmul.f32 %v4753_v14, %v6325_v8 }
0x2d53   : > { %v4755_v18 = vadd.f32 1e-06, %v4754_v15 }
0x2d55   : > { %5582 = vrsqrt.f32 %v4755_v18  ;;  %vm4762_vm6 = vweird.f32 %v4755_v18 }
0x2d5b   : > { %v5583_v19 = vpop.eup %5582 }
0x2d5c   : > { %v4757_v0 = vmul.f32 %v5583_v19, %v4755_v18  ;;  %vm4763_vm5 = vweird.f32 %v5583_v19 }
0x2d5d   : > { %vm4764_vm7 = vmor %vm4762_vm6, %vm4763_vm5 }
0x2d5e   : > { %v4758_v21 = vmul.f32 %v5583_v19, %v4757_v0 }
0x2d60   : > { %v4759_v23 = vmul.f32 0.5, %v4758_v21 }
0x2d62   : > { %v4760_v62 = vsub.f32 1.5, %v4759_v23 }
0x2d64   : > { %v4761_v22 = vmul.f32 %v5583_v19, %v4760_v62 }
0x2d66   : > { %v4765_v20 = vsel %vm4764_vm7, %v5583_v19, %v4761_v22 }
0x2d67   : > { %v4766_v11 = vmul.f32 %v4765_v20, %v4749_v3 }
0x2d69   : > { %v4770_v28 = vmul.f32 %v5436_v5, %v4766_v11 }
0x2d6b   : > { %v4774_v29 = vadd.f32 %v5437_v30, %v4770_v28 }
0x2d6d   : > { %5286 = vmatmul.msk.f32.vlgmr.msra.gmra.mxu1 %vm915_vm0, %v4774_v29 }
0x2dea   : > { %v4798_v39 = vpop.f32.mrf.mxu1 }
0x2deb   : > { %v4799_v34 = vadd.f32 %v5438_v35, %v4798_v39 }
0x2ded   : > { %v4801_v40 = vmax.f32 %v4799_v34, 0.0 }
0x2def   : > { %5287 = vmatmul.msk.f32.vlgmr.msra.gmra.mxu3 %vm2836_vm3, %v4801_v40 }
0x2e72   : > { %v4822_v45 = vpop.f32.mrf.mxu3 }
0x2e73   : > { %v4825_v44 = vadd.f32 %v4822_v45, %v4722_v43 }
0x2e75   : > { %v4829_v46 = vadd.f32 %v5439_v41, %v4825_v44 }
0x2e77   : > { %v4832_v27 = vsel %vm915_vm0, %v4829_v46, 0.0 }
0x2e78   : > { %4833 = vadd.xlane.f32.xlu2 %v4832_v27 }
0x2eeb   : > { %v4834_v47 = vpop.xlane.xlu2 %4833 }
0x2eec   : > { %v4835_v36 = vmul.f32 %v4834_v47, %v6325_v8 }
0x2eee   : > { %v4836_v48 = vsub.f32 %v4829_v46, %v4835_v36 }
0x2ef0   : > { %v4837_v49 = vmul.f32 %v4836_v48, %v4836_v48 }
0x2ef2   : > { %v4838_v24 = vsel %vm915_vm0, %v4837_v49, 0.0 }
0x2ef3   : > { %4839 = vadd.xlane.f32.xlu0 %v4838_v24 }
0x2f66   : > { %v4840_v50 = vpop.xlane.xlu0 %4839 }
0x2f67   : > { %v4841_v37 = vmul.f32 %v4840_v50, %v6325_v8 }
0x2f69   : > { %v4842_v51 = vadd.f32 1e-06, %v4841_v37 }
0x2f6b   : > { %5584 = vrsqrt.f32 %v4842_v51  ;;  %vm4849_vm11 = vweird.f32 %v4842_v51 }
0x2f71   : > { %v5585_v52 = vpop.eup %5584 }
0x2f72   : > { %v4844_v53 = vmul.f32 %v5585_v52, %v4842_v51  ;;  %vm4850_vm3 = vweird.f32 %v5585_v52 }
0x2f73   : > { %vm4851_vm12 = vmor %vm4849_vm11, %vm4850_vm3 }
0x2f74   : > { %v4845_v54 = vmul.f32 %v5585_v52, %v4844_v53 }
0x2f76   : > { %v4846_v38 = vmul.f32 0.5, %v4845_v54 }
0x2f78   : > { %v4847_v55 = vsub.f32 1.5, %v4846_v38 }
0x2f7a   : > { %v4848_v26 = vmul.f32 %v5585_v52, %v4847_v55 }
0x2f7c   : > { %v4852_v8 = vsel %vm4851_vm12, %v5585_v52, %v4848_v26 }
0x2f7d   : > { %v4853_v42 = vmul.f32 %v4852_v8, %v4836_v48 }
0x2f7f   : > { %v4857_v60 = vmul.f32 %v5440_v57, %v4853_v42 }
0x2f81   : > { %v4861_v25 = vadd.f32 %v5441_v58, %v4857_v60 }
0x2f83   : > { %4862 = vst.msk [vmem:[%s896_s5] sm:$0xff] %vm915_vm0, %v4861_v25 }
0x2f84   : > { %5886 = shalt.err (!%p5883_p3)
}
0x2f85   : > { %5320 = dma.vmem_to_hbm [thread:$0]  (%p6169_p0), %s4877_s8, 128, %s4879_s14, %s4864_s23  }
0x2f86 PF: > { %s7296_s17 = sld [smem:[#allocation25_spill]]  ;;  %p7298_p8 = scmp.ge.s32.totalorder %s5945_s30, 2 }
0x2f88   : > { %p5352_p9 = pnand %p7298_p8, %p6175_p5 }
0x2f8a   : > { %p5353_p12 = pneg %p5352_p9 }
0x2f8c   : > { %s4890_s27 = sand.u32 1, %s7296_s17  }
0x2f8d   : > { %s4891_s16 = scalar_lea.sflag [#allocation4], %s4890_s27 }
0x2f8e   : > { %5928 = dma.done.wait (%p5353_p12), %s4891_s16, 128  }
0x2f8f   : > { %5930 = vsyncadd (%p5353_p12), %s4891_s16, 4294967168  ;;  %s7299_s30 = sld [smem:[#allocation27_spill]]  ;;  %s7302_s3 = smov %s5937_s28 }
0x2f90   : > { %s7300_s29 = sld [smem:[#allocation26_spill]] }
0x2f91   : > { %s7301_s24 = sld [smem:[#allocation28_spill]] }
0x2f95   : > { %p43_p2 = scmp.ge.s32.totalorder %s7299_s30, 4  }
0x2f96   : > { %s7303_s28 = smov %s7300_s29 }
0x2f97   : > { %s7304_s29 = smov %s7301_s24  ;;  %45 = sbr.rel (!%p43_p2) target bundleno = 32 (0x20), region = 226 }
0x2f9c   :  { %4897 = vsyncpa [#allocation3], 1 }
0x2f9d   :  { %4899 = vsyncpa [#allocation3 + $0x1], 1 }
0x2f9e   :  { %4900 = vsyncpa [#allocation6], 1 }
0x2f9f   :  { %4902 = vsyncpa [#allocation6 + $0x1], 1 }
0x2fa0   :  { %4903 = vsyncpa [#allocation9], 1 }
0x2fa1   :  { %4905 = vsyncpa [#allocation9 + $0x1], 1 }
0x2fa2   :  { %4906 = vsyncpa [#allocation12], 1 }
0x2fa3   :  { %4907 = vsyncpa [#allocation15], 1 }
0x2fa4   :  { %4908 = vsyncpa [#allocation4], 1 }
0x2fa5   :  { %4910 = vsyncpa [#allocation4 + $0x1], 1 }

</bundles_post_ra>
